<compile_context>
chip_gen: v7x
topology: tpu7x:2x2x1
jax: 0.10.0
libtpu: 0.0.40
codegen_flags: <defaults>
</compile_context>

<pallas_src>
import functools
import numpy as np
import jax
import jax.numpy as jnp
from jax import lax
from jax.experimental import pallas as pl
from jax.experimental.pallas import tpu as pltpu


def _round_up(x, m):
    return (x + m - 1) // m * m


def plant_disease_net_pallas(x_nchw, conv_w, conv_b, fc_w, fc_b, *, block_b=None):
    """Forward pass identical to the PyTorch PlantDiseaseNet.

    x_nchw : (N, Cin, H, W) f32       conv_w : (Cout, Cin, 3, 3) f32 (OIHW)
    conv_b : (Cout,) f32              fc_w   : (num_classes, Cout*H*W) f32 (CHW order)
    fc_b   : (num_classes,) f32       returns: (N, num_classes) f32
    """
    N, Cin, H, W = x_nchw.shape
    Cout = conv_w.shape[0]
    NC = fc_w.shape[0]
    P = H * W                       # spatial positions per image
    K = 9 * Cin                     # im2col rows (tap-major, cin fastest) = 27
    Kp = _round_up(K + 1, 8)        # +1 bias row, sublane-aligned
    NCp = _round_up(NC, 128)        # lane-dense output tile width

    # ---- batch blocking: keep >=2 grid steps when batch allows (v7x: 2 TCs) ----
    if block_b is None:
        block_b = min(64, _round_up(N, 8))
        if N >= 16 and _round_up(N, block_b) // block_b < 2:
            block_b = max(8, _round_up(N, 8) // 2)
    block_b = int(max(8, min(_round_up(block_b, 8), _round_up(N, 8))))
    Np = _round_up(N, block_b)
    nb = Np // block_b
    Mb = block_b * P                # lanes of work per grid step
    GUARD = _round_up(W + 8, 128)   # halo so the +-(W+1) tap shifts stay in-bounds
    Lb = Mb + 2 * GUARD

    # --------------- wrapper-side layout prep (cheap; NO im2col) ----------------
    xf = x_nchw.astype(jnp.float32).reshape(N, Cin, P)
    xf = jnp.pad(xf, ((0, Np - N), (0, 0), (0, 0)))
    xf = xf.reshape(nb, block_b, Cin, P).transpose(0, 2, 1, 3).reshape(nb, Cin, Mb)
    xf = jnp.pad(xf, ((0, 0), (0, 0), (GUARD, GUARD)))            # (nb, Cin, Lb)

    # Per-tap validity masks (compile-time constants): zero lanes whose shifted
    # read would cross an image-row / image boundary instead of hitting padding.
    midx = np.arange(Mb)
    mp, mw = midx % P, midx % W
    mrows = []
    for kh in range(3):
        for kw in range(3):
            v = np.ones((Mb,), np.bool_)
            if kh == 0:
                v &= mp >= W
            if kh == 2:
                v &= mp < P - W
            if kw == 0:
                v &= mw != 0
            if kw == 2:
                v &= mw != W - 1
            mrows.append(v)
    masks = jnp.asarray(np.stack(mrows, 0).astype(np.float32))    # (9, Mb)

    # Conv weight -> (Cout, Kp): columns = 27 taps (kh,kw,cin), bias, zero pad.
    w_taps = jnp.transpose(conv_w, (2, 3, 1, 0)).reshape(K, Cout)
    wct = jnp.concatenate(
        [w_taps.astype(jnp.float32),
         conv_b.reshape(1, Cout).astype(jnp.float32),
         jnp.zeros((Kp - K - 1, Cout), jnp.float32)], axis=0)
    wct = jnp.transpose(wct)                                      # (Cout, Kp)

    # FC weight: PyTorch flattens (C,H,W), which is exactly (NC, Cout, P).
    wf3 = fc_w.reshape(NC, Cout, P).astype(jnp.float32)
    bf = fc_b.reshape(1, NC).astype(jnp.float32)

    def kernel(x_ref, mask_ref, wc_ref, wf_ref, bf_ref, o_ref, pat_ref, conv_ref):
        # ---- on-chip im2col: transposed patch slab (Kp, Mb) in VMEM ----
        for kh in range(3):
            for kw in range(3):
                t = kh * 3 + kw
                a = GUARD + (kh - 1) * W + (kw - 1)                # static offset
                sl = x_ref[:, a:a + Mb]                            # (Cin, Mb)
                pat_ref[t * Cin:(t + 1) * Cin, :] = sl * mask_ref[t:t + 1, :]
        # bias row (ones); extra padded rows also ones but hit zero weights.
        pat_ref[K:Kp, :] = jnp.ones((Kp - K, Mb), jnp.float32)

        # ---- conv: single MXU GEMM, transposed; bias folded; lane-dense ReLU ----
        conv_ref[...] = jnp.maximum(
            jnp.dot(wc_ref[...], pat_ref[...],
                    preferred_element_type=jnp.float32), 0.0)     # (Cout, Mb)

        # ---- tiny FC: per-image multiply+reduce in the conv's native layout ----
        cols = []
        for j in range(block_b):
            cj = conv_ref[:, j * P:(j + 1) * P]                    # (Cout, P) aligned
            prod = wf_ref[...] * cj[None, :, :]                    # (NC, Cout, P)
            s = jnp.sum(prod, axis=2)                              # (NC, Cout)
            cols.append(jnp.sum(s, axis=1, keepdims=True))         # (NC, 1)
        out_t = jnp.concatenate(cols, axis=1)                      # (NC, block_b)
        tile = jnp.transpose(out_t) + bf_ref[...]                  # (block_b, NC)
        tile = jnp.concatenate(
            [tile, jnp.zeros((block_b, NCp - NC), jnp.float32)], axis=1)
        o_ref[...] = tile                                          # lane-dense store

    flops = 2 * Np * P * (K + 1) * Cout + 2 * Np * (P * Cout) * NC
    bytes_accessed = 4 * (nb * Cin * Lb + 9 * Mb + Cout * Kp
                          + NC * Cout * P + NC + Np * NCp)

    out = pl.pallas_call(
        kernel,
        out_shape=jax.ShapeDtypeStruct((Np, NCp), jnp.float32),
        grid=(nb,),
        in_specs=[
            pl.BlockSpec((None, Cin, Lb), lambda n: (n, 0, 0)),    # image slab
            pl.BlockSpec((9, Mb), lambda n: (0, 0)),               # tap masks
            pl.BlockSpec((Cout, Kp), lambda n: (0, 0)),            # conv weight+bias
            pl.BlockSpec((NC, Cout, P), lambda n: (0, 0, 0)),      # fc weight
            pl.BlockSpec((1, NC), lambda n: (0, 0)),               # fc bias
        ],
        out_specs=pl.BlockSpec((block_b, NCp), lambda n: (n, 0)),
        scratch_shapes=[pltpu.VMEM((Kp, Mb), jnp.float32),         # patch slab
                        pltpu.VMEM((Cout, Mb), jnp.float32)],      # conv activations
        compiler_params=pltpu.CompilerParams(
            dimension_semantics=("parallel",)),
        cost_estimate=pl.CostEstimate(
            flops=flops, transcendentals=0, bytes_accessed=bytes_accessed),
    )(xf, masks, wct, wf3, bf)

    return out[:N, :NC]


def plant_disease_net_reference(x, conv_w, conv_b, fc_w, fc_b):
    """Pure-JAX reference reproducing the exact PyTorch semantics (NCHW)."""
    y = lax.conv_general_dilated(
        x, conv_w, window_strides=(1, 1), padding=((1, 1), (1, 1)),
        dimension_numbers=("NCHW", "OIHW", "NCHW"))
    y = jnp.maximum(y + conv_b[None, :, None, None], 0.0)
    y = y.reshape(x.shape[0], -1)                 # PyTorch x.view(N, -1): C,H,W order
    return y @ fc_w.T + fc_b


if __name__ == "__main__":
    # Small shapes consistent with the module (3 input channels, 16 conv channels).
    N, Cin, H, W = 16, 3, 16, 16
    Cout, num_classes = 16, 8

    key = jax.random.PRNGKey(0)
    k1, k2, k3, k4, k5 = jax.random.split(key, 5)
    x = jax.random.normal(k1, (N, Cin, H, W), jnp.float32)
    conv_w = 0.05 * jax.random.normal(k2, (Cout, Cin, 3, 3), jnp.float32)
    conv_b = 0.05 * jax.random.normal(k3, (Cout,), jnp.float32)
    fc_w = 0.05 * jax.random.normal(k4, (num_classes, Cout * H * W), jnp.float32)
    fc_b = 0.05 * jax.random.normal(k5, (num_classes,), jnp.float32)

    fwd = jax.jit(functools.partial(plant_disease_net_pallas, block_b=8))
    out = jax.block_until_ready(fwd(x, conv_w, conv_b, fc_w, fc_b))

    ref = plant_disease_net_reference(x, conv_w, conv_b, fc_w, fc_b)
    assert out.shape == (N, num_classes)
    err = float(jnp.max(jnp.abs(out - ref)))
    assert jnp.allclose(out, ref, atol=1e-3, rtol=1e-3), f"max abs err = {err}"
    print("KERNEL_OK")
</pallas_src>

<mosaic_0001>
module attributes {stable_mosaic.version = 11 : i64} {
  func.func @kernel(%arg0: i32, %arg1: memref<1x3x2304xf32, #tpu.memory_space<vmem>>, %arg2: memref<9x2048xf32, #tpu.memory_space<vmem>>, %arg3: memref<16x32xf32, #tpu.memory_space<vmem>>, %arg4: memref<8x16x256xf32, #tpu.memory_space<vmem>>, %arg5: memref<1x8xf32, #tpu.memory_space<vmem>>, %arg6: memref<8x128xf32, #tpu.memory_space<vmem>>, %arg7: memref<32x2048xf32, #tpu.memory_space<vmem>>, %arg8: memref<16x2048xf32, #tpu.memory_space<vmem>>) attributes {dimension_semantics = [#tpu.dimension_semantics<parallel>], iteration_bounds = array<i64: 2>, scalar_prefetch = 0 : i64, scratch_operands = 2 : i64, tpu.core_type = #tpu.core_type<tc>, window_params = [{transform_indices = @transform_0, window_bounds = array<i64: 1, 3, 2304>}, {pipeline_mode = #tpu.pipeline_mode<synchronous>, transform_indices = @transform_1, window_bounds = array<i64: 9, 2048>}, {pipeline_mode = #tpu.pipeline_mode<synchronous>, transform_indices = @transform_2, window_bounds = array<i64: 16, 32>}, {pipeline_mode = #tpu.pipeline_mode<synchronous>, transform_indices = @transform_3, window_bounds = array<i64: 8, 16, 256>}, {pipeline_mode = #tpu.pipeline_mode<synchronous>, transform_indices = @transform_4, window_bounds = array<i64: 1, 8>}, {transform_indices = @transform_5, window_bounds = array<i64: 8, 128>}]} {
    %c0 = arith.constant 0 : index
    %c0_0 = arith.constant 0 : index
    %c111 = arith.constant 111 : index
    %0 = vector.load %arg1[%c0, %c0_0, %c111] : memref<1x3x2304xf32, #tpu.memory_space<vmem>>, vector<1x3x2048xf32>
    %1 = vector.shape_cast %0 : vector<1x3x2048xf32> to vector<3x2048xf32>
    %c0_1 = arith.constant 0 : index
    %c0_2 = arith.constant 0 : index
    %2 = vector.load %arg2[%c0_1, %c0_2] : memref<9x2048xf32, #tpu.memory_space<vmem>>, vector<1x2048xf32>
    %3 = vector.broadcast %2 : vector<1x2048xf32> to vector<3x2048xf32>
    %4 = arith.mulf %1, %3 : vector<3x2048xf32>
    %c0_3 = arith.constant 0 : index
    %c0_4 = arith.constant 0 : index
    %5 = vector.load %arg7[%c0_3, %c0_4] : memref<32x2048xf32, #tpu.memory_space<vmem>>, vector<3x2048xf32>
    tpu.vector_store %arg7[%c0_3, %c0_4], %4 {strides = array<i32>} : memref<32x2048xf32, #tpu.memory_space<vmem>>, vector<3x2048xf32>,
    %c0_5 = arith.constant 0 : index
    %c0_6 = arith.constant 0 : index
    %c112 = arith.constant 112 : index
    %6 = vector.load %arg1[%c0_5, %c0_6, %c112] : memref<1x3x2304xf32, #tpu.memory_space<vmem>>, vector<1x3x2048xf32>
    %7 = vector.shape_cast %6 : vector<1x3x2048xf32> to vector<3x2048xf32>
    %c1 = arith.constant 1 : index
    %c0_7 = arith.constant 0 : index
    %8 = vector.load %arg2[%c1, %c0_7] : memref<9x2048xf32, #tpu.memory_space<vmem>>, vector<1x2048xf32>
    %9 = vector.broadcast %8 : vector<1x2048xf32> to vector<3x2048xf32>
    %10 = arith.mulf %7, %9 : vector<3x2048xf32>
    %c3 = arith.constant 3 : index
    %c0_8 = arith.constant 0 : index
    %11 = vector.load %arg7[%c3, %c0_8] : memref<32x2048xf32, #tpu.memory_space<vmem>>, vector<3x2048xf32>
    tpu.vector_store %arg7[%c3, %c0_8], %10 {strides = array<i32>} : memref<32x2048xf32, #tpu.memory_space<vmem>>, vector<3x2048xf32>,
    %c0_9 = arith.constant 0 : index
    %c0_10 = arith.constant 0 : index
    %c113 = arith.constant 113 : index
    %12 = vector.load %arg1[%c0_9, %c0_10, %c113] : memref<1x3x2304xf32, #tpu.memory_space<vmem>>, vector<1x3x2048xf32>
    %13 = vector.shape_cast %12 : vector<1x3x2048xf32> to vector<3x2048xf32>
    %c2 = arith.constant 2 : index
    %c0_11 = arith.constant 0 : index
    %14 = vector.load %arg2[%c2, %c0_11] : memref<9x2048xf32, #tpu.memory_space<vmem>>, vector<1x2048xf32>
    %15 = vector.broadcast %14 : vector<1x2048xf32> to vector<3x2048xf32>
    %16 = arith.mulf %13, %15 : vector<3x2048xf32>
    %c6 = arith.constant 6 : index
    %c0_12 = arith.constant 0 : index
    %17 = vector.load %arg7[%c6, %c0_12] : memref<32x2048xf32, #tpu.memory_space<vmem>>, vector<3x2048xf32>
    tpu.vector_store %arg7[%c6, %c0_12], %16 {strides = array<i32>} : memref<32x2048xf32, #tpu.memory_space<vmem>>, vector<3x2048xf32>,
    %c0_13 = arith.constant 0 : index
    %c0_14 = arith.constant 0 : index
    %c127 = arith.constant 127 : index
    %18 = vector.load %arg1[%c0_13, %c0_14, %c127] : memref<1x3x2304xf32, #tpu.memory_space<vmem>>, vector<1x3x2048xf32>
    %19 = vector.shape_cast %18 : vector<1x3x2048xf32> to vector<3x2048xf32>
    %c3_15 = arith.constant 3 : index
    %c0_16 = arith.constant 0 : index
    %20 = vector.load %arg2[%c3_15, %c0_16] : memref<9x2048xf32, #tpu.memory_space<vmem>>, vector<1x2048xf32>
    %21 = vector.broadcast %20 : vector<1x2048xf32> to vector<3x2048xf32>
    %22 = arith.mulf %19, %21 : vector<3x2048xf32>
    %c9 = arith.constant 9 : index
    %c0_17 = arith.constant 0 : index
    %23 = vector.load %arg7[%c9, %c0_17] : memref<32x2048xf32, #tpu.memory_space<vmem>>, vector<3x2048xf32>
    tpu.vector_store %arg7[%c9, %c0_17], %22 {strides = array<i32>} : memref<32x2048xf32, #tpu.memory_space<vmem>>, vector<3x2048xf32>,
    %c0_18 = arith.constant 0 : index
    %c0_19 = arith.constant 0 : index
    %c128 = arith.constant 128 : index
    %24 = vector.load %arg1[%c0_18, %c0_19, %c128] : memref<1x3x2304xf32, #tpu.memory_space<vmem>>, vector<1x3x2048xf32>
    %25 = vector.shape_cast %24 : vector<1x3x2048xf32> to vector<3x2048xf32>
    %c4 = arith.constant 4 : index
    %c0_20 = arith.constant 0 : index
    %26 = vector.load %arg2[%c4, %c0_20] : memref<9x2048xf32, #tpu.memory_space<vmem>>, vector<1x2048xf32>
    %27 = vector.broadcast %26 : vector<1x2048xf32> to vector<3x2048xf32>
    %28 = arith.mulf %25, %27 : vector<3x2048xf32>
    %c12 = arith.constant 12 : index
    %c0_21 = arith.constant 0 : index
    %29 = vector.load %arg7[%c12, %c0_21] : memref<32x2048xf32, #tpu.memory_space<vmem>>, vector<3x2048xf32>
    tpu.vector_store %arg7[%c12, %c0_21], %28 {strides = array<i32>} : memref<32x2048xf32, #tpu.memory_space<vmem>>, vector<3x2048xf32>,
    %c0_22 = arith.constant 0 : index
    %c0_23 = arith.constant 0 : index
    %c129 = arith.constant 129 : index
    %30 = vector.load %arg1[%c0_22, %c0_23, %c129] : memref<1x3x2304xf32, #tpu.memory_space<vmem>>, vector<1x3x2048xf32>
    %31 = vector.shape_cast %30 : vector<1x3x2048xf32> to vector<3x2048xf32>
    %c5 = arith.constant 5 : index
    %c0_24 = arith.constant 0 : index
    %32 = vector.load %arg2[%c5, %c0_24] : memref<9x2048xf32, #tpu.memory_space<vmem>>, vector<1x2048xf32>
    %33 = vector.broadcast %32 : vector<1x2048xf32> to vector<3x2048xf32>
    %34 = arith.mulf %31, %33 : vector<3x2048xf32>
    %c15 = arith.constant 15 : index
    %c0_25 = arith.constant 0 : index
    %35 = vector.load %arg7[%c15, %c0_25] : memref<32x2048xf32, #tpu.memory_space<vmem>>, vector<3x2048xf32>
    tpu.vector_store %arg7[%c15, %c0_25], %34 {strides = array<i32>} : memref<32x2048xf32, #tpu.memory_space<vmem>>, vector<3x2048xf32>,
    %c0_26 = arith.constant 0 : index
    %c0_27 = arith.constant 0 : index
    %c143 = arith.constant 143 : index
    %36 = vector.load %arg1[%c0_26, %c0_27, %c143] : memref<1x3x2304xf32, #tpu.memory_space<vmem>>, vector<1x3x2048xf32>
    %37 = vector.shape_cast %36 : vector<1x3x2048xf32> to vector<3x2048xf32>
    %c6_28 = arith.constant 6 : index
    %c0_29 = arith.constant 0 : index
    %38 = vector.load %arg2[%c6_28, %c0_29] : memref<9x2048xf32, #tpu.memory_space<vmem>>, vector<1x2048xf32>
    %39 = vector.broadcast %38 : vector<1x2048xf32> to vector<3x2048xf32>
    %40 = arith.mulf %37, %39 : vector<3x2048xf32>
    %c18 = arith.constant 18 : index
    %c0_30 = arith.constant 0 : index
    %41 = vector.load %arg7[%c18, %c0_30] : memref<32x2048xf32, #tpu.memory_space<vmem>>, vector<3x2048xf32>
    tpu.vector_store %arg7[%c18, %c0_30], %40 {strides = array<i32>} : memref<32x2048xf32, #tpu.memory_space<vmem>>, vector<3x2048xf32>,
    %c0_31 = arith.constant 0 : index
    %c0_32 = arith.constant 0 : index
    %c144 = arith.constant 144 : index
    %42 = vector.load %arg1[%c0_31, %c0_32, %c144] : memref<1x3x2304xf32, #tpu.memory_space<vmem>>, vector<1x3x2048xf32>
    %43 = vector.shape_cast %42 : vector<1x3x2048xf32> to vector<3x2048xf32>
    %c7 = arith.constant 7 : index
    %c0_33 = arith.constant 0 : index
    %44 = vector.load %arg2[%c7, %c0_33] : memref<9x2048xf32, #tpu.memory_space<vmem>>, vector<1x2048xf32>
    %45 = vector.broadcast %44 : vector<1x2048xf32> to vector<3x2048xf32>
    %46 = arith.mulf %43, %45 : vector<3x2048xf32>
    %c21 = arith.constant 21 : index
    %c0_34 = arith.constant 0 : index
    %47 = vector.load %arg7[%c21, %c0_34] : memref<32x2048xf32, #tpu.memory_space<vmem>>, vector<3x2048xf32>
    tpu.vector_store %arg7[%c21, %c0_34], %46 {strides = array<i32>} : memref<32x2048xf32, #tpu.memory_space<vmem>>, vector<3x2048xf32>,
    %c0_35 = arith.constant 0 : index
    %c0_36 = arith.constant 0 : index
    %c145 = arith.constant 145 : index
    %48 = vector.load %arg1[%c0_35, %c0_36, %c145] : memref<1x3x2304xf32, #tpu.memory_space<vmem>>, vector<1x3x2048xf32>
    %49 = vector.shape_cast %48 : vector<1x3x2048xf32> to vector<3x2048xf32>
    %c8 = arith.constant 8 : index
    %c0_37 = arith.constant 0 : index
    %50 = vector.load %arg2[%c8, %c0_37] : memref<9x2048xf32, #tpu.memory_space<vmem>>, vector<1x2048xf32>
    %51 = vector.broadcast %50 : vector<1x2048xf32> to vector<3x2048xf32>
    %52 = arith.mulf %49, %51 : vector<3x2048xf32>
    %c24 = arith.constant 24 : index
    %c0_38 = arith.constant 0 : index
    %53 = vector.load %arg7[%c24, %c0_38] : memref<32x2048xf32, #tpu.memory_space<vmem>>, vector<3x2048xf32>
    tpu.vector_store %arg7[%c24, %c0_38], %52 {strides = array<i32>} : memref<32x2048xf32, #tpu.memory_space<vmem>>, vector<3x2048xf32>,
    %cst = arith.constant 1.000000e+00 : f32
    %54 = vector.broadcast %cst : f32 to vector<5x2048xf32>
    %c27 = arith.constant 27 : index
    %c0_39 = arith.constant 0 : index
    %55 = vector.load %arg7[%c27, %c0_39] : memref<32x2048xf32, #tpu.memory_space<vmem>>, vector<5x2048xf32>
    tpu.vector_store %arg7[%c27, %c0_39], %54 {strides = array<i32>} : memref<32x2048xf32, #tpu.memory_space<vmem>>, vector<5x2048xf32>,
    %c0_40 = arith.constant 0 : index
    %c0_41 = arith.constant 0 : index
    %56 = vector.load %arg3[%c0_40, %c0_41] : memref<16x32xf32, #tpu.memory_space<vmem>>, vector<16x32xf32>
    %c0_42 = arith.constant 0 : index
    %c0_43 = arith.constant 0 : index
    %57 = vector.load %arg7[%c0_42, %c0_43] : memref<32x2048xf32, #tpu.memory_space<vmem>>, vector<32x2048xf32>
    %cst_44 = arith.constant dense<0.000000e+00> : vector<16x2048xf32>
    %58 = tpu.matmul %56, %57, %cst_44 {dimension_numbers = #tpu.dot_dimension_numbers<[1], [0], [0], [1], [0, 0, 1, 1], [], []>} : vector<16x32xf32>, vector<32x2048xf32>, vector<16x2048xf32> -> vector<16x2048xf32>
    %cst_45 = arith.constant 0.000000e+00 : f32
    %59 = vector.broadcast %cst_45 : f32 to vector<16x2048xf32>
    %60 = arith.maximumf %58, %59 : vector<16x2048xf32>
    %c0_46 = arith.constant 0 : index
    %c0_47 = arith.constant 0 : index
    %61 = vector.load %arg8[%c0_46, %c0_47] : memref<16x2048xf32, #tpu.memory_space<vmem>>, vector<16x2048xf32>
    tpu.vector_store %arg8[%c0_46, %c0_47], %60 {strides = array<i32>} : memref<16x2048xf32, #tpu.memory_space<vmem>>, vector<16x2048xf32>,
    %c0_48 = arith.constant 0 : index
    %c0_49 = arith.constant 0 : index
    %62 = vector.load %arg8[%c0_48, %c0_49] : memref<16x2048xf32, #tpu.memory_space<vmem>>, vector<16x256xf32>
    %c0_50 = arith.constant 0 : index
    %c0_51 = arith.constant 0 : index
    %c0_52 = arith.constant 0 : index
    %63 = vector.load %arg4[%c0_50, %c0_51, %c0_52] : memref<8x16x256xf32, #tpu.memory_space<vmem>>, vector<8x16x256xf32>
    %64 = vector.shape_cast %62 : vector<16x256xf32> to vector<1x16x256xf32>
    %65 = vector.broadcast %64 : vector<1x16x256xf32> to vector<8x16x256xf32>
    %66 = arith.mulf %63, %65 : vector<8x16x256xf32>
    %cst_53 = arith.constant dense<0.000000e+00> : vector<8x16xf32>
    %67 = vector.multi_reduction <add>, %66, %cst_53 [2] : vector<8x16x256xf32> to vector<8x16xf32>
    %cst_54 = arith.constant dense<0.000000e+00> : vector<8xf32>
    %68 = vector.multi_reduction <add>, %67, %cst_54 [1] : vector<8x16xf32> to vector<8xf32>
    %69 = vector.shape_cast %68 : vector<8xf32> to vector<8x1xf32>
    %c0_55 = arith.constant 0 : index
    %c256 = arith.constant 256 : index
    %70 = vector.load %arg8[%c0_55, %c256] : memref<16x2048xf32, #tpu.memory_space<vmem>>, vector<16x256xf32>
    %c0_56 = arith.constant 0 : index
    %c0_57 = arith.constant 0 : index
    %c0_58 = arith.constant 0 : index
    %71 = vector.load %arg4[%c0_56, %c0_57, %c0_58] : memref<8x16x256xf32, #tpu.memory_space<vmem>>, vector<8x16x256xf32>
    %72 = vector.shape_cast %70 : vector<16x256xf32> to vector<1x16x256xf32>
    %73 = vector.broadcast %72 : vector<1x16x256xf32> to vector<8x16x256xf32>
    %74 = arith.mulf %71, %73 : vector<8x16x256xf32>
    %cst_59 = arith.constant dense<0.000000e+00> : vector<8x16xf32>
    %75 = vector.multi_reduction <add>, %74, %cst_59 [2] : vector<8x16x256xf32> to vector<8x16xf32>
    %cst_60 = arith.constant dense<0.000000e+00> : vector<8xf32>
    %76 = vector.multi_reduction <add>, %75, %cst_60 [1] : vector<8x16xf32> to vector<8xf32>
    %77 = vector.shape_cast %76 : vector<8xf32> to vector<8x1xf32>
    %c0_61 = arith.constant 0 : index
    %c512 = arith.constant 512 : index
    %78 = vector.load %arg8[%c0_61, %c512] : memref<16x2048xf32, #tpu.memory_space<vmem>>, vector<16x256xf32>
    %c0_62 = arith.constant 0 : index
    %c0_63 = arith.constant 0 : index
    %c0_64 = arith.constant 0 : index
    %79 = vector.load %arg4[%c0_62, %c0_63, %c0_64] : memref<8x16x256xf32, #tpu.memory_space<vmem>>, vector<8x16x256xf32>
    %80 = vector.shape_cast %78 : vector<16x256xf32> to vector<1x16x256xf32>
    %81 = vector.broadcast %80 : vector<1x16x256xf32> to vector<8x16x256xf32>
    %82 = arith.mulf %79, %81 : vector<8x16x256xf32>
    %cst_65 = arith.constant dense<0.000000e+00> : vector<8x16xf32>
    %83 = vector.multi_reduction <add>, %82, %cst_65 [2] : vector<8x16x256xf32> to vector<8x16xf32>
    %cst_66 = arith.constant dense<0.000000e+00> : vector<8xf32>
    %84 = vector.multi_reduction <add>, %83, %cst_66 [1] : vector<8x16xf32> to vector<8xf32>
    %85 = vector.shape_cast %84 : vector<8xf32> to vector<8x1xf32>
    %c0_67 = arith.constant 0 : index
    %c768 = arith.constant 768 : index
    %86 = vector.load %arg8[%c0_67, %c768] : memref<16x2048xf32, #tpu.memory_space<vmem>>, vector<16x256xf32>
    %c0_68 = arith.constant 0 : index
    %c0_69 = arith.constant 0 : index
    %c0_70 = arith.constant 0 : index
    %87 = vector.load %arg4[%c0_68, %c0_69, %c0_70] : memref<8x16x256xf32, #tpu.memory_space<vmem>>, vector<8x16x256xf32>
    %88 = vector.shape_cast %86 : vector<16x256xf32> to vector<1x16x256xf32>
    %89 = vector.broadcast %88 : vector<1x16x256xf32> to vector<8x16x256xf32>
    %90 = arith.mulf %87, %89 : vector<8x16x256xf32>
    %cst_71 = arith.constant dense<0.000000e+00> : vector<8x16xf32>
    %91 = vector.multi_reduction <add>, %90, %cst_71 [2] : vector<8x16x256xf32> to vector<8x16xf32>
    %cst_72 = arith.constant dense<0.000000e+00> : vector<8xf32>
    %92 = vector.multi_reduction <add>, %91, %cst_72 [1] : vector<8x16xf32> to vector<8xf32>
    %93 = vector.shape_cast %92 : vector<8xf32> to vector<8x1xf32>
    %c0_73 = arith.constant 0 : index
    %c1024 = arith.constant 1024 : index
    %94 = vector.load %arg8[%c0_73, %c1024] : memref<16x2048xf32, #tpu.memory_space<vmem>>, vector<16x256xf32>
    %c0_74 = arith.constant 0 : index
    %c0_75 = arith.constant 0 : index
    %c0_76 = arith.constant 0 : index
    %95 = vector.load %arg4[%c0_74, %c0_75, %c0_76] : memref<8x16x256xf32, #tpu.memory_space<vmem>>, vector<8x16x256xf32>
    %96 = vector.shape_cast %94 : vector<16x256xf32> to vector<1x16x256xf32>
    %97 = vector.broadcast %96 : vector<1x16x256xf32> to vector<8x16x256xf32>
    %98 = arith.mulf %95, %97 : vector<8x16x256xf32>
    %cst_77 = arith.constant dense<0.000000e+00> : vector<8x16xf32>
    %99 = vector.multi_reduction <add>, %98, %cst_77 [2] : vector<8x16x256xf32> to vector<8x16xf32>
    %cst_78 = arith.constant dense<0.000000e+00> : vector<8xf32>
    %100 = vector.multi_reduction <add>, %99, %cst_78 [1] : vector<8x16xf32> to vector<8xf32>
    %101 = vector.shape_cast %100 : vector<8xf32> to vector<8x1xf32>
    %c0_79 = arith.constant 0 : index
    %c1280 = arith.constant 1280 : index
    %102 = vector.load %arg8[%c0_79, %c1280] : memref<16x2048xf32, #tpu.memory_space<vmem>>, vector<16x256xf32>
    %c0_80 = arith.constant 0 : index
    %c0_81 = arith.constant 0 : index
    %c0_82 = arith.constant 0 : index
    %103 = vector.load %arg4[%c0_80, %c0_81, %c0_82] : memref<8x16x256xf32, #tpu.memory_space<vmem>>, vector<8x16x256xf32>
    %104 = vector.shape_cast %102 : vector<16x256xf32> to vector<1x16x256xf32>
    %105 = vector.broadcast %104 : vector<1x16x256xf32> to vector<8x16x256xf32>
    %106 = arith.mulf %103, %105 : vector<8x16x256xf32>
    %cst_83 = arith.constant dense<0.000000e+00> : vector<8x16xf32>
    %107 = vector.multi_reduction <add>, %106, %cst_83 [2] : vector<8x16x256xf32> to vector<8x16xf32>
    %cst_84 = arith.constant dense<0.000000e+00> : vector<8xf32>
    %108 = vector.multi_reduction <add>, %107, %cst_84 [1] : vector<8x16xf32> to vector<8xf32>
    %109 = vector.shape_cast %108 : vector<8xf32> to vector<8x1xf32>
    %c0_85 = arith.constant 0 : index
    %c1536 = arith.constant 1536 : index
    %110 = vector.load %arg8[%c0_85, %c1536] : memref<16x2048xf32, #tpu.memory_space<vmem>>, vector<16x256xf32>
    %c0_86 = arith.constant 0 : index
    %c0_87 = arith.constant 0 : index
    %c0_88 = arith.constant 0 : index
    %111 = vector.load %arg4[%c0_86, %c0_87, %c0_88] : memref<8x16x256xf32, #tpu.memory_space<vmem>>, vector<8x16x256xf32>
    %112 = vector.shape_cast %110 : vector<16x256xf32> to vector<1x16x256xf32>
    %113 = vector.broadcast %112 : vector<1x16x256xf32> to vector<8x16x256xf32>
    %114 = arith.mulf %111, %113 : vector<8x16x256xf32>
    %cst_89 = arith.constant dense<0.000000e+00> : vector<8x16xf32>
    %115 = vector.multi_reduction <add>, %114, %cst_89 [2] : vector<8x16x256xf32> to vector<8x16xf32>
    %cst_90 = arith.constant dense<0.000000e+00> : vector<8xf32>
    %116 = vector.multi_reduction <add>, %115, %cst_90 [1] : vector<8x16xf32> to vector<8xf32>
    %117 = vector.shape_cast %116 : vector<8xf32> to vector<8x1xf32>
    %c0_91 = arith.constant 0 : index
    %c1792 = arith.constant 1792 : index
    %118 = vector.load %arg8[%c0_91, %c1792] : memref<16x2048xf32, #tpu.memory_space<vmem>>, vector<16x256xf32>
    %c0_92 = arith.constant 0 : index
    %c0_93 = arith.constant 0 : index
    %c0_94 = arith.constant 0 : index
    %119 = vector.load %arg4[%c0_92, %c0_93, %c0_94] : memref<8x16x256xf32, #tpu.memory_space<vmem>>, vector<8x16x256xf32>
    %120 = vector.shape_cast %118 : vector<16x256xf32> to vector<1x16x256xf32>
    %121 = vector.broadcast %120 : vector<1x16x256xf32> to vector<8x16x256xf32>
    %122 = arith.mulf %119, %121 : vector<8x16x256xf32>
    %cst_95 = arith.constant dense<0.000000e+00> : vector<8x16xf32>
    %123 = vector.multi_reduction <add>, %122, %cst_95 [2] : vector<8x16x256xf32> to vector<8x16xf32>
    %cst_96 = arith.constant dense<0.000000e+00> : vector<8xf32>
    %124 = vector.multi_reduction <add>, %123, %cst_96 [1] : vector<8x16xf32> to vector<8xf32>
    %125 = vector.shape_cast %124 : vector<8xf32> to vector<8x1xf32>
    %126 = tpu.concatenate %69, %77, %85, %93, %101, %109, %117, %125 in 1 : vector<8x1xf32>, vector<8x1xf32>, vector<8x1xf32>, vector<8x1xf32>, vector<8x1xf32>, vector<8x1xf32>, vector<8x1xf32>, vector<8x1xf32> -> vector<8x8xf32>
    %127 = tpu.transpose %126, [1, 0] : vector<8x8xf32> -> vector<8x8xf32>
    %c0_97 = arith.constant 0 : index
    %c0_98 = arith.constant 0 : index
    %128 = vector.load %arg5[%c0_97, %c0_98] : memref<1x8xf32, #tpu.memory_space<vmem>>, vector<1x8xf32>
    %129 = vector.broadcast %128 : vector<1x8xf32> to vector<8x8xf32>
    %130 = arith.addf %127, %129 : vector<8x8xf32>
    %cst_99 = arith.constant 0.000000e+00 : f32
    %131 = vector.broadcast %cst_99 : f32 to vector<8x120xf32>
    %132 = tpu.concatenate %130, %131 in 1 : vector<8x8xf32>, vector<8x120xf32> -> vector<8x128xf32>
    %c0_100 = arith.constant 0 : index
    %c0_101 = arith.constant 0 : index
    %133 = vector.load %arg6[%c0_100, %c0_101] : memref<8x128xf32, #tpu.memory_space<vmem>>, vector<8x128xf32>
    tpu.vector_store %arg6[%c0_100, %c0_101], %132 {strides = array<i32>} : memref<8x128xf32, #tpu.memory_space<vmem>>, vector<8x128xf32>,
    return
  }
  func.func @transform_0(%arg0: i32) -> (i32, i32, i32) {
    %c0_i32 = arith.constant 0 : i32
    %c0_i32_0 = arith.constant 0 : i32
    %c0_i32_1 = arith.constant 0 : i32
    return %arg0, %c0_i32, %c0_i32_0 : i32, i32, i32
  }
  func.func @transform_1(%arg0: i32) -> (i32, i32) {
    %c0_i32 = arith.constant 0 : i32
    %c0_i32_0 = arith.constant 0 : i32
    %c0_i32_1 = arith.constant 0 : i32
    return %c0_i32, %c0_i32_0 : i32, i32
  }
  func.func @transform_2(%arg0: i32) -> (i32, i32) {
    %c0_i32 = arith.constant 0 : i32
    %c0_i32_0 = arith.constant 0 : i32
    %c0_i32_1 = arith.constant 0 : i32
    return %c0_i32, %c0_i32_0 : i32, i32
  }
  func.func @transform_3(%arg0: i32) -> (i32, i32, i32) {
    %c0_i32 = arith.constant 0 : i32
    %c0_i32_0 = arith.constant 0 : i32
    %c0_i32_1 = arith.constant 0 : i32
    %c0_i32_2 = arith.constant 0 : i32
    return %c0_i32, %c0_i32_0, %c0_i32_1 : i32, i32, i32
  }
  func.func @transform_4(%arg0: i32) -> (i32, i32) {
    %c0_i32 = arith.constant 0 : i32
    %c0_i32_0 = arith.constant 0 : i32
    %c0_i32_1 = arith.constant 0 : i32
    return %c0_i32, %c0_i32_0 : i32, i32
  }
  func.func @transform_5(%arg0: i32) -> (i32, i32) {
    %c0_i32 = arith.constant 0 : i32
    %c0_i32_0 = arith.constant 0 : i32
    return %arg0, %c0_i32 : i32, i32
  }
}

</mosaic_0001>

<bundles_post_ra>
// kernel: plant_disease_net_pallas.1
= control target key start
LH: loop header
LB: loop body
LE: loop exit
PB: predicated region body
PF: predicated region fallthrough
CT: control target
= control target key end

     0   :  { %s5072_s18 = smov 0   ;;  %s8126_s0 = inlined_call_operand.vmem [shape: f32[2,3,2304], index: 0, kind: input, shape index: {}]   ;;  %s8127_s1 = inlined_call_operand.vmem [shape: f32[9,2048], index: 1, kind: input, shape index: {}]   ;;  %s8128_s2 = inlined_call_operand.vmem [shape: f32[16,32], index: 2, kind: input, shape index: {}]   ;;  %s8129_s3 = inlined_call_operand.vmem [shape: f32[8,16,256], index: 3, kind: input, shape index: {}]   ;;  %s8130_s4 = inlined_call_operand.vmem [shape: f32[1,8], index: 4, kind: input, shape index: {}]   ;;  %s8131_s5 = inlined_call_operand.vmem [shape: f32[16,128], index: 5, kind: output, shape index: {}]  }
   0x1 LB: > { %s4872_s19 = sadd.s32 4294967295, %s5030_s18   ;;  %p4876_p0 = scmp.ge.s32.totalorder %s5030_s18, 1  ;;  %s5030_s18 = sphi %s5072_s18, %s15_s18  }
   0x2   : > { %p187_p1 = scmp.lt.s32.totalorder %s5030_s18, 3 }
   0x4   : > { %p188_p2 = pnand %p4876_p0, %p187_p1 }
   0x6   : > { %191 = sbr.rel (%p188_p2) target bundleno = 1422 (0x58e), region = 40 }
   0xd   : > { %v232_v0 = vld [vmem:[%s8127_s1] ss:$8 sm:$0xf]  ;;  %v241_v2 = vlaneseq  ;;  %s5032_s28 = smov 111   ;;  %s5033_s12 = smov 112   ;;  %vm337_vm0 = vcmask 908288  }
   0xe   : > { %v233_v1 = vld [vmem:[%s8127_s1] ss:$8 sm:$0xf0]  ;;  %v4881_v35 = vld [vmem:[%s8127_s1 + $0x1] ss:$8 sm:$0xf] }
   0xf   : > { %v4879_v3 = vld [vmem:[%s8127_s1 + $0x40] ss:$8 sm:$0xf]  ;;  %v234_v4 = vor.u32 %v233_v1, %v232_v0  ;;  %v242_v5 = vshrl.u32 %v241_v2, 7  ;;  %v3389_v6 = vand.u32 127, %v241_v2  ;;  %s5034_s23 = smov 113  }
  0x10   : > { %v4880_v7 = vld [vmem:[%s8127_s1 + $0x40] ss:$8 sm:$0xf0]  ;;  %v4882_v36 = vld [vmem:[%s8127_s1 + $0x1] ss:$8 sm:$0xf0] }
  0x11   : > { %v238_v8 = vor.u32 %v4880_v7, %v4879_v3  ;;  %v5092_v9 = vsub.s32 4, %v242_v5  ;;  %v5094_v10 = vsub.s32 5, %v242_v5  ;;  %v5096_v11 = vsub.s32 %v3389_v6, %v242_v5  ;;  %v4883_v51 = vld [vmem:[%s8127_s1 + $0x41] ss:$8 sm:$0xf]  ;;  %s5035_s8 = smov 127  }
  0x12   : > { %v3394_v12 = vadd.s32 4294967288, %v3389_v6  ;;  %v5098_v13 = vsub.s32 0, %v242_v5  ;;  %v5100_v14 = vsub.s32 1, %v242_v5  ;;  %v5102_v15 = vsub.s32 6, %v242_v5  ;;  %s5036_s9 = smov 1   ;;  %p214_p3 = scmp.lt.s32.totalorder %s4872_s19, 1 }
  0x13   : > { %8161 = vst [vmem:[#allocation4_spill] sm:$0xff] %v5096_v11  ;;  %v5104_v16 = vsub.s32 7, %v242_v5  ;;  %v260_v17 = vrot.slane %v234_v4, %v5092_v9  ;;  %v264_v18 = vrot.slane %v234_v4, %v5094_v10  ;;  %v5110_v20 = vsub.s32 2, %v242_v5  ;;  %v4884_v52 = vld [vmem:[%s8127_s1 + $0x41] ss:$8 sm:$0xf0] }
  0x14   : > { %v5108_v19 = vsub.s32 %v3394_v12, %v242_v5  ;;  %v244_v21 = vrot.slane %v234_v4, %v5098_v13  ;;  %v248_v22 = vrot.slane %v234_v4, %v5100_v14  ;;  %v268_v23 = vrot.slane %v234_v4, %v5102_v15  ;;  %v4885_v2 = vld [vmem:[%s8127_s1 + $0x2] ss:$8 sm:$0xf]  ;;  %s8259_s19 = smov (!%p214_p3, %s4872_s19), 1  ;;  %s5037_s15 = smov 17  }
  0x15   : > { %v272_v24 = vrot.slane %v234_v4, %v5104_v16  ;;  %v307_v25 = vcombine.low %v260_v17, %v264_v18  ;;  %v252_v26 = vrot.slane %v234_v4, %v5110_v20  ;;  %v5117_v27 = vsub.s32 3, %v242_v5  ;;  %v4886_v3 = vld [vmem:[%s8127_s1 + $0x2] ss:$8 sm:$0xf0]  ;;  %s4996_s10 = smul.u32 72, %s8259_s19  ;;  %s5038_s16 = smov 16  }
  0x16   : > { %8162 = vst [vmem:[#allocation5_spill] sm:$0xff] %v5108_v19  ;;  %v305_v28 = vcombine.low %v244_v21, %v248_v22  ;;  %v284_v31 = vrot.slane %v238_v8, %v5110_v20  ;;  %v276_v33 = vrot.slane %v238_v8, %v5098_v13  ;;  %v280_v34 = vrot.slane %v238_v8, %v5100_v14  ;;  %s5039_s17 = smov 15   ;;  %s4878_s26 = sshll.u32 %s8259_s19, 3 }
  0x17   : > { %317 = vrot.lane.b32.xlu1 %v307_v25, %s5032_s28  ;;  %v308_v29 = vcombine.low %v268_v23, %v272_v24  ;;  %v256_v30 = vrot.slane %v234_v4, %v5117_v27  ;;  %v288_v32 = vrot.slane %v238_v8, %v5117_v27  ;;  %v300_v39 = vrot.slane %v238_v8, %v5102_v15  ;;  %s5266_s14 = scalar_lea.vmem %s8126_s0, %s4996_s10  ;;  %s222_s6 = scalar_lea.vmem %s8131_s5, %s4878_s26 }
  0x18   : > { %313 = vrot.lane.b32.xlu0 %v305_v28, %s5032_s28  ;;  %v304_v40 = vrot.slane %v238_v8, %v5104_v16  ;;  %v484_v41 = vor.u32 %v4882_v36, %v4881_v35  ;;  %v309_v42 = vcombine.low %v276_v33, %v280_v34  ;;  %v292_v43 = vrot.slane %v238_v8, %v5092_v9  ;;  %v4888_v28 = vld [vmem:[%s8127_s1 + $0x42] ss:$8 sm:$0xf0] }
  0x19   : > { %v306_v37 = vcombine.low %v252_v26, %v256_v30  ;;  %v310_v38 = vcombine.low %v284_v31, %v288_v32  ;;  %v296_v44 = vrot.slane %v238_v8, %v5094_v10  ;;  %v488_v56 = vor.u32 %v4884_v52, %v4883_v51  ;;  %v4887_v26 = vld [vmem:[%s8127_s1 + $0x42] ss:$8 sm:$0xf]  ;;  %v4897_v51 = vld [vmem:[%s8127_s1 + $0x5] ss:$8 sm:$0xf] }
  0x1a   : > { %v312_v45 = vcombine.low %v300_v39, %v304_v40  ;;  %v494_v46 = vrot.slane %v484_v41, %v5098_v13  ;;  %v498_v47 = vrot.slane %v484_v41, %v5100_v14  ;;  %v502_v49 = vrot.slane %v484_v41, %v5110_v20  ;;  %v4898_v52 = vld [vmem:[%s8127_s1 + $0x5] ss:$8 sm:$0xf0] }
  0x1b   : > { %319 = vrot.lane.b32.xlu1 %v308_v29, %s5032_s28  ;;  %v311_v48 = vcombine.low %v292_v43, %v296_v44  ;;  %v506_v50 = vrot.slane %v484_v41, %v5117_v27  ;;  %v510_v54 = vrot.slane %v484_v41, %v5092_v9  ;;  %v514_v55 = vrot.slane %v484_v41, %v5094_v10  ;;  %v4890_v43 = vld [vmem:[%s8127_s1 + $0x3] ss:$8 sm:$0xf0] }
  0x1c   : > { %315 = vrot.lane.b32.xlu0 %v306_v37, %s5032_s28  ;;  %v555_v53 = vcombine.low %v494_v46, %v498_v47  ;;  %v518_v58 = vrot.slane %v484_v41, %v5102_v15  ;;  %v522_v59 = vrot.slane %v484_v41, %v5104_v16  ;;  %v526_v61 = vrot.slane %v488_v56, %v5098_v13 }
  0x1d   : > { %v556_v57 = vcombine.low %v502_v49, %v506_v50  ;;  %v557_v60 = vcombine.low %v510_v54, %v514_v55  ;;  %v530_v62 = vrot.slane %v488_v56, %v5100_v14  ;;  %v534_v0 = vrot.slane %v488_v56, %v5110_v20 }
  0x1e   : > { %v558_v63 = vcombine.low %v518_v58, %v522_v59  ;;  %v538_v1 = vrot.slane %v488_v56, %v5117_v27  ;;  %v542_v5 = vrot.slane %v488_v56, %v5092_v9  ;;  %v546_v6 = vrot.slane %v488_v56, %v5094_v10 }
  0x1f   : > { %323 = vrot.lane.b32.xlu1 %v310_v38, %s5032_s28  ;;  %v559_v4 = vcombine.low %v526_v61, %v530_v62  ;;  %v550_v8 = vrot.slane %v488_v56, %v5102_v15  ;;  %v554_v12 = vrot.slane %v488_v56, %v5104_v16  ;;  %v750_v17 = vor.u32 %v4886_v3, %v4885_v2 }
  0x20   : > { %321 = vrot.lane.b32.xlu0 %v309_v42, %s5032_s28  ;;  %v560_v7 = vcombine.low %v534_v0, %v538_v1  ;;  %v561_v18 = vcombine.low %v542_v5, %v546_v6  ;;  %v754_v35 = vor.u32 %v4888_v28, %v4887_v26  ;;  %v4889_v42 = vld [vmem:[%s8127_s1 + $0x3] ss:$8 sm:$0xf]  ;;  %v5228_v59 = vor.u32 %v4898_v52, %v4897_v51  ;;  %v231_v28 = vld [vmem:[%s5266_s14 + $0x40] sm:$0x7] }
  0x21   : > { %v768_v21 = vrot.slane %v750_v17, %v5110_v20  ;;  %v772_v22 = vrot.slane %v750_v17, %v5117_v27  ;;  %v562_v23 = vcombine.low %v550_v8, %v554_v12  ;;  %v760_v24 = vrot.slane %v750_v17, %v5098_v13 }
  0x22   : > { %v764_v25 = vrot.slane %v750_v17, %v5100_v14  ;;  %v784_v30 = vrot.slane %v750_v17, %v5102_v15  ;;  %v788_v31 = vrot.slane %v750_v17, %v5104_v16  ;;  %v776_v33 = vrot.slane %v750_v17, %v5092_v9 }
  0x23   : > { %327 = vrot.lane.b32.xlu1 %v312_v45, %s5032_s28  ;;  %v822_v29 = vcombine.low %v768_v21, %v772_v22  ;;  %v780_v34 = vrot.slane %v750_v17, %v5094_v10  ;;  %v800_v37 = vrot.slane %v754_v35, %v5110_v20  ;;  %v804_v38 = vrot.slane %v754_v35, %v5117_v27 }
  0x24   : > { %325 = vrot.lane.b32.xlu0 %v311_v48, %s5032_s28  ;;  %v821_v32 = vcombine.low %v760_v24, %v764_v25  ;;  %v824_v36 = vcombine.low %v784_v30, %v788_v31  ;;  %v792_v40 = vrot.slane %v754_v35, %v5098_v13  ;;  %v796_v41 = vrot.slane %v754_v35, %v5100_v14 }
  0x25   : > { %v823_v39 = vcombine.low %v776_v33, %v780_v34  ;;  %v826_v44 = vcombine.low %v800_v37, %v804_v38  ;;  %v816_v45 = vrot.slane %v754_v35, %v5102_v15  ;;  %v820_v46 = vrot.slane %v754_v35, %v5104_v16 }
  0x26   : > { %v825_v47 = vcombine.low %v792_v40, %v796_v41  ;;  %v808_v48 = vrot.slane %v754_v35, %v5092_v9  ;;  %v812_v49 = vrot.slane %v754_v35, %v5094_v10  ;;  %v5210_v50 = vor.u32 %v4890_v43, %v4889_v42  ;;  %v223_v35 = vld [vmem:[%s5266_s14] sm:$0x77]  ;;  %v224_v42 = vld [vmem:[%s5266_s14 + $0x8] sm:$0x77] }
  0x27   : > { %563 = vrot.lane.b32.xlu1 %v555_v53, %s5033_s12  ;;  %v828_v53 = vcombine.low %v816_v45, %v820_v46  ;;  %v1462_v61 = vrot.slane %v5228_v59, %v5110_v20  ;;  %v1466_v62 = vrot.slane %v5228_v59, %v5117_v27  ;;  %v1454_v0 = vrot.slane %v5228_v59, %v5098_v13 }
  0x28   : > { %565 = vrot.lane.b32.xlu0 %v556_v57, %s5033_s12  ;;  %v1050_v54 = vrot.slane %v5210_v50, %v5110_v20  ;;  %v1054_v55 = vrot.slane %v5210_v50, %v5117_v27  ;;  %v827_v56 = vcombine.low %v808_v48, %v812_v49  ;;  %v1042_v57 = vrot.slane %v5210_v50, %v5098_v13 }
  0x29   : > { %v1046_v58 = vrot.slane %v5210_v50, %v5100_v14  ;;  %v1458_v1 = vrot.slane %v5228_v59, %v5100_v14  ;;  %v1516_v2 = vcombine.low %v1462_v61, %v1466_v62  ;;  %v1470_v3 = vrot.slane %v5228_v59, %v5092_v9  ;;  %v480_v61 = vld [vmem:[%s5266_s14 + $0x40] sm:$0x7] }
  0x2a   : > { %v1058_v6 = vrot.slane %v5210_v50, %v5092_v9  ;;  %vm339_vm1 = vcmask 1043456   ;;  %vm587_vm2 = vcmask 916480   ;;  %vm853_vm3 = vcmask 924672  }
  0x2b   : > { %567 = vrot.lane.b32.xlu1 %v557_v60, %s5033_s12  ;;  %v1104_v60 = vcombine.low %v1050_v54, %v1054_v55  ;;  %v1515_v5 = vcombine.low %v1454_v0, %v1458_v1  ;;  %vm1135_vm4 = vcmask 1039360   ;;  %vm1237_vm5 = vcmask 7168  }
  0x2c   : > { %569 = vrot.lane.b32.xlu0 %v558_v63, %s5033_s12  ;;  %v1103_v63 = vcombine.low %v1042_v57, %v1046_v58  ;;  %vm423_vm6 = vcmask 138240   ;;  %vm689_vm7 = vcmask 130048   ;;  %vm955_vm8 = vcmask 121856  }
  0x2d   : > { %vm2569_vm9 = vcmask 261120   ;;  %vm3399_vm10 = vcmask 130112   ;;  %vm3464_vm11 = vcmask 1041409   ;;  %vm3466_vm12 = vcmask 1042434  }
  0x2e   : > { %vm3468_vm13 = vcmask 1043459   ;;  %vm3470_vm14 = vcmask 1044484   ;;  %vm3472_vm15 = vcmask 1045509  }
  0x2f   : > { %571 = vrot.lane.b32.xlu1 %v559_v4, %s5033_s12  ;;  %v1474_v4 = vrot.slane %v5228_v59, %v5094_v10 }
  0x30   : > { %573 = vrot.lane.b32.xlu0 %v560_v7, %s5033_s12  ;;  %v1062_v7 = vrot.slane %v5210_v50, %v5094_v10 }
  0x31   : > { %v1517_v8 = vcombine.low %v1470_v3, %v1474_v4  ;;  %v227_v3 = vld [vmem:[%s5266_s14 + $0x20] sm:$0x77] }
  0x32   : > { %v1105_v12 = vcombine.low %v1058_v6, %v1062_v7 }
  0x33   : > { %575 = vrot.lane.b32.xlu1 %v561_v18, %s5033_s12 }
  0x34   : > { %577 = vrot.lane.b32.xlu0 %v562_v23, %s5033_s12 }
  0x37   : > { %831 = vrot.lane.b32.xlu1 %v822_v29, %s5034_s23 }
  0x38   : > { %829 = vrot.lane.b32.xlu0 %v821_v32, %s5034_s23 }
  0x3b   : > { %835 = vrot.lane.b32.xlu1 %v824_v36, %s5034_s23 }
  0x3c   : > { %833 = vrot.lane.b32.xlu0 %v823_v39, %s5034_s23 }
  0x3f   : > { %839 = vrot.lane.b32.xlu1 %v826_v44, %s5034_s23 }
  0x40   : > { %837 = vrot.lane.b32.xlu0 %v825_v47, %s5034_s23  ;;  %v225_v47 = vld [vmem:[%s5266_s14 + $0x10] sm:$0x77] }
  0x43   : > { %843 = vrot.lane.b32.xlu1 %v828_v53, %s5034_s23 }
  0x44   : > { %841 = vrot.lane.b32.xlu0 %v827_v56, %s5034_s23  ;;  %v226_v56 = vld [vmem:[%s5266_s14 + $0x18] sm:$0x77] }
  0x47   : > { %1113 = vrot.lane.b32.xlu1 %v1104_v60, %s5035_s8 }
  0x48   : > { %1111 = vrot.lane.b32.xlu0 %v1103_v63, %s5035_s8 }
  0x4b   : > { %1525 = vrot.lane.b32.xlu1 %v1516_v2, %s5036_s9 }
  0x4c   : > { %1523 = vrot.lane.b32.xlu0 %v1515_v5, %s5036_s9 }
  0x4f   : > { %1527 = vrot.lane.b32.xlu1 %v1517_v8, %s5036_s9  ;;  %v472_v8 = vld [vmem:[%s5266_s14] sm:$0x77] }
  0x50   : > { %1115 = vrot.lane.b32.xlu0 %v1105_v12, %s5035_s8 }
  0x89   : > { %v318_v17 = vpop.permute.xlu1 %317 }
  0x8a   : > { %v314_v18 = vpop.permute.xlu0 %313  ;;  %v331_v36 = vrot.slane %v318_v17, 4 }
  0x8b   : > { %v329_v25 = vrot.slane %v314_v18, 4 }
  0x8d   : > { %v320_v21 = vpop.permute.xlu1 %319  ;;  %v338_v33 = vsel %vm337_vm0, %v329_v25, %v314_v18 }
  0x8e   : > { %v316_v22 = vpop.permute.xlu0 %315  ;;  %v363_v39 = vmul.f32 %v338_v33, %v223_v35  ;;  %v332_v45 = vrot.slane %v320_v21, 4  ;;  %v229_v35 = vld [vmem:[%s5266_s14 + $0x30] sm:$0x77] }
  0x8f   : > { %v330_v29 = vrot.slane %v316_v22, 4 }
  0x90   : > { %v344_v49 = vsel %vm339_vm1, %v331_v36, %v332_v45 }
  0x91   : > { %v5261_v23 = vpop.permute.xlu1 %323  ;;  %v340_v37 = vsel %vm339_vm1, %v329_v25, %v330_v29  ;;  %v342_v44 = vsel %vm339_vm1, %v330_v29, %v331_v36  ;;  %v345_v55 = vsel %vm337_vm0, %v344_v49, %v320_v21  ;;  %v228_v21 = vld [vmem:[%s5266_s14 + $0x28] sm:$0x77]  ;;  %v381_v29 = vcombine.high %v363_v39, %v363_v39 }
  0x92   : > { %v322_v24 = vpop.permute.xlu0 %321  ;;  %v341_v40 = vsel %vm337_vm0, %v340_v37, %v316_v22  ;;  %v343_v48 = vsel %vm337_vm0, %v342_v44, %v318_v17  ;;  %v334_v57 = vrot.slane %v5261_v23, 4  ;;  %v5315_v63 = vmul.f32 %v345_v55, %v226_v56  ;;  %v230_v44 = vld [vmem:[%s5266_s14 + $0x38] sm:$0x77]  ;;  %v739_v49 = vld [vmem:[%s5266_s14 + $0x8] sm:$0x77] }
  0x93   : > { %v5292_v46 = vmul.f32 %v341_v40, %v224_v42  ;;  %v333_v51 = vrot.slane %v322_v24, 4  ;;  %v5303_v54 = vmul.f32 %v343_v48, %v225_v47 }
  0x95   : > { %v5268_v26 = vpop.permute.xlu1 %327  ;;  %v346_v58 = vsel %vm339_vm1, %v332_v45, %v333_v51  ;;  %v348_v6 = vsel %vm339_vm1, %v333_v51, %v334_v57  ;;  %v382_v48 = vcombine.high %v5292_v46, %v5292_v46 }
  0x96   : > { %v336_v30 = vrot.slane %v5268_v26, 4  ;;  %v5272_v31 = vpop.permute.xlu0 %325  ;;  %v347_v0 = vsel %vm337_vm0, %v346_v58, %v322_v24  ;;  %v349_v22 = vsel %vm337_vm0, %v348_v6, %v5261_v23 }
  0x97   : > { %v335_v4 = vrot.slane %v5272_v31, 4  ;;  %v5331_v17 = vmul.f32 %v347_v0, %v227_v3  ;;  %v5342_v33 = vmul.f32 %v349_v22, %v228_v21 }
  0x98   : > { %v371_v32 = vmul.f32 %v336_v30, %v231_v28 }
  0x99   : > { %v5277_v34 = vpop.permute.xlu1 %563  ;;  %v350_v25 = vsel %vm339_vm1, %v334_v57, %v335_v4  ;;  %v352_v36 = vsel %vm339_vm1, %v335_v4, %v336_v30 }
  0x9a   : > { %v5281_v38 = vpop.permute.xlu0 %565  ;;  %421 = vrot.lane.b32.xlu0 %v371_v32, %s5037_s15  ;;  %v579_v5 = vrot.slane %v5277_v34, 4  ;;  %v351_v23 = vsel %vm337_vm0, %v350_v25, %v5272_v31  ;;  %v353_v45 = vsel %vm337_vm0, %v352_v36, %v5268_v26  ;;  %v475_v25 = vld [vmem:[%s5266_s14 + $0x18] sm:$0x77]  ;;  %v476_v36 = vld [vmem:[%s5266_s14 + $0x20] sm:$0x77] }
  0x9b   : > { %v5356_v42 = vmul.f32 %v351_v23, %v229_v35  ;;  %v580_v47 = vrot.slane %v5281_v38, 4  ;;  %v370_v55 = vmul.f32 %v353_v45, %v230_v44  ;;  %v477_v45 = vld [vmem:[%s5266_s14 + $0x28] sm:$0x77] }
  0x9c   : > { %v588_v12 = vsel %vm587_vm2, %v579_v5, %v5277_v34 }
  0x9d   : > { %v5285_v41 = vpop.permute.xlu1 %567  ;;  %v612_v28 = vmul.f32 %v588_v12, %v472_v8  ;;  %v589_v56 = vsel %vm339_vm1, %v579_v5, %v580_v47  ;;  %v384_v5 = vcombine.high %v5315_v63, %v5315_v63 }
  0x9e   : > { %v5288_v43 = vpop.permute.xlu0 %569  ;;  %389 = vrot.lane.b32.xlu0 %v363_v39, %s5037_s15  ;;  %v738_v39 = vld [vmem:[%s5266_s14] sm:$0x77]  ;;  %v581_v26 = vrot.slane %v5285_v41, 4  ;;  %v590_v0 = vsel %vm587_vm2, %v589_v56, %v5281_v38 }
  0x9f   : > { %v638_v37 = vrot.slane %v612_v28, 5  ;;  %v582_v3 = vrot.slane %v5288_v43, 4  ;;  %v630_v6 = vcombine.high %v612_v28, %v612_v28 }
  0xa1   : > { %v5301_v53 = vpop.permute.xlu1 %571  ;;  %v593_v8 = vsel %vm339_vm1, %v581_v26, %v582_v3 }
  0xa2   : > { %v5297_v52 = vpop.permute.xlu0 %573  ;;  %393 = vrot.lane.b32.xlu0 %v5292_v46, %s5037_s15  ;;  %v383_v46 = vcombine.high %v5303_v54, %v5303_v54  ;;  %v583_v12 = vrot.slane %v5301_v53, 4  ;;  %v594_v28 = vsel %vm587_vm2, %v593_v8, %v5288_v43 }
  0xa5   : > { %v5318_v1 = vpop.permute.xlu1 %575 }
  0xa6   : > { %v5309_v60 = vpop.permute.xlu0 %577  ;;  %397 = vrot.lane.b32.xlu0 %v5303_v54, %s5037_s15 }
  0xa7   : > { %v586_v62 = vrot.slane %v5309_v60, 4 }
  0xa9   : > { %v620_v2 = vmul.f32 %v586_v62, %v480_v61  ;;  %v5337_v24 = vpop.permute.xlu1 %831  ;;  %v473_v61 = vld [vmem:[%s5266_s14 + $0x8] sm:$0x77] }
  0xaa   : > { %401 = vrot.lane.b32.xlu0 %v5315_v63, %s5037_s15  ;;  %v830_v18 = vpop.permute.xlu0 %829  ;;  %v846_v34 = vrot.slane %v5337_v24, 4  ;;  %v613_v54 = vmul.f32 %v590_v0, %v473_v61  ;;  %v639_v63 = vrot.slane %v630_v6, 5  ;;  %v4905_v6 = vld [vmem:[%s8127_s1 + $0x7] ss:$8 sm:$0xf] }
  0xab   : > { %v654_v7 = vrot.slane %v620_v2, 5  ;;  %v845_v32 = vrot.slane %v830_v18, 4  ;;  %v591_v2 = vsel %vm339_vm1, %v580_v47, %v581_v26  ;;  %v478_v26 = vld [vmem:[%s5266_s14 + $0x30] sm:$0x77] }
  0xac   : > { %v592_v38 = vsel %vm587_vm2, %v591_v2, %v5285_v41  ;;  %v631_v22 = vcombine.high %v613_v54, %v613_v54  ;;  %v595_v41 = vsel %vm339_vm1, %v582_v3, %v583_v12 }
  0xad   : > { %687 = vrot.lane.b32.xlu1 %v654_v7, %s5038_s16  ;;  %v854_v40 = vsel %vm853_vm3, %v845_v32, %v830_v18  ;;  %v855_v31 = vsel %vm339_vm1, %v845_v32, %v846_v34  ;;  %v474_v7 = vld [vmem:[%s5266_s14 + $0x10] sm:$0x77]  ;;  %v385_v18 = vcombine.high %v5331_v17, %v5331_v17  ;;  %v386_v32 = vcombine.high %v5342_v33, %v5342_v33 }
  0xae   : > { %405 = vrot.lane.b32.xlu0 %v5331_v17, %s5037_s15  ;;  %v5366_v30 = vmul.f32 %v854_v40, %v738_v39  ;;  %v856_v51 = vsel %vm853_vm3, %v855_v31, %v5337_v24  ;;  %v614_v21 = vmul.f32 %v592_v38, %v474_v7  ;;  %v615_v17 = vmul.f32 %v594_v28, %v475_v25  ;;  %v4906_v38 = vld [vmem:[%s8127_s1 + $0x7] ss:$8 sm:$0xf0] }
  0xaf   : > { %v5378_v57 = vmul.f32 %v856_v51, %v739_v49  ;;  %v641_v23 = vrot.slane %v631_v22, 5  ;;  %v585_v39 = vrot.slane %v5318_v1, 4  ;;  %v387_v40 = vcombine.high %v5356_v42, %v5356_v42 }
  0xb0   : > { %v904_v58 = vrot.slane %v5366_v30, 2  ;;  %v632_v35 = vcombine.high %v614_v21, %v614_v21  ;;  %v633_v44 = vcombine.high %v615_v17, %v615_v17  ;;  %v642_v3 = vrot.slane %v614_v21, 5 }
  0xb1   : > { %391 = vrot.lane.b32.xlu1 %v381_v29, %s5037_s15  ;;  %v906_v4 = vrot.slane %v5378_v57, 2  ;;  %v584_v29 = vrot.slane %v5297_v52, 4  ;;  %v644_v7 = vrot.slane %v615_v17, 5 }
  0xb2   : > { %409 = vrot.lane.b32.xlu0 %v5342_v33, %s5037_s15  ;;  %v643_v31 = vrot.slane %v632_v35, 5  ;;  %v645_v51 = vrot.slane %v633_v44, 5 }
  0xb3   : > { %v597_v43 = vsel %vm339_vm1, %v583_v12, %v584_v29 }
  0xb4   : > { %v598_v47 = vsel %vm587_vm2, %v597_v43, %v5297_v52  ;;  %v601_v52 = vsel %vm339_vm1, %v585_v39, %v586_v62  ;;  %v4902_v62 = vld [vmem:[%s8127_s1 + $0x6] ss:$8 sm:$0xf0] }
  0xb5   : > { %655 = vrot.lane.b32.xlu1 %v638_v37, %s5038_s16  ;;  %v596_v37 = vsel %vm587_vm2, %v595_v41, %v5301_v53  ;;  %v599_v53 = vsel %vm339_vm1, %v584_v29, %v585_v39  ;;  %v617_v49 = vmul.f32 %v598_v47, %v477_v45  ;;  %v602_v2 = vsel %vm587_vm2, %v601_v52, %v5309_v60 }
  0xb6   : > { %413 = vrot.lane.b32.xlu0 %v5356_v42, %s5037_s15  ;;  %v616_v33 = vmul.f32 %v596_v37, %v476_v36  ;;  %v600_v42 = vsel %vm587_vm2, %v599_v53, %v5318_v1  ;;  %v4901_v1 = vld [vmem:[%s8127_s1 + $0x6] ss:$8 sm:$0xf]  ;;  %v896_v47 = vcombine.high %v5366_v30, %v5366_v30  ;;  %v897_v30 = vcombine.high %v5378_v57, %v5378_v57 }
  0xb7   : > { %v635_v0 = vcombine.high %v617_v49, %v617_v49  ;;  %v5448_v60 = vor.u32 %v4902_v62, %v4901_v1  ;;  %v648_v17 = vrot.slane %v617_v49, 5  ;;  %v1070_v49 = vrot.slane %v5210_v50, %v5104_v16 }
  0xb8   : > { %v634_v56 = vcombine.high %v616_v33, %v616_v33  ;;  %v646_v22 = vrot.slane %v616_v33, 5 }
  0xb9   : > { %395 = vrot.lane.b32.xlu1 %v382_v48, %s5037_s15  ;;  %v388_v48 = vcombine.high %v370_v55, %v370_v55  ;;  %v1738_v21 = vrot.slane %v5448_v60, %v5100_v14  ;;  %v1750_v36 = vrot.slane %v5448_v60, %v5092_v9  ;;  %v1754_v37 = vrot.slane %v5448_v60, %v5094_v10 }
  0xba   : > { %417 = vrot.lane.b32.xlu0 %v370_v55, %s5037_s15  ;;  %v647_v61 = vrot.slane %v634_v56, 5  ;;  %v479_v55 = vld [vmem:[%s5266_s14 + $0x38] sm:$0x77]  ;;  %v1742_v52 = vrot.slane %v5448_v60, %v5110_v20 }
  0xbb   : > { %v1797_v33 = vcombine.low %v1750_v36, %v1754_v37  ;;  %v4899_v56 = vld [vmem:[%s8127_s1 + $0x45] ss:$8 sm:$0xf]  ;;  %v5572_v37 = vpop.permute.xlu1 %835 }
  0xbd   : > { %399 = vrot.lane.b32.xlu1 %v383_v46, %s5037_s15  ;;  %v618_v46 = vmul.f32 %v600_v42, %v478_v26  ;;  %v905_v26 = vrot.slane %v896_v47, 2  ;;  %v4900_v42 = vld [vmem:[%s8127_s1 + $0x45] ss:$8 sm:$0xf0]  ;;  %v1482_v47 = vrot.slane %v5228_v59, %v5104_v16 }
  0xbe   : > { %921 = vrot.lane.b32.xlu0 %v904_v58, %s5039_s17  ;;  %v640_v58 = vrot.slane %v613_v54, 5 }
  0xbf   : > { %v636_v54 = vcombine.high %v618_v46, %v618_v46  ;;  %v650_v39 = vrot.slane %v618_v46, 5 }
  0xc1   : > { %403 = vrot.lane.b32.xlu1 %v384_v5, %s5037_s15  ;;  %v649_v5 = vrot.slane %v635_v0, 5  ;;  %v651_v8 = vrot.slane %v636_v54, 5  ;;  %v907_v0 = vrot.slane %v897_v30, 2  ;;  %v4907_v54 = vld [vmem:[%s8127_s1 + $0x47] ss:$8 sm:$0xf] }
  0xc2   : > { %925 = vrot.lane.b32.xlu0 %v906_v4, %s5039_s17  ;;  %v619_v4 = vmul.f32 %v602_v2, %v479_v55 }
  0xc4   : > { %v637_v12 = vcombine.high %v619_v4, %v619_v4  ;;  %v652_v45 = vrot.slane %v619_v4, 5 }
  0xc5   : > { %407 = vrot.lane.b32.xlu1 %v385_v18, %s5037_s15  ;;  %v1734_v18 = vrot.slane %v5448_v60, %v5098_v13 }
  0xc6   : > { %657 = vrot.lane.b32.xlu0 %v639_v63, %s5038_s16  ;;  %v5462_v63 = vor.u32 %v4906_v38, %v4905_v6  ;;  %v653_v25 = vrot.slane %v637_v12, 5  ;;  %v4908_v6 = vld [vmem:[%s8127_s1 + $0x47] ss:$8 sm:$0xf0] }
  0xc7   : > { %v1795_v28 = vcombine.low %v1734_v18, %v1738_v21 }
  0xc8   : > { %v1998_v41 = vrot.slane %v5462_v63, %v5098_v13  ;;  %v2002_v29 = vrot.slane %v5462_v63, %v5100_v14  ;;  %v2006_v1 = vrot.slane %v5462_v63, %v5110_v20  ;;  %v2014_v38 = vrot.slane %v5462_v63, %v5092_v9 }
  0xc9   : > { %411 = vrot.lane.b32.xlu1 %v386_v32, %s5037_s15  ;;  %v4909_v32 = vld [vmem:[%s8127_s1 + $0x80] ss:$8 sm:$0xf]  ;;  %v2022_v21 = vrot.slane %v5462_v63, %v5102_v15 }
  0xca   : > { %661 = vrot.lane.b32.xlu0 %v641_v23, %s5038_s16  ;;  %v4910_v23 = vld [vmem:[%s8127_s1 + $0x80] ss:$8 sm:$0xf0]  ;;  %v2059_v35 = vcombine.low %v1998_v41, %v2002_v29  ;;  %v4892_v41 = vld [vmem:[%s8127_s1 + $0x43] ss:$8 sm:$0xf0] }
  0xcb   : > { %v5482_v43 = vor.u32 %v4910_v23, %v4909_v32 }
  0xcd   : > { %415 = vrot.lane.b32.xlu1 %v387_v40, %s5037_s15  ;;  %v5485_v40 = vpop.permute.xlu0 %833  ;;  %v2266_v44 = vrot.slane %v5482_v43, %v5100_v14  ;;  %v2278_v46 = vrot.slane %v5482_v43, %v5092_v9  ;;  %v2282_v57 = vrot.slane %v5482_v43, %v5094_v10  ;;  %v2270_v32 = vrot.slane %v5482_v43, %v5110_v20 }
  0xce   : > { %665 = vrot.lane.b32.xlu0 %v643_v31, %s5038_s16  ;;  %v2262_v31 = vrot.slane %v5482_v43, %v5098_v13 }
  0xcf   : > { %v2325_v62 = vcombine.low %v2278_v46, %v2282_v57  ;;  %v4903_v57 = vld [vmem:[%s8127_s1 + $0x46] ss:$8 sm:$0xf] }
  0xd0   : > { %v2323_v53 = vcombine.low %v2262_v31, %v2266_v44 }
  0xd1   : > { %419 = vrot.lane.b32.xlu1 %v388_v48, %s5037_s15  ;;  %v1066_v48 = vrot.slane %v5210_v50, %v5102_v15  ;;  %v1746_v50 = vrot.slane %v5448_v60, %v5117_v27 }
  0xd2   : > { %669 = vrot.lane.b32.xlu0 %v645_v51, %s5038_s16  ;;  %v5500_v51 = vpop.permute.xlu0 %837 }
  0xd3   : > { %v1796_v2 = vcombine.low %v1742_v52, %v1746_v50 }
  0xd5   : > { %659 = vrot.lane.b32.xlu1 %v640_v58, %s5038_s16  ;;  %v1106_v58 = vcombine.low %v1066_v48, %v1070_v49 }
  0xd6   : > { %673 = vrot.lane.b32.xlu0 %v647_v61, %s5038_s16  ;;  %v5520_v61 = vor.u32 %v4900_v42, %v4899_v56  ;;  %v5522_v55 = vpop.permute.xlu0 %841 }
  0xd8   : > { %v1486_v4 = vrot.slane %v5520_v61, %v5098_v13 }
  0xd9   : > { %663 = vrot.lane.b32.xlu1 %v642_v3, %s5038_s16  ;;  %v2010_v3 = vrot.slane %v5462_v63, %v5117_v27 }
  0xda   : > { %677 = vrot.lane.b32.xlu0 %v649_v5, %s5038_s16  ;;  %v1490_v5 = vrot.slane %v5520_v61, %v5100_v14  ;;  %v5546_v18 = vpop.permute.xlu0 %1111 }
  0xdc   : > { %v1519_v12 = vcombine.low %v1486_v4, %v1490_v5  ;;  %v1502_v5 = vrot.slane %v5520_v61, %v5092_v9 }
  0xdd   : > { %667 = vrot.lane.b32.xlu1 %v644_v7, %s5038_s16  ;;  %v2060_v7 = vcombine.low %v2006_v1, %v2010_v3  ;;  %v1758_v1 = vrot.slane %v5448_v60, %v5102_v15  ;;  %v1762_v3 = vrot.slane %v5448_v60, %v5104_v16 }
  0xde   : > { %681 = vrot.lane.b32.xlu0 %v651_v8, %s5038_s16  ;;  %v2018_v8 = vrot.slane %v5462_v63, %v5094_v10  ;;  %v5580_v31 = vpop.permute.xlu0 %1523 }
  0xe0   : > { %v2061_v29 = vcombine.low %v2014_v38, %v2018_v8  ;;  %v1798_v38 = vcombine.low %v1758_v1, %v1762_v3  ;;  %v1020_v1 = vld [vmem:[%s5266_s14] sm:$0x77] }
  0xe1   : > { %671 = vrot.lane.b32.xlu1 %v646_v22, %s5038_s16  ;;  %v2026_v22 = vrot.slane %v5462_v63, %v5104_v16 }
  0xe2   : > { %685 = vrot.lane.b32.xlu0 %v653_v25, %s5038_s16  ;;  %v5552_v25 = vor.u32 %v4908_v6, %v4907_v54  ;;  %v5602_v52 = vpop.permute.xlu0 %1115  ;;  %v1506_v54 = vrot.slane %v5520_v61, %v5094_v10 }
  0xe3   : > { %v2062_v63 = vcombine.low %v2022_v21, %v2026_v22 }
  0xe4   : > { %v2030_v23 = vrot.slane %v5552_v25, %v5098_v13  ;;  %v2038_v21 = vrot.slane %v5552_v25, %v5110_v20  ;;  %v2042_v22 = vrot.slane %v5552_v25, %v5117_v27 }
  0xe5   : > { %675 = vrot.lane.b32.xlu1 %v648_v17, %s5038_s16  ;;  %v2274_v17 = vrot.slane %v5482_v43, %v5117_v27 }
  0xe6   : > { %1803 = vrot.lane.b32.xlu0 %v1795_v28, %s5039_s17  ;;  %v4891_v28 = vld [vmem:[%s8127_s1 + $0x43] ss:$8 sm:$0xf] }
  0xe7   : > { %v5570_v36 = vor.u32 %v4892_v41, %v4891_v28  ;;  %v2324_v44 = vcombine.low %v2270_v32, %v2274_v17  ;;  %v2286_v32 = vrot.slane %v5482_v43, %v5102_v15  ;;  %v2290_v17 = vrot.slane %v5482_v43, %v5104_v16 }
  0xe8   : > { %v1498_v43 = vrot.slane %v5520_v61, %v5117_v27 }
  0xe9   : > { %679 = vrot.lane.b32.xlu1 %v650_v39, %s5038_s16  ;;  %v4911_v39 = vld [vmem:[%s8127_s1 + $0xc0] ss:$8 sm:$0xf]  ;;  %v1082_v48 = vrot.slane %v5570_v36, %v5110_v20  ;;  %v1086_v49 = vrot.slane %v5570_v36, %v5117_v27  ;;  %v1074_v42 = vrot.slane %v5570_v36, %v5098_v13 }
  0xea   : > { %2067 = vrot.lane.b32.xlu0 %v2059_v35, %s5038_s16  ;;  %v2034_v35 = vrot.slane %v5552_v25, %v5100_v14 }
  0xeb   : > { %v1108_v50 = vcombine.low %v1082_v48, %v1086_v49 }
  0xed   : > { %683 = vrot.lane.b32.xlu1 %v652_v45, %s5038_s16  ;;  %v1478_v45 = vrot.slane %v5228_v59, %v5102_v15  ;;  %v1078_v59 = vrot.slane %v5570_v36, %v5100_v14 }
  0xee   : > { %1807 = vrot.lane.b32.xlu0 %v1797_v33, %s5039_s17  ;;  %v4912_v33 = vld [vmem:[%s8127_s1 + $0xc0] ss:$8 sm:$0xf0] }
  0xef   : > { %v5592_v56 = vor.u32 %v4912_v33, %v4911_v39  ;;  %v1518_v30 = vcombine.low %v1478_v45, %v1482_v47  ;;  %v2326_v33 = vcombine.low %v2286_v32, %v2290_v17  ;;  %v1098_v47 = vrot.slane %v5570_v36, %v5102_v15 }
  0xf1   : > { %923 = vrot.lane.b32.xlu1 %v905_v26, %s5039_s17  ;;  %v5594_v26 = vpop.permute.xlu1 %839  ;;  %v2298_v46 = vrot.slane %v5592_v56, %v5100_v14 }
  0xf2   : > { %2331 = vrot.lane.b32.xlu0 %v2323_v53, %s5037_s15  ;;  %v2063_v53 = vcombine.low %v2030_v23, %v2034_v35  ;;  %v2046_v23 = vrot.slane %v5552_v25, %v5092_v9  ;;  %v2050_v35 = vrot.slane %v5552_v25, %v5094_v10 }
  0xf4   : > { %v2065_v45 = vcombine.low %v2046_v23, %v2050_v35  ;;  %v847_v23 = vrot.slane %v5485_v40, 4 }
  0xf5   : > { %927 = vrot.lane.b32.xlu1 %v907_v0, %s5039_s17  ;;  %v4904_v0 = vld [vmem:[%s8127_s1 + $0x46] ss:$8 sm:$0xf0]  ;;  %v5626_v6 = vpop.permute.xlu1 %843 }
  0xf6   : > { %1117 = vrot.lane.b32.xlu0 %v1106_v58, %s5035_s8  ;;  %v2294_v58 = vrot.slane %v5592_v56, %v5098_v13 }
  0xf8   : > { %v2327_v4 = vcombine.low %v2294_v58, %v2298_v46  ;;  %v2310_v46 = vrot.slane %v5592_v56, %v5092_v9 }
  0xf9   : > { %1805 = vrot.lane.b32.xlu1 %v1796_v2, %s5039_s17  ;;  %v1107_v2 = vcombine.low %v1074_v42, %v1078_v59  ;;  %v5642_v41 = vpop.permute.xlu1 %1113  ;;  %v1094_v42 = vrot.slane %v5570_v36, %v5094_v10  ;;  %v1127_v59 = vrot.slane %v5546_v18, 4 }
  0xfa   : > { %2335 = vrot.lane.b32.xlu0 %v2325_v62, %s5037_s15  ;;  %v5619_v62 = vor.u32 %v4904_v0, %v4903_v57  ;;  %v2314_v57 = vrot.slane %v5592_v56, %v5094_v10  ;;  %v1128_v17 = vrot.slane %v5642_v41, 4 }
  0xfb   : > { %v1136_v3 = vsel %vm1135_vm4, %v1127_v59, %v5546_v18  ;;  %v2058_v18 = vrot.slane %v5552_v25, %v5104_v16 }
  0xfc   : > { %v1766_v60 = vrot.slane %v5619_v62, %v5098_v13  ;;  %v1770_v8 = vrot.slane %v5619_v62, %v5100_v14 }
  0xfd   : > { %2069 = vrot.lane.b32.xlu1 %v2060_v7, %s5038_s16  ;;  %v5666_v48 = vpop.permute.xlu1 %1525 }
  0xfe   : > { %1531 = vrot.lane.b32.xlu0 %v1519_v12, %s5036_s9  ;;  %v1521_v12 = vcombine.low %v1502_v5, %v1506_v54  ;;  %v1774_v5 = vrot.slane %v5619_v62, %v5110_v20  ;;  %v1778_v54 = vrot.slane %v5619_v62, %v5117_v27 }
 0x101   : > { %2071 = vrot.lane.b32.xlu1 %v2061_v29, %s5038_s16  ;;  %v1799_v29 = vcombine.low %v1766_v60, %v1770_v8  ;;  %v5681_v0 = vpop.permute.xlu1 %1527  ;;  %v2054_v60 = vrot.slane %v5552_v25, %v5102_v15  ;;  %v1800_v25 = vcombine.low %v1774_v5, %v1778_v54  ;;  %v740_v5 = vld [vmem:[%s5266_s14 + $0x10] sm:$0x77]  ;;  %v1510_v54 = vrot.slane %v5520_v61, %v5102_v15 }
 0x102   : > { %2073 = vrot.lane.b32.xlu0 %v2062_v63, %s5038_s16  ;;  %v2064_v63 = vcombine.low %v2038_v21, %v2042_v22  ;;  %v1782_v22 = vrot.slane %v5619_v62, %v5092_v9 }
 0x103   : > { %v2066_v35 = vcombine.low %v2054_v60, %v2058_v18 }
 0x105   : > { %2333 = vrot.lane.b32.xlu1 %v2324_v44, %s5037_s15  ;;  %v1494_v44 = vrot.slane %v5520_v61, %v5110_v20 }
 0x106   : > { %2075 = vrot.lane.b32.xlu0 %v2063_v53, %s5038_s16  ;;  %v1102_v53 = vrot.slane %v5570_v36, %v5104_v16 }
 0x108   : > { %v1110_v58 = vcombine.low %v1098_v47, %v1102_v53 }
 0x109   : > { %1529 = vrot.lane.b32.xlu1 %v1518_v30, %s5036_s9  ;;  %v1090_v30 = vrot.slane %v5570_v36, %v5092_v9 }
 0x10a   : > { %1121 = vrot.lane.b32.xlu0 %v1108_v50, %s5035_s8  ;;  %v1520_v50 = vcombine.low %v1494_v44, %v1498_v43 }
 0x10b   : > { %v1109_v36 = vcombine.low %v1090_v30, %v1094_v42  ;;  %v1137_v30 = vsel %vm339_vm1, %v1127_v59, %v1128_v17 }
 0x10c   : > { %v5628_v7 = vpop.permute.xlu0 %421 }
 0x10d   : > { %1119 = vrot.lane.b32.xlu1 %v1107_v2, %s5035_s8 }
 0x10e   : > { %2339 = vrot.lane.b32.xlu0 %v2327_v4, %s5037_s15  ;;  %v1539_v4 = vrot.slane %v5580_v31, 4 }
 0x110   : > { %v5640_v28 = vpop.permute.xlu0 %389  ;;  %v1547_v32 = vsel %vm1237_vm5, %v1539_v4, %v5580_v31  ;;  %v1434_v31 = vld [vmem:[%s5266_s14 + $0x14] sm:$0x77] }
 0x111   : > { %1809 = vrot.lane.b32.xlu1 %v1798_v38, %s5039_s17  ;;  %v2329_v38 = vcombine.low %v2310_v46, %v2314_v57 }
 0x112   : > { %1535 = vrot.lane.b32.xlu0 %v1521_v12, %s5036_s9  ;;  %v5701_v12 = vmul.f32 %v1136_v3, %v1020_v1  ;;  %v1138_v1 = vsel %vm1135_vm4, %v1137_v30, %v5642_v41 }
 0x114   : > { %v5654_v39 = vpop.permute.xlu0 %393  ;;  %v1178_v44 = vcombine.high %v5701_v12, %v5701_v12 }
 0x115   : > { %1811 = vrot.lane.b32.xlu1 %v1799_v29, %s5039_s17  ;;  %v1432_v29 = vld [vmem:[%s5266_s14 + $0x4] sm:$0x77] }
 0x116   : > { %2077 = vrot.lane.b32.xlu0 %v2064_v63, %s5038_s16  ;;  %v1786_v63 = vrot.slane %v5619_v62, %v5094_v10  ;;  %v5720_v43 = vmul.f32 %v1547_v32, %v1432_v29  ;;  %v1187_v46 = vrot.slane %v1178_v44, 7  ;;  %v1541_v44 = vrot.slane %v5681_v0, 4 }
 0x118   : > { %v5668_v49 = vpop.permute.xlu0 %397  ;;  %v1801_v42 = vcombine.low %v1782_v22, %v1786_v63  ;;  %v1589_v57 = vcombine.high %v5720_v43, %v5720_v43 }
 0x119   : > { %2337 = vrot.lane.b32.xlu1 %v2326_v33, %s5037_s15 }
 0x11a   : > { %2079 = vrot.lane.b32.xlu0 %v2065_v45, %s5038_s16  ;;  %v1598_v29 = vrot.slane %v1589_v57, 1  ;;  %v4894_v57 = vld [vmem:[%s8127_s1 + $0x4] ss:$8 sm:$0xf0] }
 0x11c   : > { %v5683_v2 = vpop.permute.xlu0 %401 }
 0x11d   : > { %1533 = vrot.lane.b32.xlu1 %v1520_v50, %s5036_s9  ;;  %v2302_v50 = vrot.slane %v5592_v56, %v5110_v20 }
 0x11e   : > { %1125 = vrot.lane.b32.xlu0 %v1110_v58, %s5035_s8  ;;  %v857_v58 = vsel %vm339_vm1, %v846_v34, %v847_v23 }
 0x11f   : > { %v5699_v8 = vpop.permute.xlu1 %687  ;;  %v858_v24 = vsel %vm853_vm3, %v857_v58, %v5485_v40  ;;  %v2318_v58 = vrot.slane %v5592_v56, %v5102_v15 }
 0x120   : > { %v5703_v21 = vpop.permute.xlu0 %405  ;;  %v5762_v22 = vmul.f32 %v858_v24, %v740_v5 }
 0x121   : > { %1123 = vrot.lane.b32.xlu1 %v1109_v36, %s5035_s8  ;;  %v1021_v36 = vld [vmem:[%s5266_s14 + $0x8] sm:$0x77] }
 0x122   : > { %2343 = vrot.lane.b32.xlu0 %v2329_v38, %s5037_s15  ;;  %v1514_v38 = vrot.slane %v5520_v61, %v5104_v16  ;;  %v5760_v60 = vmul.f32 %v1138_v1, %v1021_v36  ;;  %v908_v30 = vrot.slane %v5762_v22, 2 }
 0x123   : > { %v392_v33 = vpop.permute.xlu1 %391 }
 0x124   : > { %v424_v45 = vsel %vm423_vm6, %v5640_v28, %v392_v33  ;;  %v425_v47 = vsel %vm423_vm6, %v392_v33, %v5654_v39  ;;  %v5726_v53 = vpop.permute.xlu0 %409  ;;  %v2306_v28 = vrot.slane %v5592_v56, %v5117_v27  ;;  %v1522_v61 = vcombine.low %v1510_v54, %v1514_v38 }
 0x125   : > { %456 = vst [vmem:[#allocation2] sm:$0x7] %v424_v45  ;;  %457 = vst [vmem:[#allocation2 + $0x8] sm:$0x7] %v425_v47  ;;  %1813 = vrot.lane.b32.xlu1 %v1800_v25, %s5039_s17  ;;  %v1794_v33 = vrot.slane %v5619_v62, %v5104_v16  ;;  %v1540_v45 = vrot.slane %v5666_v48, 4 }
 0x126   : > { %2081 = vrot.lane.b32.xlu0 %v2066_v35, %s5038_s16  ;;  %v2328_v34 = vcombine.low %v2302_v50, %v2306_v28  ;;  %v1790_v35 = vrot.slane %v5619_v62, %v5102_v15 }
 0x127   : > { %v5742_v59 = vpop.permute.xlu1 %655  ;;  %v1550_v36 = vsel %vm339_vm1, %v1540_v45, %v1541_v44 }
 0x128   : > { %v5749_v3 = vpop.permute.xlu0 %413  ;;  %v1802_v62 = vcombine.low %v1790_v35, %v1794_v33  ;;  %v1286_v33 = vld [vmem:[%s5266_s14 + $0x4] sm:$0x77] }
 0x129   : > { %1815 = vrot.lane.b32.xlu1 %v1801_v42, %s5039_s17 }
 0x12a   : > { %1205 = vrot.lane.b32.xlu0 %v1187_v46, %s5036_s9  ;;  %v2322_v46 = vrot.slane %v5592_v56, %v5104_v16  ;;  %v1548_v56 = vsel %vm339_vm1, %v1539_v4, %v1540_v45  ;;  %v1551_v4 = vsel %vm1237_vm5, %v1550_v36, %v5681_v0  ;;  %v1435_v0 = vld [vmem:[%s5266_s14 + $0x1c] sm:$0x77] }
 0x12b   : > { %v396_v18 = vpop.permute.xlu1 %395  ;;  %v5827_v45 = vmul.f32 %v1551_v4, %v1434_v31  ;;  %v1287_v31 = vld [vmem:[%s5266_s14 + $0xc] sm:$0x77] }
 0x12c   : > { %v426_v32 = vsel %vm423_vm6, %v5654_v39, %v396_v18  ;;  %v427_v25 = vsel %vm423_vm6, %v396_v18, %v5668_v49  ;;  %v5768_v63 = vpop.permute.xlu0 %417  ;;  %v1179_v39 = vcombine.high %v5760_v60, %v5760_v60 }
 0x12d   : > { %458 = vst [vmem:[#allocation2 + $0x10] sm:$0x7] %v426_v32  ;;  %459 = vst [vmem:[#allocation2 + $0x18] sm:$0x7] %v427_v25  ;;  %2341 = vrot.lane.b32.xlu1 %v2328_v34, %s5037_s15  ;;  %v1597_v25 = vrot.slane %v5720_v43, 1 }
 0x12e   : > { %1616 = vrot.lane.b32.xlu0 %v1598_v29, %s5035_s8  ;;  %v1189_v5 = vrot.slane %v1179_v39, 7  ;;  %v1433_v39 = vld [vmem:[%s5266_s14 + $0xc] sm:$0x77] }
 0x12f   : > { %v400_v47 = vpop.permute.xlu1 %399 }
 0x130   : > { %v428_v42 = vsel %vm423_vm6, %v5668_v49, %v400_v47  ;;  %v429_v50 = vsel %vm423_vm6, %v400_v47, %v5683_v2  ;;  %v5785_v28 = vpop.permute.xlu0 %921  ;;  %v4893_v49 = vld [vmem:[%s8127_s1 + $0x4] ss:$8 sm:$0xf] }
 0x131   : > { %460 = vst [vmem:[#allocation2 + $0x20] sm:$0x7] %v428_v42  ;;  %461 = vst [vmem:[#allocation2 + $0x28] sm:$0x7] %v429_v50  ;;  %1537 = vrot.lane.b32.xlu1 %v1522_v61, %s5036_s9  ;;  %v5802_v1 = vor.u32 %v4894_v57, %v4893_v49  ;;  %v1549_v61 = vsel %vm1237_vm5, %v1548_v56, %v5666_v48 }
 0x132   : > { %929 = vrot.lane.b32.xlu0 %v908_v30, %s5039_s17  ;;  %v1572_v43 = vmul.f32 %v1549_v61, %v1433_v39 }
 0x133   : > { %v404_v24 = vpop.permute.xlu1 %403  ;;  %v1307_v18 = vrot.slane %v5802_v1, %v5098_v13  ;;  %v1311_v29 = vrot.slane %v5802_v1, %v5100_v14 }
 0x134   : > { %v430_v34 = vsel %vm423_vm6, %v5683_v2, %v404_v24  ;;  %v431_v54 = vsel %vm423_vm6, %v404_v24, %v5703_v21  ;;  %v5811_v38 = vpop.permute.xlu0 %925  ;;  %v2330_v2 = vcombine.low %v2318_v58, %v2322_v46  ;;  %v1601_v46 = vrot.slane %v5827_v45, 1 }
 0x135   : > { %462 = vst [vmem:[#allocation2 + $0x30] sm:$0x7] %v430_v34  ;;  %463 = vst [vmem:[#allocation2 + $0x38] sm:$0x7] %v431_v54  ;;  %1817 = vrot.lane.b32.xlu1 %v1802_v62, %s5039_s17  ;;  %v1368_v32 = vcombine.low %v1307_v18, %v1311_v29  ;;  %v1129_v62 = vrot.slane %v5602_v52, 4  ;;  %v1599_v56 = vrot.slane %v1572_v43, 1  ;;  %v1590_v39 = vcombine.high %v1572_v43, %v1572_v43 }
 0x136   : > { %1209 = vrot.lane.b32.xlu0 %v1189_v5, %s5036_s9  ;;  %v1022_v18 = vld [vmem:[%s5266_s14 + $0x10] sm:$0x77] }
 0x137   : > { %v408_v35 = vpop.permute.xlu1 %407  ;;  %v1384_v50 = vmul.f32 %v1368_v32, %v1286_v33  ;;  %v1139_v5 = vsel %vm339_vm1, %v1128_v17, %v1129_v62 }
 0x138   : > { %v432_v47 = vsel %vm423_vm6, %v5703_v21, %v408_v35  ;;  %v433_v30 = vsel %vm423_vm6, %v408_v35, %v5726_v53  ;;  %v658_v42 = vpop.permute.xlu0 %657  ;;  %v1188_v21 = vrot.slane %v5760_v60, 7  ;;  %v1319_v60 = vrot.slane %v5802_v1, %v5117_v27 }
 0x139   : > { %464 = vst [vmem:[#allocation2 + $0x40] sm:$0x7] %v432_v47  ;;  %465 = vst [vmem:[#allocation2 + $0x48] sm:$0x7] %v433_v30  ;;  %v690_v48 = vsel %vm689_vm7, %v5742_v59, %v658_v42  ;;  %2345 = vrot.lane.b32.xlu1 %v2330_v2, %s5037_s15  ;;  %v1400_v59 = vcombine.low %v1384_v50, %v1384_v50  ;;  %v1140_v41 = vsel %vm1135_vm4, %v1139_v5, %v5602_v52 }
 0x13a   : > { %722 = vst [vmem:[#allocation2] sm:$0x38] %v690_v48  ;;  %1614 = vrot.lane.b32.xlu0 %v1597_v25, %s5035_s8  ;;  %1417 = vst [vmem:[#allocation2 + $0x88] sm:$0x70] %v1384_v50  ;;  %v1186_v2 = vrot.slane %v5701_v12, 7  ;;  %v5865_v25 = vmul.f32 %v1140_v41, %v1022_v18 }
 0x13b   : > { %v412_v58 = vpop.permute.xlu1 %411  ;;  %1416 = vst [vmem:[#allocation2 + $0x80] sm:$0x70] %v1400_v59 }
 0x13c   : > { %v434_v49 = vsel %vm423_vm6, %v5726_v53, %v412_v58  ;;  %v435_v57 = vsel %vm423_vm6, %v412_v58, %v5749_v3  ;;  %v662_v36 = vpop.permute.xlu0 %661  ;;  %v1315_v53 = vrot.slane %v5802_v1, %v5110_v20  ;;  %v1190_v12 = vrot.slane %v5865_v25, 7 }
 0x13d   : > { %466 = vst [vmem:[#allocation2 + $0x50] sm:$0x7] %v434_v49  ;;  %467 = vst [vmem:[#allocation2 + $0x58] sm:$0x7] %v435_v57  ;;  %1207 = vrot.lane.b32.xlu1 %v1188_v21, %s5036_s9 }
 0x13e   : > { %1622 = vrot.lane.b32.xlu0 %v1601_v46, %s5035_s8  ;;  %v1369_v29 = vcombine.low %v1315_v53, %v1319_v60 }
 0x13f   : > { %v416_v24 = vpop.permute.xlu1 %415 }
 0x140   : > { %v436_v17 = vsel %vm423_vm6, %v5749_v3, %v416_v24  ;;  %v437_v34 = vsel %vm423_vm6, %v416_v24, %v5768_v63  ;;  %v666_v54 = vpop.permute.xlu0 %665  ;;  %v1385_v4 = vmul.f32 %v1369_v29, %v1287_v31 }
 0x141   : > { %468 = vst [vmem:[#allocation2 + $0x60] sm:$0x7] %v436_v17  ;;  %469 = vst [vmem:[#allocation2 + $0x68] sm:$0x7] %v437_v34  ;;  %1618 = vrot.lane.b32.xlu1 %v1599_v56, %s5035_s8  ;;  %v1712_v34 = vld [vmem:[%s5266_s14 + $0x4] sm:$0x77] }
 0x142   : > { %1419 = vst [vmem:[#allocation2 + $0x98] sm:$0x70] %v1385_v4  ;;  %v1401_v33 = vcombine.low %v1385_v4, %v1385_v4 }
 0x143   : > { %v420_v32 = vpop.permute.xlu1 %419 }
 0x144   : > { %v438_v3 = vsel %vm423_vm6, %v5768_v63, %v420_v32  ;;  %v439_v61 = vsel %vm423_vm6, %v420_v32, %v5628_v7  ;;  %v670_v35 = vpop.permute.xlu0 %669  ;;  %1418 = vst [vmem:[#allocation2 + $0x90] sm:$0x70] %v1401_v33  ;;  %v1600_v7 = vrot.slane %v1590_v39, 1  ;;  %v1976_v32 = vld [vmem:[%s5266_s14 + $0x4] sm:$0x77] }
 0x145   : > { %470 = vst [vmem:[#allocation2 + $0x70] sm:$0x7] %v438_v3  ;;  %471 = vst [vmem:[#allocation2 + $0x78] sm:$0x7] %v439_v61  ;;  %1203 = vrot.lane.b32.xlu1 %v1186_v2, %s5036_s9 }
 0x147   : > { %v660_v47 = vpop.permute.xlu1 %659 }
 0x148   : > { %v691_v30 = vsel %vm689_vm7, %v658_v42, %v660_v47  ;;  %v692_v50 = vsel %vm689_vm7, %v660_v47, %v662_v36  ;;  %v674_v63 = vpop.permute.xlu0 %673 }
 0x149   : > { %723 = vst [vmem:[#allocation2 + $0x8] sm:$0x38] %v691_v30  ;;  %724 = vst [vmem:[#allocation2 + $0x10] sm:$0x38] %v692_v50  ;;  %1211 = vrot.lane.b32.xlu1 %v1190_v12, %s5036_s9 }
 0x14b   : > { %v664_v48 = vpop.permute.xlu1 %663 }
 0x14c   : > { %v693_v21 = vsel %vm689_vm7, %v662_v36, %v664_v48  ;;  %v694_v58 = vsel %vm689_vm7, %v664_v48, %v666_v54  ;;  %v678_v46 = vpop.permute.xlu0 %677 }
 0x14d   : > { %725 = vst [vmem:[#allocation2 + $0x18] sm:$0x38] %v693_v21  ;;  %726 = vst [vmem:[#allocation2 + $0x20] sm:$0x38] %v694_v58  ;;  %1620 = vrot.lane.b32.xlu1 %v1600_v7, %s5035_s8 }
 0x14f   : > { %v668_v43 = vpop.permute.xlu1 %667 }
 0x150   : > { %v695_v42 = vsel %vm689_vm7, %v666_v54, %v668_v43  ;;  %v696_v49 = vsel %vm689_vm7, %v668_v43, %v670_v35  ;;  %v682_v57 = vpop.permute.xlu0 %681  ;;  %v2240_v43 = vld [vmem:[%s5266_s14 + $0x4] sm:$0x77] }
 0x151   : > { %727 = vst [vmem:[#allocation2 + $0x28] sm:$0x38] %v695_v42  ;;  %728 = vst [vmem:[#allocation2 + $0x30] sm:$0x38] %v696_v49 }
 0x153   : > { %v672_v59 = vpop.permute.xlu1 %671 }
 0x154   : > { %v697_v5 = vsel %vm689_vm7, %v670_v35, %v672_v59  ;;  %v698_v36 = vsel %vm689_vm7, %v672_v59, %v674_v63  ;;  %v686_v53 = vpop.permute.xlu0 %685 }
 0x155   : > { %729 = vst [vmem:[#allocation2 + $0x38] sm:$0x38] %v697_v5  ;;  %730 = vst [vmem:[#allocation2 + $0x40] sm:$0x38] %v698_v36  ;;  %v705_v60 = vsel %vm689_vm7, %v686_v53, %v5699_v8 }
 0x156   : > { %737 = vst [vmem:[#allocation2 + $0x78] sm:$0x38] %v705_v60 }
 0x157   : > { %v676_v56 = vpop.permute.xlu1 %675 }
 0x158   : > { %v699_v24 = vsel %vm689_vm7, %v674_v63, %v676_v56  ;;  %v700_v41 = vsel %vm689_vm7, %v676_v56, %v678_v46  ;;  %v1804_v17 = vpop.permute.xlu0 %1803 }
 0x159   : > { %731 = vst [vmem:[#allocation2 + $0x48] sm:$0x38] %v699_v24  ;;  %732 = vst [vmem:[#allocation2 + $0x50] sm:$0x38] %v700_v41  ;;  %v1819_v54 = vrot.slane %v1804_v17, 4 }
 0x15a   : > { %v1713_v41 = vld [vmem:[%s5266_s14 + $0xc] sm:$0x77] }
 0x15b   : > { %v1827_v18 = vsel %vm955_vm8, %v1819_v54, %v1804_v17  ;;  %v680_v29 = vpop.permute.xlu1 %679  ;;  %v1714_v17 = vld [vmem:[%s5266_s14 + $0x14] sm:$0x77] }
 0x15c   : > { %v1851_v31 = vmul.f32 %v1827_v18, %v1712_v34  ;;  %v701_v4 = vsel %vm689_vm7, %v678_v46, %v680_v29  ;;  %v702_v8 = vsel %vm689_vm7, %v680_v29, %v682_v57  ;;  %v2068_v2 = vpop.permute.xlu0 %2067 }
 0x15d   : > { %733 = vst [vmem:[#allocation2 + $0x58] sm:$0x38] %v701_v4  ;;  %734 = vst [vmem:[#allocation2 + $0x60] sm:$0x38] %v702_v8  ;;  %v2083_v3 = vrot.slane %v2068_v2, 4 }
 0x15e   : > { %v1869_v61 = vcombine.high %v1851_v31, %v1851_v31  ;;  %v1877_v34 = vrot.slane %v1851_v31, 6 }
 0x15f   : > { %v2091_v35 = vsel %vm689_vm7, %v2083_v3, %v2068_v2  ;;  %v684_v33 = vpop.permute.xlu1 %683 }
 0x160   : > { %v1878_v39 = vrot.slane %v1869_v61, 6  ;;  %v5893_v47 = vmul.f32 %v2091_v35, %v1976_v32  ;;  %v703_v12 = vsel %vm689_vm7, %v682_v57, %v684_v33  ;;  %v704_v30 = vsel %vm689_vm7, %v684_v33, %v686_v53  ;;  %v5897_v50 = vpop.permute.xlu0 %1807 }
 0x161   : > { %735 = vst [vmem:[#allocation2 + $0x68] sm:$0x38] %v703_v12  ;;  %736 = vst [vmem:[#allocation2 + $0x70] sm:$0x38] %v704_v30  ;;  %v1821_v36 = vrot.slane %v5897_v50, 4 }
 0x162   : > { %v2133_v63 = vcombine.high %v5893_v47, %v5893_v47  ;;  %1896 = vrot.lane.b32.xlu1 %v1878_v39, %s5034_s23 }
 0x163   : > { %v924_v7 = vpop.permute.xlu1 %923 }
 0x164   : > { %v2142_v48 = vrot.slane %v2133_v63, 3  ;;  %v956_v21 = vsel %vm955_vm8, %v5785_v28, %v924_v7  ;;  %v957_v58 = vsel %vm955_vm8, %v924_v7, %v5811_v38  ;;  %v5906_v46 = vpop.permute.xlu0 %2331 }
 0x165   : > { %988 = vst [vmem:[#allocation2 + $0x80] ss:$-124 sps:$4 sm:$0xc1] %v956_v21   ;;  %989 = vst [vmem:[#allocation2 + $0x88] ss:$-124 sps:$4 sm:$0xc1] %v957_v58  }
 0x166   : > { %v2347_v42 = vrot.slane %v5906_v46, 4  ;;  %2160 = vrot.lane.b32.xlu1 %v2142_v48, %s5033_s12  ;;  %v848_v48 = vrot.slane %v5572_v37, 4 }
 0x167   : > { %v5915_v28 = vpop.permute.xlu1 %927 }
 0x168   : > { %v2355_v49 = vsel %vm423_vm6, %v2347_v42, %v5906_v46  ;;  %v958_v59 = vsel %vm955_vm8, %v5811_v38, %v5915_v28  ;;  %v5922_v5 = vpop.permute.xlu0 %1117 }
 0x169   : > { %v5917_v57 = vmul.f32 %v2355_v49, %v2240_v43  ;;  %990 = vst [vmem:[#allocation2 + $0x90] ss:$-124 sps:$4 sm:$0xc1] %v958_v59   ;;  %v5040_v49 = vmov 1.0  }
 0x16a   : > { %2488 = vst [vmem:[#allocation2 + $0x188] sm:$0xf8] %v5040_v49  ;;  %2487 = vst [vmem:[#allocation2 + $0x180] sm:$0xf8] %v5040_v49 }
 0x16b   : > { %v2397_v53 = vcombine.high %v5917_v57, %v5917_v57  ;;  %v1806_v60 = vpop.permute.xlu1 %1805  ;;  %2489 = vst [vmem:[#allocation2 + $0x190] sm:$0xf8] %v5040_v49  ;;  %2490 = vst [vmem:[#allocation2 + $0x198] sm:$0xf8] %v5040_v49 }
 0x16c   : > { %v1820_v56 = vrot.slane %v1806_v60, 4  ;;  %v5927_v24 = vpop.permute.xlu0 %2335  ;;  %2491 = vst [vmem:[#allocation2 + $0x1a0] sm:$0xf8] %v5040_v49  ;;  %2492 = vst [vmem:[#allocation2 + $0x1a8] sm:$0xf8] %v5040_v49 }
 0x16d   : > { %2407 = vrot.lane.b32.xlu1 %v2397_v53, %s5032_s28  ;;  %v2349_v21 = vrot.slane %v5927_v24, 4  ;;  %2493 = vst [vmem:[#allocation2 + $0x1b0] sm:$0xf8] %v5040_v49  ;;  %2494 = vst [vmem:[#allocation2 + $0x1b8] sm:$0xf8] %v5040_v49 }
 0x16e   : > { %v1828_v38 = vsel %vm339_vm1, %v1819_v54, %v1820_v56  ;;  %v1830_v18 = vsel %vm339_vm1, %v1820_v56, %v1821_v36  ;;  %v1977_v54 = vld [vmem:[%s5266_s14 + $0xc] sm:$0x77]  ;;  %2495 = vst [vmem:[#allocation2 + $0x1c0] sm:$0xf8] %v5040_v49  ;;  %2496 = vst [vmem:[#allocation2 + $0x1c8] sm:$0xf8] %v5040_v49  ;;  %v859_v56 = vsel %vm339_vm1, %v847_v23, %v848_v48 }
 0x16f   : > { %v1829_v29 = vsel %vm955_vm8, %v1828_v38, %v1806_v60  ;;  %v1831_v4 = vsel %vm955_vm8, %v1830_v18, %v5897_v50  ;;  %v2070_v8 = vpop.permute.xlu1 %2069  ;;  %2497 = vst [vmem:[#allocation2 + $0x1d0] sm:$0xf8] %v5040_v49  ;;  %2498 = vst [vmem:[#allocation2 + $0x1d8] sm:$0xf8] %v5040_v49  ;;  %v860_v46 = vsel %vm853_vm3, %v859_v56, %v5572_v37  ;;  %v8132_v37 = vmov 0.0  }
 0x170   : > { %v5939_v2 = vmul.f32 %v1829_v29, %v1713_v41  ;;  %v2084_v32 = vrot.slane %v2070_v8, 4  ;;  %v5941_v61 = vpop.permute.xlu0 %1531  ;;  %v5944_v31 = vmul.f32 %v1831_v4, %v1714_v17  ;;  %2499 = vst [vmem:[#allocation2 + $0x1e0] sm:$0xf8] %v5040_v49  ;;  %2500 = vst [vmem:[#allocation2 + $0x1e8] sm:$0xf8] %v5040_v49  ;;  %v1130_v17 = vrot.slane %v5922_v5, 4  ;;  %2640 = vmatprep.mubr.f32.mxu0 %v8132_v37 }
 0x171   : > { %1894 = vrot.lane.b32.xlu1 %v1877_v34, %s5034_s23  ;;  %2501 = vst [vmem:[#allocation2 + $0x1f0] sm:$0xf8] %v5040_v49  ;;  %2502 = vst [vmem:[#allocation2 + $0x1f8] sm:$0xf8] %v5040_v49  ;;  %v2241_v41 = vld [vmem:[%s5266_s14 + $0xc] sm:$0x77]  ;;  %2717 = vmatprep.mubr.f32.mxu1 %v8132_v37 }
 0x172   : > { %v1879_v35 = vrot.slane %v5939_v2, 6  ;;  %v2092_v33 = vsel %vm339_vm1, %v2083_v3, %v2084_v32  ;;  %v1881_v39 = vrot.slane %v5944_v31, 6  ;;  %v1870_v23 = vcombine.high %v5939_v2, %v5939_v2 }
 0x173   : > { %v2093_v12 = vsel %vm689_vm7, %v2092_v33, %v2070_v8  ;;  %v5951_v30 = vpop.permute.xlu1 %2071  ;;  %v1141_v33 = vsel %vm339_vm1, %v1129_v62, %v1130_v17  ;;  %v1023_v62 = vld [vmem:[%s5266_s14 + $0x18] sm:$0x77]  ;;  %v8138_v49 = vrot.slane %v5500_v51, 4 }
 0x174   : > { %v2116_v63 = vmul.f32 %v2093_v12, %v1977_v54  ;;  %1898 = vrot.lane.b32.xlu0 %v1879_v35, %s5034_s23  ;;  %v5954_v7 = vpop.permute.xlu0 %2073  ;;  %v2085_v34 = vrot.slane %v5951_v30, 4  ;;  %v741_v54 = vld [vmem:[%s5266_s14 + $0x18] sm:$0x77] }
 0x175   : > { %1902 = vrot.lane.b32.xlu1 %v1881_v39, %s5034_s23 }
 0x176   : > { %v2134_v58 = vcombine.high %v2116_v63, %v2116_v63  ;;  %v2143_v43 = vrot.slane %v2116_v63, 3  ;;  %v2094_v2 = vsel %vm339_vm1, %v2084_v32, %v2085_v34  ;;  %v5999_v63 = vmul.f32 %v860_v46, %v741_v54 }
 0x177   : > { %v2334_v3 = vpop.permute.xlu1 %2333  ;;  %v1142_v32 = vsel %vm1135_vm4, %v1141_v33, %v5922_v5  ;;  %v2141_v5 = vrot.slane %v5893_v47, 3  ;;  %v8134_v46 = vrot.slane %v5941_v61, 4  ;;  %v742_v33 = vld [vmem:[%s5266_s14 + $0x20] sm:$0x77] }
 0x178   : > { %v2144_v59 = vrot.slane %v2134_v58, 3  ;;  %v2348_v53 = vrot.slane %v2334_v3, 4  ;;  %2162 = vrot.lane.b32.xlu0 %v2143_v43, %s5033_s12  ;;  %v5960_v60 = vpop.permute.xlu0 %2075  ;;  %v1880_v58 = vrot.slane %v1870_v23, 6  ;;  %v910_v56 = vrot.slane %v5999_v63, 2 }
 0x17a   : > { %v2356_v38 = vsel %vm339_vm1, %v2347_v42, %v2348_v53  ;;  %v2358_v18 = vsel %vm339_vm1, %v2348_v53, %v2349_v21  ;;  %2164 = vrot.lane.b32.xlu1 %v2144_v59, %s5033_s12  ;;  %v2242_v42 = vld [vmem:[%s5266_s14 + $0x14] sm:$0x77] }
 0x17b   : > { %v2357_v29 = vsel %vm423_vm6, %v2356_v38, %v2334_v3  ;;  %v1530_v40 = vpop.permute.xlu1 %1529  ;;  %v2359_v35 = vsel %vm423_vm6, %v2358_v18, %v5927_v24  ;;  %v1978_v3 = vld [vmem:[%s5266_s14 + $0x14] sm:$0x77] }
 0x17c   : > { %v2380_v4 = vmul.f32 %v2357_v29, %v2241_v41  ;;  %v5980_v8 = vpop.permute.xlu0 %1121  ;;  %v1542_v39 = vrot.slane %v1530_v40, 4  ;;  %v6003_v52 = vmul.f32 %v2359_v35, %v2242_v42  ;;  %v6022_v41 = vmul.f32 %v1142_v32, %v1023_v62 }
 0x17d   : > { %v861_v29 = vsel %vm339_vm1, %v848_v48, %v8138_v49 }
 0x17e   : > { %2405 = vrot.lane.b32.xlu1 %v5917_v57, %s5032_s28  ;;  %2409 = vrot.lane.b32.xlu0 %v2380_v4, %s5032_s28  ;;  %v2095_v57 = vsel %vm689_vm7, %v2094_v2, %v5951_v30  ;;  %v1552_v59 = vsel %vm339_vm1, %v1541_v44, %v1542_v39  ;;  %v1192_v54 = vrot.slane %v6022_v41, 7  ;;  %v862_v48 = vsel %vm853_vm3, %v861_v29, %v5500_v51  ;;  %v1436_v29 = vld [vmem:[%s5266_s14 + $0x24] sm:$0x77] }
 0x17f   : > { %v5997_v12 = vpop.permute.xlu1 %1119  ;;  %v6024_v38 = vmul.f32 %v2095_v57, %v1978_v3  ;;  %v1553_v44 = vsel %vm1237_vm5, %v1552_v59, %v1530_v40  ;;  %v2398_v32 = vcombine.high %v2380_v4, %v2380_v4  ;;  %v1554_v3 = vsel %vm339_vm1, %v1542_v39, %v8134_v46 }
 0x180   : > { %v6001_v43 = vpop.permute.xlu0 %2339  ;;  %v8137_v23 = vrot.slane %v5997_v12, 4  ;;  %v6043_v42 = vmul.f32 %v1553_v44, %v1435_v0  ;;  %v1327_v4 = vrot.slane %v5802_v1, %v5094_v10  ;;  %v1555_v39 = vsel %vm1237_vm5, %v1554_v3, %v5941_v61 }
 0x181   : > { %v2145_v40 = vrot.slane %v6024_v38, 3 }
 0x182   : > { %2413 = vrot.lane.b32.xlu1 %v6003_v52, %s5032_s28  ;;  %1900 = vrot.lane.b32.xlu0 %v1880_v58, %s5034_s23  ;;  %v1143_v2 = vsel %vm339_vm1, %v1130_v17, %v8137_v23  ;;  %v898_v58 = vcombine.high %v5762_v22, %v5762_v22  ;;  %v1603_v57 = vrot.slane %v6043_v42, 1  ;;  %v6067_v17 = vmul.f32 %v862_v48, %v742_v33 }
 0x183   : > { %v6018_v53 = vpop.permute.xlu1 %1809  ;;  %v1323_v22 = vrot.slane %v5802_v1, %v5092_v9 }
 0x184   : > { %v6026_v18 = vpop.permute.xlu0 %1535  ;;  %v1822_v0 = vrot.slane %v6018_v53, 4  ;;  %v912_v33 = vrot.slane %v6067_v17, 2 }
 0x186   : > { %933 = vrot.lane.b32.xlu1 %v910_v56, %s5039_s17  ;;  %2158 = vrot.lane.b32.xlu0 %v2141_v5, %s5033_s12  ;;  %v1024_v56 = vld [vmem:[%s5266_s14 + $0x20] sm:$0x77]  ;;  %v1144_v5 = vsel %vm1135_vm4, %v1143_v2, %v5997_v12  ;;  %v1180_v2 = vcombine.high %v5865_v25, %v5865_v25  ;;  %v1832_v3 = vsel %vm339_vm1, %v1821_v36, %v1822_v0 }
 0x187   : > { %v6038_v47 = vpop.permute.xlu1 %1811  ;;  %v1591_v25 = vcombine.high %v5827_v45, %v5827_v45 }
 0x188   : > { %v6045_v35 = vpop.permute.xlu0 %2077  ;;  %v1191_v50 = vrot.slane %v1180_v2, 7  ;;  %v1979_v2 = vld [vmem:[%s5266_s14 + $0x1c] sm:$0x77] }
 0x189   : > { %v1602_v30 = vrot.slane %v1591_v25, 1 }
 0x18a   : > { %1215 = vrot.lane.b32.xlu1 %v1192_v54, %s5036_s9  ;;  %2166 = vrot.lane.b32.xlu0 %v2145_v40, %s5033_s12  ;;  %v909_v54 = vrot.slane %v898_v58, 2  ;;  %v6084_v40 = vmul.f32 %v1144_v5, %v1024_v56  ;;  %v6097_v58 = vmul.f32 %v1555_v39, %v1436_v29  ;;  %v1288_v56 = vld [vmem:[%s5266_s14 + $0x14] sm:$0x77]  ;;  %v1833_v39 = vsel %vm955_vm8, %v1832_v3, %v6018_v53 }
 0x18b   : > { %v6059_v62 = vpop.permute.xlu1 %2337  ;;  %v8135_v53 = vrot.slane %v6038_v47, 4 }
 0x18c   : > { %v6065_v59 = vpop.permute.xlu0 %2079  ;;  %v1194_v37 = vrot.slane %v6084_v40, 7  ;;  %v1605_v45 = vrot.slane %v6097_v58, 1  ;;  %v2350_v3 = vrot.slane %v6059_v62, 4 }
 0x18e   : > { %2411 = vrot.lane.b32.xlu0 %v2398_v32, %s5032_s28  ;;  %1626 = vrot.lane.b32.xlu1 %v1603_v57, %s5035_s8  ;;  %v2086_v32 = vrot.slane %v5954_v7, 4  ;;  %v1370_v57 = vcombine.low %v1323_v22, %v1327_v4  ;;  %v1715_v4 = vld [vmem:[%s5266_s14 + $0x1c] sm:$0x77] }
 0x18f   : > { %v6081_v44 = vpop.permute.xlu1 %1533  ;;  %v6123_v46 = vmul.f32 %v1833_v39, %v1715_v4  ;;  %v1834_v4 = vsel %vm339_vm1, %v1822_v0, %v8135_v53  ;;  %v1716_v0 = vld [vmem:[%s5266_s14 + $0x24] sm:$0x77] }
 0x190   : > { %v6086_v48 = vpop.permute.xlu0 %1125  ;;  %v2096_v36 = vsel %vm339_vm1, %v2085_v34, %v2086_v32  ;;  %v1386_v29 = vmul.f32 %v1370_v57, %v1288_v56  ;;  %v1181_v56 = vcombine.high %v6022_v41, %v6022_v41  ;;  %v1331_v41 = vrot.slane %v5802_v1, %v5102_v15  ;;  %v1980_v53 = vld [vmem:[%s5266_s14 + $0x24] sm:$0x77] }
 0x191   : > { %v2097_v34 = vsel %vm689_vm7, %v2096_v36, %v5954_v7  ;;  %v1883_v36 = vrot.slane %v6123_v46, 6 }
 0x192   : > { %931 = vrot.lane.b32.xlu0 %v909_v54, %s5039_s17  ;;  %937 = vrot.lane.b32.xlu1 %v912_v33, %s5039_s17  ;;  %v899_v54 = vcombine.high %v5999_v63, %v5999_v63  ;;  %1421 = vst [vmem:[#allocation2 + $0xa8] sm:$0x70] %v1386_v29  ;;  %v6133_v25 = vmul.f32 %v2097_v34, %v1979_v2 }
 0x193   : > { %v6100_v5 = vpop.permute.xlu1 %1123 }
 0x194   : > { %v6105_v22 = vpop.permute.xlu0 %2343  ;;  %v911_v63 = vrot.slane %v899_v54, 2  ;;  %v1193_v54 = vrot.slane %v1181_v56, 7  ;;  %v2147_v34 = vrot.slane %v6133_v25, 3  ;;  %v2243_v56 = vld [vmem:[%s5266_s14 + $0x1c] sm:$0x77] }
 0x196   : > { %1213 = vrot.lane.b32.xlu0 %v1191_v50, %s5036_s9  ;;  %1219 = vrot.lane.b32.xlu1 %v1194_v37, %s5036_s9  ;;  %v1402_v37 = vcombine.low %v1386_v29, %v1386_v29  ;;  %v8136_v50 = vrot.slane %v5960_v60, 4  ;;  %v2360_v29 = vsel %vm339_vm1, %v2349_v21, %v2350_v3  ;;  %v1592_v21 = vcombine.high %v6043_v42, %v6043_v42 }
 0x197   : > { %v6118_v33 = vpop.permute.xlu1 %1813 }
 0x198   : > { %v6126_v57 = vpop.permute.xlu0 %2081  ;;  %1420 = vst [vmem:[#allocation2 + $0xa0] sm:$0x70] %v1402_v37  ;;  %v2098_v24 = vsel %vm339_vm1, %v2086_v32, %v8136_v50  ;;  %v1604_v23 = vrot.slane %v1592_v21, 1 }
 0x199   : > { %v2099_v32 = vsel %vm689_vm7, %v2098_v24, %v5960_v60 }
 0x19a   : > { %1624 = vrot.lane.b32.xlu0 %v1602_v30, %s5035_s8  ;;  %1630 = vrot.lane.b32.xlu1 %v1605_v45, %s5035_s8  ;;  %v1335_v45 = vrot.slane %v5802_v1, %v5104_v16  ;;  %v1835_v30 = vsel %vm955_vm8, %v1834_v4, %v6038_v47  ;;  %v1289_v1 = vld [vmem:[%s5266_s14 + $0x1c] sm:$0x77] }
 0x19b   : > { %v6135_v7 = vpop.permute.xlu1 %1815  ;;  %v6170_v4 = vmul.f32 %v1835_v30, %v1716_v0  ;;  %v6189_v0 = vmul.f32 %v2099_v32, %v1980_v53  ;;  %v2351_v30 = vrot.slane %v6001_v43, 4  ;;  %v1132_v53 = vrot.slane %v5980_v8, 4 }
 0x19c   : > { %v6142_v39 = vpop.permute.xlu0 %1205 }
 0x19e   : > { %935 = vrot.lane.b32.xlu0 %v911_v63, %s5039_s17  ;;  %1906 = vrot.lane.b32.xlu1 %v1883_v36, %s5034_s23  ;;  %v1371_v63 = vcombine.low %v1331_v41, %v1335_v45  ;;  %v2361_v36 = vsel %vm423_vm6, %v2360_v29, %v6059_v62  ;;  %v1871_v62 = vcombine.high %v5944_v31, %v5944_v31  ;;  %v850_v29 = vrot.slane %v5594_v26, 4 }
 0x19f   : > { %v6156_v2 = vpop.permute.xlu1 %2341  ;;  %v6179_v49 = vmul.f32 %v2361_v36, %v2243_v56  ;;  %v2362_v56 = vsel %vm339_vm1, %v2350_v3, %v2351_v30  ;;  %v743_v36 = vld [vmem:[%s5266_s14 + $0x28] sm:$0x77] }
 0x1a0   : > { %v6164_v37 = vpop.permute.xlu0 %1616  ;;  %v1387_v42 = vmul.f32 %v1371_v63, %v1289_v1  ;;  %v1882_v21 = vrot.slane %v1871_v62, 6  ;;  %v8163_v1 = vrot.slane %v5500_v51, 4  ;;  %v8164_v51 = vrot.slane %v5997_v12, 4 }
 0x1a2   : > { %1217 = vrot.lane.b32.xlu0 %v1193_v54, %s5036_s9  ;;  %2170 = vrot.lane.b32.xlu1 %v2147_v34, %s5033_s12  ;;  %1423 = vst [vmem:[#allocation2 + $0xb8] sm:$0x70] %v1387_v42  ;;  %v1403_v54 = vcombine.low %v1387_v42, %v1387_v42  ;;  %v1885_v34 = vrot.slane %v6170_v4, 6  ;;  %v863_v63 = vsel %vm339_vm1, %v8163_v1, %v850_v29 }
 0x1a3   : > { %v6177_v50 = vpop.permute.xlu1 %1537  ;;  %v864_v32 = vsel %vm853_vm3, %v863_v63, %v5594_v26  ;;  %v1145_v62 = vsel %vm339_vm1, %v8164_v51, %v1132_v53  ;;  %v2399_v1 = vcombine.high %v6003_v52, %v6003_v52  ;;  %v1872_v63 = vcombine.high %v6123_v46, %v6123_v46 }
 0x1a4   : > { %v6181_v41 = vpop.permute.xlu0 %929  ;;  %1422 = vst [vmem:[#allocation2 + $0xb0] sm:$0x70] %v1403_v54  ;;  %v2244_v54 = vld [vmem:[%s5266_s14 + $0x24] sm:$0x77]  ;;  %v6228_v26 = vmul.f32 %v864_v32, %v743_v36  ;;  %v1146_v12 = vsel %vm1135_vm4, %v1145_v62, %v5980_v8  ;;  %v851_v32 = vrot.slane %v5522_v55, 4  ;;  %v8165_v8 = vrot.slane %v5941_v61, 4 }
 0x1a5   : > { %v959_v45 = vsel %vm955_vm8, %v5915_v28, %v6181_v41  ;;  %v2135_v28 = vcombine.high %v6024_v38, %v6024_v38  ;;  %v1025_v36 = vld [vmem:[%s5266_s14 + $0x28] sm:$0x77]  ;;  %v2136_v46 = vcombine.high %v6133_v25, %v6133_v25  ;;  %v1133_v25 = vrot.slane %v6100_v5, 4 }
 0x1a6   : > { %991 = vst [vmem:[#allocation2 + $0x98] ss:$-124 sps:$4 sm:$0xc1] %v959_v45   ;;  %1628 = vrot.lane.b32.xlu0 %v1604_v23, %s5035_s8  ;;  %2417 = vrot.lane.b32.xlu1 %v6179_v49, %s5032_s28  ;;  %v2149_v23 = vrot.slane %v6189_v0, 3  ;;  %v6254_v62 = vmul.f32 %v1146_v12, %v1025_v36 }
 0x1a7   : > { %v6196_v31 = vpop.permute.xlu1 %1817  ;;  %v2146_v42 = vrot.slane %v2135_v28, 3  ;;  %v2148_v12 = vrot.slane %v2136_v46, 3  ;;  %v4895_v36 = vld [vmem:[%s8127_s1 + $0x44] ss:$8 sm:$0xf]  ;;  %v1545_v46 = vrot.slane %v6026_v18, 4 }
 0x1a8   : > { %v6201_v24 = vpop.permute.xlu0 %1209 }
 0x1aa   : > { %1904 = vrot.lane.b32.xlu0 %v1882_v21, %s5034_s23  ;;  %1910 = vrot.lane.b32.xlu1 %v1885_v34, %s5034_s23  ;;  %v2363_v34 = vsel %vm423_vm6, %v2362_v56, %v6001_v43  ;;  %v1544_v21 = vrot.slane %v6081_v44, 4 }
 0x1ab   : > { %v6212_v38 = vpop.permute.xlu1 %2345 }
 0x1ac   : > { %v1615_v45 = vpop.permute.xlu0 %1614  ;;  %v1556_v52 = vsel %vm339_vm1, %v8165_v8, %v1544_v21  ;;  %v4896_v8 = vld [vmem:[%s8127_s1 + $0x44] ss:$8 sm:$0xf0] }
 0x1ad   : > { %v1648_v3 = vsel %vm1135_vm4, %v1615_v45, %v6164_v37  ;;  %v914_v45 = vrot.slane %v6228_v26, 2 }
 0x1ae   : > { %1680 = vst [vmem:[#allocation2 + $0x100] ss:$-124 sps:$4 sm:$0x83] %v1648_v3   ;;  %2168 = vrot.lane.b32.xlu0 %v2146_v42, %s5033_s12  ;;  %2174 = vrot.lane.b32.xlu1 %v2149_v23, %s5033_s12  ;;  %v6240_v23 = vmul.f32 %v2363_v34, %v2244_v54  ;;  %v1884_v3 = vrot.slane %v1872_v63, 6  ;;  %v865_v54 = vsel %vm339_vm1, %v850_v29, %v851_v32  ;;  %v1437_v34 = vld [vmem:[%s5266_s14 + $0x2c] sm:$0x77] }
 0x1af   : > { %v1208_v28 = vpop.permute.xlu1 %1207  ;;  %v1196_v63 = vrot.slane %v6254_v62, 7 }
 0x1b0   : > { %v1239_v56 = vsel %vm1237_vm5, %v6142_v39, %v1208_v28  ;;  %v1240_v42 = vsel %vm1237_vm5, %v1208_v28, %v6201_v24  ;;  %v1557_v28 = vsel %vm1237_vm5, %v1556_v52, %v6081_v44  ;;  %v6282_v52 = vor.u32 %v4896_v8, %v4895_v36 }
 0x1b1   : > { %1271 = vst [vmem:[#allocation2 + $0x88] sm:$0xe] %v1239_v56  ;;  %1272 = vst [vmem:[#allocation2 + $0x90] sm:$0xe] %v1240_v42  ;;  %v866_v56 = vsel %vm853_vm3, %v865_v54, %v5522_v55  ;;  %v6272_v29 = vmul.f32 %v1557_v28, %v1437_v34  ;;  %v1182_v44 = vcombine.high %v6084_v40, %v6084_v40  ;;  %v2088_v40 = vrot.slane %v6045_v35, 4 }
 0x1b2   : > { %2415 = vrot.lane.b32.xlu0 %v2399_v1, %s5032_s28  ;;  %2421 = vrot.lane.b32.xlu1 %v6240_v23, %s5032_s28  ;;  %v1339_v54 = vrot.slane %v6282_v52, %v5098_v13  ;;  %v1343_v34 = vrot.slane %v6282_v52, %v5100_v14  ;;  %v1558_v14 = vsel %vm339_vm1, %v1544_v21, %v1545_v46 }
 0x1b3   : > { %v1619_v51 = vpop.permute.xlu1 %1618  ;;  %v1607_v28 = vrot.slane %v6272_v29, 1 }
 0x1b4   : > { %v1649_v61 = vsel %vm1135_vm4, %v6164_v37, %v1619_v51  ;;  %v744_v37 = vld [vmem:[%s5266_s14 + $0x30] sm:$0x77] }
 0x1b5   : > { %1681 = vst [vmem:[#allocation2 + $0x108] ss:$-124 sps:$4 sm:$0x83] %v1649_v61   ;;  %v6294_v61 = vmul.f32 %v866_v56, %v744_v37  ;;  %v1372_v56 = vcombine.low %v1339_v54, %v1343_v34 }
 0x1b6   : > { %1908 = vrot.lane.b32.xlu0 %v1884_v3, %s5034_s23  ;;  %941 = vrot.lane.b32.xlu1 %v914_v45, %s5039_s17  ;;  %v1147_v45 = vsel %vm339_vm1, %v1132_v53, %v1133_v25  ;;  %v900_v3 = vcombine.high %v6067_v17, %v6067_v17  ;;  %v2400_v53 = vcombine.high %v6179_v49, %v6179_v49  ;;  %v1824_v49 = vrot.slane %v6118_v33, 4 }
 0x1b7   : > { %v1204_v1 = vpop.permute.xlu1 %1203  ;;  %v1148_v37 = vsel %vm1135_vm4, %v1147_v45, %v6100_v5  ;;  %v916_v45 = vrot.slane %v6294_v61, 2 }
 0x1b8   : > { %v1238_v42 = vsel %vm1237_vm5, %v1204_v1, %v6142_v39  ;;  %v2506_v1 = vld [vmem:[#allocation2 + $0x8] sm:$0xff]  ;;  %v913_v8 = vrot.slane %v900_v3, 2 }
 0x1b9   : > { %1270 = vst [vmem:[#allocation2 + $0x80] sm:$0xe] %v1238_v42  ;;  %v6318_v42 = vpop.permute.xlu0 %1622 }
 0x1ba   : > { %2172 = vrot.lane.b32.xlu0 %v2148_v12, %s5033_s12  ;;  %1223 = vrot.lane.b32.xlu1 %v1196_v63, %s5036_s9  ;;  %v1026_v63 = vld [vmem:[%s5266_s14 + $0x30] sm:$0x77] }
 0x1bb   : > { %v6290_v39 = vpop.permute.xlu1 %1211  ;;  %v6323_v21 = vmul.f32 %v1148_v37, %v1026_v63  ;;  %v1195_v37 = vrot.slane %v1182_v44, 7  ;;  %v1347_v44 = vrot.slane %v6282_v52, %v5110_v20 }
 0x1bc   : > { %v1241_v12 = vsel %vm1237_vm5, %v6201_v24, %v6290_v39  ;;  %v2522_v17 = vld [vmem:[#allocation2 + $0x88] sm:$0xff] }
 0x1bd   : > { %1273 = vst [vmem:[#allocation2 + $0x98] sm:$0xe] %v1241_v12  ;;  %v4932_v13 = vpack.c.bf16 %v2522_v17, %v2506_v1  ;;  %v1290_v24 = vld [vmem:[%s5266_s14 + $0x24] sm:$0x77]  ;;  %v1559_v1 = vsel %vm1237_vm5, %v1558_v14, %v6026_v18  ;;  %v1438_v17 = vld [vmem:[%s5266_s14 + $0x34] sm:$0x77]  ;;  %v1593_v14 = vcombine.high %v6097_v58, %v6097_v58  ;;  %v1351_v58 = vrot.slane %v6282_v52, %v5117_v27 }
 0x1be   : > { %2419 = vrot.lane.b32.xlu0 %v2400_v53, %s5032_s28  ;;  %1634 = vrot.lane.b32.xlu1 %v1607_v28, %s5035_s8  ;;  %v1388_v54 = vmul.f32 %v1372_v56, %v1290_v24  ;;  %v2505_v28 = vld [vmem:[#allocation2] sm:$0xff]  ;;  %v1198_v56 = vrot.slane %v6323_v21, 7  ;;  %v6342_v24 = vmul.f32 %v1559_v1, %v1438_v17  ;;  %v1981_v17 = vld [vmem:[%s5266_s14 + $0x2c] sm:$0x77]  ;;  %v1825_v27 = vrot.slane %v6135_v7, 4 }
 0x1bf   : > { %4933 = vmatprep.subr.bf16.mxu0 %v4932_v13  ;;  %v1621_v36 = vpop.permute.xlu1 %1620  ;;  %v1439_v18 = vld [vmem:[%s5266_s14 + $0x3c] sm:$0x77] }
 0x1c0   : > { %v1650_v34 = vsel %vm1135_vm4, %v1619_v51, %v1621_v36  ;;  %v1651_v53 = vsel %vm1135_vm4, %v1621_v36, %v6318_v42  ;;  %v2521_v12 = vld [vmem:[#allocation2 + $0x80] sm:$0xff]  ;;  %1425 = vst [vmem:[#allocation2 + $0xc8] sm:$0x70] %v1388_v54  ;;  %v1404_v13 = vcombine.low %v1388_v54, %v1388_v54  ;;  %v8166_v51 = vrot.slane %v6038_v47, 4  ;;  %v1717_v36 = vld [vmem:[%s5266_s14 + $0x2c] sm:$0x77] }
 0x1c1   : > { %1682 = vst [vmem:[#allocation2 + $0x110] ss:$-124 sps:$4 sm:$0x83] %v1650_v34   ;;  %1683 = vst [vmem:[#allocation2 + $0x118] ss:$-124 sps:$4 sm:$0x83] %v1651_v53   ;;  %v4934_v3 = vpack.c.bf16 %v2521_v12, %v2505_v28  ;;  %v901_v34 = vcombine.high %v6228_v26, %v6228_v26 }
 0x1c2   : > { %v1836_v63 = vsel %vm339_vm1, %v8166_v51, %v1824_v49  ;;  %939 = vrot.lane.b32.xlu0 %v913_v8, %s5039_s17  ;;  %945 = vrot.lane.b32.xlu1 %v916_v45, %s5039_s17  ;;  %1424 = vst [vmem:[#allocation2 + $0xc0] sm:$0x70] %v1404_v13  ;;  %v8167_v54 = vrot.slane %v5960_v60, 4  ;;  %v2507_v45 = vld [vmem:[#allocation2 + $0x10] sm:$0xff]  ;;  %v1606_v60 = vrot.slane %v1593_v14, 1  ;;  %v1609_v28 = vrot.slane %v6342_v24, 1 }
 0x1c3   : > { %4935 = vmatpush1.bf16.msra.mxu0 %v4934_v3  ;;  %v1837_v47 = vsel %vm955_vm8, %v1836_v63, %v6118_v33  ;;  %v2508_v12 = vld [vmem:[#allocation2 + $0x18] sm:$0xff]  ;;  %v1373_v63 = vcombine.low %v1347_v44, %v1351_v58  ;;  %v2352_v26 = vrot.slane %v6156_v2, 4  ;;  %v915_v14 = vrot.slane %v901_v34, 2 }
 0x1c4   : > { %v2100_v8 = vsel %vm339_vm1, %v8167_v54, %v2088_v40  ;;  %v6358_v53 = vmul.f32 %v1837_v47, %v1717_v36  ;;  %v1183_v47 = vcombine.high %v6254_v62, %v6254_v62  ;;  %v1594_v58 = vcombine.high %v6272_v29, %v6272_v29 }
 0x1c5   : > { %v2101_v13 = vsel %vm689_vm7, %v2100_v8, %v6045_v35  ;;  %v2089_v8 = vrot.slane %v6065_v59, 4  ;;  %v2364_v44 = vsel %vm339_vm1, %v2351_v30, %v2352_v26  ;;  %v1873_v29 = vcombine.high %v6170_v4, %v6170_v4 }
 0x1c6   : > { %1221 = vrot.lane.b32.xlu0 %v1195_v37, %s5036_s9  ;;  %1227 = vrot.lane.b32.xlu1 %v1198_v56, %s5036_s9  ;;  %v1291_v37 = vld [vmem:[%s5266_s14 + $0x2c] sm:$0x77]  ;;  %v6369_v36 = vmul.f32 %v2101_v13, %v1981_v17  ;;  %v1887_v35 = vrot.slane %v6358_v53, 6  ;;  %v1197_v34 = vrot.slane %v1183_v47, 7  ;;  %v2365_v43 = vsel %vm423_vm6, %v2364_v44, %v6156_v2  ;;  %v1982_v17 = vld [vmem:[%s5266_s14 + $0x34] sm:$0x77] }
 0x1c7   : > { %v1389_v56 = vmul.f32 %v1373_v63, %v1291_v37  ;;  %v2102_v30 = vsel %vm339_vm1, %v2088_v40, %v2089_v8  ;;  %v852_v13 = vrot.slane %v5626_v6, 4  ;;  %v2353_v40 = vrot.slane %v6105_v22, 4 }
 0x1c8   : > { %v2524_v1 = vld [vmem:[#allocation2 + $0x98] sm:$0xff]  ;;  %v2523_v3 = vld [vmem:[#allocation2 + $0x90] sm:$0xff]  ;;  %v2151_v62 = vrot.slane %v6369_v36, 3  ;;  %v2103_v2 = vsel %vm689_vm7, %v2102_v30, %v6065_v59  ;;  %v2137_v4 = vcombine.high %v6189_v0, %v6189_v0  ;;  %v1546_v44 = vrot.slane %v6177_v50, 4 }
 0x1c9   : > { %v4940_v20 = vpack.c.bf16 %v2524_v1, %v2508_v12  ;;  %v4942_v51 = vpack.c.bf16 %v2523_v3, %v2507_v45  ;;  %1427 = vst [vmem:[#allocation2 + $0xd8] sm:$0x70] %v1389_v56  ;;  %v1405_v54 = vcombine.low %v1389_v56, %v1389_v56  ;;  %v1838_v45 = vsel %vm339_vm1, %v1824_v49, %v1825_v27  ;;  %v2245_v49 = vld [vmem:[%s5266_s14 + $0x2c] sm:$0x77] }
 0x1ca   : > { %1632 = vrot.lane.b32.xlu0 %v1606_v60, %s5035_s8  ;;  %1638 = vrot.lane.b32.xlu1 %v1609_v28, %s5035_s8  ;;  %v1718_v60 = vld [vmem:[%s5266_s14 + $0x34] sm:$0x77]  ;;  %v1839_v33 = vsel %vm955_vm8, %v1838_v45, %v6135_v7  ;;  %v1608_v28 = vrot.slane %v1594_v58, 1  ;;  %v6403_v1 = vmul.f32 %v2365_v43, %v2245_v49  ;;  %v867_v56 = vsel %vm339_vm1, %v851_v32, %v852_v13 }
 0x1cb   : > { %4941 = vmatprep.subr.bf16.mxu1 %v4940_v20  ;;  %1426 = vst [vmem:[#allocation2 + $0xd0] sm:$0x70] %v1405_v54  ;;  %v6401_v12 = vmul.f32 %v1839_v33, %v1718_v60  ;;  %v1886_v20 = vrot.slane %v1873_v29, 6  ;;  %v2150_v0 = vrot.slane %v2137_v4, 3  ;;  %v745_v54 = vld [vmem:[%s5266_s14 + $0x38] sm:$0x77]  ;;  %v868_v55 = vsel %vm853_vm3, %v867_v56, %v5626_v6 }
 0x1cc   : > { %4943 = vmatpush1.bf16.msra.mxu1 %v4942_v51  ;;  %v6415_v51 = vmul.f32 %v2103_v2, %v1982_v17  ;;  %v2246_v45 = vld [vmem:[%s5266_s14 + $0x34] sm:$0x77]  ;;  %v6444_v58 = vmul.f32 %v868_v55, %v745_v54  ;;  %v1874_v6 = vcombine.high %v6358_v53, %v6358_v53  ;;  %v1560_v33 = vsel %vm339_vm1, %v1545_v46, %v1546_v44 }
 0x1cd   : > { %v1889_v63 = vrot.slane %v6401_v12, 6  ;;  %v2138_v43 = vcombine.high %v6369_v36, %v6369_v36  ;;  %v1561_v46 = vsel %vm1237_vm5, %v1560_v33, %v6177_v50  ;;  %v2402_v54 = vcombine.high %v6403_v1, %v6403_v1 }
 0x1ce   : > { %943 = vrot.lane.b32.xlu0 %v915_v14, %s5039_s17  ;;  %1914 = vrot.lane.b32.xlu1 %v1887_v35, %s5034_s23  ;;  %v1134_v14 = vrot.slane %v6086_v48, 4  ;;  %v2366_v35 = vsel %vm339_vm1, %v2352_v26, %v2353_v40  ;;  %v2153_v47 = vrot.slane %v6415_v51, 3  ;;  %v918_v49 = vrot.slane %v6444_v58, 2 }
 0x1cf   : > { %v2367_v32 = vsel %vm423_vm6, %v2366_v35, %v6105_v22  ;;  %v1888_v30 = vrot.slane %v1874_v6, 6  ;;  %v2152_v4 = vrot.slane %v2138_v43, 3  ;;  %v1595_v7 = vcombine.high %v6342_v24, %v6342_v24 }
 0x1d0   : > { %v1149_v26 = vsel %vm339_vm1, %v1133_v25, %v1134_v14  ;;  %v6450_v60 = vmul.f32 %v2367_v32, %v2246_v45  ;;  %v1027_v25 = vld [vmem:[%s5266_s14 + $0x38] sm:$0x77]  ;;  %v902_v32 = vcombine.high %v6294_v61, %v6294_v61  ;;  %v1184_v61 = vcombine.high %v6323_v21, %v6323_v21 }
 0x1d1   : > { %v1150_v5 = vsel %vm1135_vm4, %v1149_v26, %v6086_v48  ;;  %v1028_v26 = vld [vmem:[%s5266_s14 + $0x40] sm:$0x7]  ;;  %v1363_v24 = vrot.slane %v6282_v52, %v5102_v15 }
 0x1d2   : > { %1225 = vrot.lane.b32.xlu0 %v1197_v34, %s5036_s9  ;;  %2178 = vrot.lane.b32.xlu1 %v2151_v62, %s5033_s12  ;;  %v2401_v34 = vcombine.high %v6240_v23, %v6240_v23  ;;  %v6467_v29 = vmul.f32 %v1150_v5, %v1027_v25  ;;  %v1168_v5 = vmul.f32 %v1134_v14, %v1028_v26  ;;  %v1199_v14 = vrot.slane %v1184_v61, 7 }
 0x1d4   : > { %v1897_v3 = vpop.permute.xlu1 %1896  ;;  %v1200_v36 = vrot.slane %v6467_v29, 7  ;;  %v1202_v21 = vrot.slane %v1168_v5, 7 }
 0x1d6   : > { %1636 = vrot.lane.b32.xlu0 %v1608_v28, %s5035_s8  ;;  %2425 = vrot.lane.b32.xlu1 %v6403_v1, %s5032_s28  ;;  %v1292_v1 = vld [vmem:[%s5266_s14 + $0x34] sm:$0x77] }
 0x1d8   : > { %v6418_v37 = vpop.permute.xlu1 %2160 }
 0x1da   : > { %1912 = vrot.lane.b32.xlu0 %v1886_v20, %s5034_s23  ;;  %1918 = vrot.lane.b32.xlu1 %v1889_v63, %s5034_s23  ;;  %v6477_v20 = vmul.f32 %v1561_v46, %v1439_v18  ;;  %v746_v63 = vld [vmem:[%s5266_s14 + $0x40] sm:$0x7]  ;;  %v2090_v18 = vrot.slane %v6126_v57, 4 }
 0x1dc   : > { %v1611_v55 = vrot.slane %v6477_v20, 1  ;;  %v2104_v50 = vsel %vm339_vm1, %v2089_v8, %v2090_v18 }
 0x1de   : > { %2176 = vrot.lane.b32.xlu0 %v2150_v0, %s5033_s12  ;;  %2182 = vrot.lane.b32.xlu1 %v2153_v47, %s5033_s12  ;;  %v1359_v0 = vrot.slane %v6282_v52, %v5094_v10  ;;  %v886_v47 = vmul.f32 %v852_v13, %v746_v63  ;;  %v1826_v10 = vrot.slane %v6196_v31, 4 }
 0x1df   : > { %v2408_v62 = vpop.permute.xlu1 %2407 }
 0x1e0   : > { %v1840_v48 = vsel %vm339_vm1, %v1825_v27, %v1826_v10 }
 0x1e1   : > { %v1841_v27 = vsel %vm955_vm8, %v1840_v48, %v6196_v31  ;;  %v2139_v31 = vcombine.high %v6415_v51, %v6415_v51 }
 0x1e2   : > { %2423 = vrot.lane.b32.xlu0 %v2401_v34, %s5032_s28  ;;  %2429 = vrot.lane.b32.xlu1 %v6450_v60, %s5032_s28  ;;  %v920_v34 = vrot.slane %v886_v47, 2  ;;  %v2105_v47 = vsel %vm689_vm7, %v2104_v50, %v6126_v57 }
 0x1e3   : > { %v1895_v53 = vpop.permute.xlu1 %1894 }
 0x1e4   : > { %v1928_v23 = vsel %vm853_vm3, %v1895_v53, %v1897_v3  ;;  %v917_v53 = vrot.slane %v902_v32, 2  ;;  %v1293_v32 = vld [vmem:[%s5266_s14 + $0x3c] sm:$0x77] }
 0x1e5   : > { %1960 = vst [vmem:[#allocation2 + $0x100] sm:$0x1c] %v1928_v23  ;;  %v1440_v23 = vld [vmem:[%s5266_s14 + $0x44] sm:$0x7] }
 0x1e6   : > { %v1899_v28 = vpop.permute.xlu0 %1898  ;;  %1916 = vrot.lane.b32.xlu0 %v1888_v30, %s5034_s23  ;;  %949 = vrot.lane.b32.xlu1 %v918_v49, %s5039_s17 }
 0x1e7   : > { %v6474_v17 = vpop.permute.xlu1 %1902  ;;  %v1929_v2 = vsel %vm853_vm3, %v1897_v3, %v1899_v28  ;;  %v1355_v3 = vrot.slane %v6282_v52, %v5092_v9 }
 0x1e8   : > { %1961 = vst [vmem:[#allocation2 + $0x108] sm:$0x1c] %v1929_v2 }
 0x1e9   : > { %v1374_v6 = vcombine.low %v1355_v3, %v1359_v0  ;;  %v1610_v3 = vrot.slane %v1595_v7, 1  ;;  %v1983_v0 = vld [vmem:[%s5266_s14 + $0x3c] sm:$0x77] }
 0x1ea   : > { %v2163_v56 = vpop.permute.xlu0 %2162  ;;  %2180 = vrot.lane.b32.xlu0 %v2152_v4, %s5033_s12  ;;  %1231 = vrot.lane.b32.xlu1 %v1200_v36, %s5036_s9  ;;  %v1719_v4 = vld [vmem:[%s5266_s14 + $0x3c] sm:$0x77] }
 0x1eb   : > { %v2193_v35 = vsel %vm587_vm2, %v6418_v37, %v2163_v56  ;;  %v1390_v13 = vmul.f32 %v1374_v6, %v1292_v1  ;;  %v6546_v59 = vmul.f32 %v1841_v27, %v1719_v4  ;;  %v6559_v6 = vmul.f32 %v2105_v47, %v1983_v0 }
 0x1ec   : > { %2225 = vst [vmem:[#allocation2 + $0x108] sm:$0xe0] %v2193_v35  ;;  %v6492_v45 = vpop.permute.xlu1 %2164 }
 0x1ed   : > { %v2194_v9 = vsel %vm587_vm2, %v2163_v56, %v6492_v45  ;;  %1429 = vst [vmem:[#allocation2 + $0xe8] sm:$0x70] %v1390_v13  ;;  %v1406_v30 = vcombine.low %v1390_v13, %v1390_v13  ;;  %v1891_v1 = vrot.slane %v6546_v59, 6 }
 0x1ee   : > { %2226 = vst [vmem:[#allocation2 + $0x110] sm:$0xe0] %v2194_v9  ;;  %2427 = vrot.lane.b32.xlu0 %v2402_v54, %s5032_s28  ;;  %1642 = vrot.lane.b32.xlu1 %v1611_v55, %s5035_s8 }
 0x1ef   : > { %1428 = vst [vmem:[#allocation2 + $0xe0] sm:$0x70] %v1406_v30  ;;  %v2247_v30 = vld [vmem:[%s5266_s14 + $0x3c] sm:$0x77] }
 0x1f0   : > { %v6507_v25 = vpop.permute.xlu0 %2409  ;;  %v2406_v33 = vpop.permute.xlu1 %2405 }
 0x1f1   : > { %v2440_v49 = vsel %vm337_vm0, %v2408_v62, %v6507_v25  ;;  %v2439_v43 = vsel %vm337_vm0, %v2406_v33, %v2408_v62  ;;  %v1579_v62 = vmul.f32 %v1546_v44, %v1440_v23  ;;  %v1367_v44 = vrot.slane %v6282_v52, %v5104_v16 }
 0x1f2   : > { %2472 = vst [vmem:[#allocation2 + $0x188] sm:$0x7] %v2440_v49  ;;  %2471 = vst [vmem:[#allocation2 + $0x180] sm:$0x7] %v2439_v43  ;;  %947 = vrot.lane.b32.xlu0 %v917_v53, %s5039_s17  ;;  %953 = vrot.lane.b32.xlu1 %v920_v34, %s5039_s17  ;;  %v1185_v34 = vcombine.high %v6467_v29, %v6467_v29  ;;  %v2155_v29 = vrot.slane %v6559_v6, 3  ;;  %v1596_v53 = vcombine.high %v6477_v20, %v6477_v20 }
 0x1f3   : > { %v1613_v56 = vrot.slane %v1579_v62, 1  ;;  %v2538_v54 = vld [vmem:[#allocation2 + $0x108] sm:$0xff]  ;;  %v1375_v52 = vcombine.low %v1363_v24, %v1367_v44  ;;  %v1875_v62 = vcombine.high %v6401_v12, %v6401_v12 }
 0x1f4   : > { %v1901_v46 = vpop.permute.xlu0 %1900  ;;  %v6523_v2 = vpop.permute.xlu1 %2413  ;;  %v1201_v43 = vrot.slane %v1185_v34, 7 }
 0x1f5   : > { %v1930_v36 = vsel %vm853_vm3, %v1899_v28, %v1901_v46  ;;  %v1931_v63 = vsel %vm853_vm3, %v1901_v46, %v6474_v17  ;;  %v903_v28 = vcombine.high %v6444_v58, %v6444_v58  ;;  %v2354_v58 = vrot.slane %v6212_v38, 4 }
 0x1f6   : > { %1962 = vst [vmem:[#allocation2 + $0x110] sm:$0x1c] %v1930_v36  ;;  %1963 = vst [vmem:[#allocation2 + $0x118] sm:$0x1c] %v1931_v63  ;;  %1229 = vrot.lane.b32.xlu0 %v1199_v14, %s5036_s9  ;;  %1235 = vrot.lane.b32.xlu1 %v1202_v21, %s5036_s9  ;;  %v1391_v26 = vmul.f32 %v1375_v52, %v1293_v32  ;;  %v1612_v46 = vrot.slane %v1596_v53, 1  ;;  %v6604_v36 = vld [vmem:[%s8128_s2] sm:$0xff] }
 0x1f7   : > { %v919_v9 = vrot.slane %v903_v28, 2  ;;  %v2368_v33 = vsel %vm339_vm1, %v2353_v40, %v2354_v58  ;;  %v1984_v63 = vld [vmem:[%s5266_s14 + $0x44] sm:$0x7]  ;;  %vm3476_vm1 = vcmask 1047559  }
 0x1f8   : > { %v2159_v8 = vpop.permute.xlu0 %2158  ;;  %v6548_v35 = vpop.permute.xlu1 %933  ;;  %1431 = vst [vmem:[#allocation2 + $0xf8] sm:$0x70] %v1391_v26  ;;  %v1407_v61 = vcombine.low %v1391_v26, %v1391_v26  ;;  %v2369_v22 = vsel %vm423_vm6, %v2368_v33, %v6212_v38  ;;  %v2248_v32 = vld [vmem:[%s5266_s14 + $0x44] sm:$0x7]  ;;  %v2140_v38 = vcombine.high %v6559_v6, %v6559_v6  ;;  %vm4772_vm6 = vcmask 48128  }
 0x1f9   : > { %v2192_v15 = vsel %vm587_vm2, %v2159_v8, %v6418_v37  ;;  %v2554_v16 = vld [vmem:[#allocation2 + $0x188] sm:$0xff]  ;;  %v2553_v14 = vld [vmem:[#allocation2 + $0x180] sm:$0xff]  ;;  %v6597_v7 = vmul.f32 %v2369_v22, %v2247_v30  ;;  %v8168_v8 = vmov 0.0   ;;  %v2387_v34 = vmul.f32 %v2354_v58, %v2248_v32 }
 0x1fa   : > { %2224 = vst [vmem:[#allocation2 + $0x100] sm:$0xe0] %v2192_v15  ;;  %1640 = vrot.lane.b32.xlu0 %v1610_v3, %s5035_s8  ;;  %1646 = vrot.lane.b32.xlu1 %v1613_v56, %s5035_s8  ;;  %v4936_v55 = vpack.c.bf16 %v2554_v16, %v2538_v54  ;;  %1430 = vst [vmem:[#allocation2 + $0xf0] sm:$0x70] %v1407_v61  ;;  %v6626_v3 = vld [vmem:[%s8128_s2 + $0x8] sm:$0xff]  ;;  %v2154_v16 = vrot.slane %v2139_v31, 3  ;;  %v2403_v61 = vcombine.high %v6450_v60, %v6450_v60 }
 0x1fc   : > { %v6562_v37 = vpop.permute.xlu0 %2166  ;;  %4937 = vmatprep.subr.bf16.mxu0 %v4936_v55  ;;  %v6564_v13 = vpop.permute.xlu1 %1215 }
 0x1fd   : > { %v2195_v5 = vsel %vm587_vm2, %v6492_v45, %v6562_v37  ;;  %v1720_v45 = vld [vmem:[%s5266_s14 + $0x44] sm:$0x7]  ;;  %v2539_v56 = vld [vmem:[#allocation2 + $0x110] sm:$0xff] }
 0x1fe   : > { %2227 = vst [vmem:[#allocation2 + $0x118] sm:$0xe0] %v2195_v5  ;;  %951 = vrot.lane.b32.xlu0 %v919_v9, %s5039_s17  ;;  %1922 = vrot.lane.b32.xlu1 %v1891_v1, %s5034_s23  ;;  %v1876_v1 = vcombine.high %v6546_v59, %v6546_v59 }
 0x200   : > { %v2412_v23 = vpop.permute.xlu0 %2411  ;;  %v6582_v49 = vpop.permute.xlu1 %1626  ;;  %v1892_v59 = vrot.slane %v1876_v1, 6 }
 0x201   : > { %v2441_v40 = vsel %vm337_vm0, %v6507_v25, %v2412_v23  ;;  %v2442_v48 = vsel %vm337_vm0, %v2412_v23, %v6523_v2  ;;  %v2537_v21 = vld [vmem:[#allocation2 + $0x100] sm:$0xff]  ;;  %v1859_v25 = vmul.f32 %v1826_v10, %v1720_v45  ;;  %v2123_v10 = vmul.f32 %v2090_v18, %v1984_v63 }
 0x202   : > { %2473 = vst [vmem:[#allocation2 + $0x190] sm:$0x7] %v2441_v40  ;;  %2474 = vst [vmem:[#allocation2 + $0x198] sm:$0x7] %v2442_v48  ;;  %1233 = vrot.lane.b32.xlu0 %v1201_v43, %s5036_s9  ;;  %2186 = vrot.lane.b32.xlu1 %v2155_v29, %s5033_s12  ;;  %v4938_v20 = vpack.c.bf16 %v2553_v14, %v2537_v21  ;;  %v2156_v40 = vrot.slane %v2140_v38, 3 }
 0x203   : > { %v1893_v24 = vrot.slane %v1859_v25, 6 }
 0x204   : > { %v932_v4 = vpop.permute.xlu0 %931  ;;  %4939 = vmatpush1.bf16.msra.mxu0 %v4938_v20  ;;  %v6599_v27 = vpop.permute.xlu1 %937  ;;  %v2404_v20 = vcombine.high %v6597_v7, %v6597_v7 }
 0x205   : > { %v960_v50 = vsel %vm955_vm8, %v6181_v41, %v932_v4  ;;  %v961_v12 = vsel %vm955_vm8, %v932_v4, %v6548_v35  ;;  %v1890_v41 = vrot.slane %v1875_v62, 6  ;;  %v2540_v51 = vld [vmem:[#allocation2 + $0x118] sm:$0xff] }
 0x206   : > { %992 = vst [vmem:[#allocation2 + $0xa0] ss:$-124 sps:$4 sm:$0xc1] %v960_v50   ;;  %993 = vst [vmem:[#allocation2 + $0xa8] ss:$-124 sps:$4 sm:$0xc1] %v961_v12   ;;  %1644 = vrot.lane.b32.xlu0 %v1612_v46, %s5035_s8  ;;  %2433 = vrot.lane.b32.xlu1 %v6597_v7, %s5032_s28 }
 0x207   : > { %4913 = vmatmul.mubr.msk.f32.vlgmr.msra.gmra.mrb[0].mxu0 %vm2569_vm9, %v6604_v36 }
 0x208   : > { %v1214_v44 = vpop.permute.xlu0 %1213  ;;  %v6620_v28 = vpop.permute.xlu1 %1219  ;;  %2646 = vmatprep.mubr.f32.mxu0 %v8168_v8 }
 0x209   : > { %v1242_v0 = vsel %vm1237_vm5, %v6290_v39, %v1214_v44  ;;  %v1243_v57 = vsel %vm1237_vm5, %v1214_v44, %v6564_v13  ;;  %v2556_v18 = vld [vmem:[#allocation2 + $0x198] sm:$0xff]  ;;  %v2555_v47 = vld [vmem:[#allocation2 + $0x190] sm:$0xff]  ;;  %v2157_v39 = vrot.slane %v2123_v10, 3 }
 0x20a   : > { %1274 = vst [vmem:[#allocation2 + $0xa0] sm:$0xe] %v1242_v0  ;;  %1275 = vst [vmem:[#allocation2 + $0xa8] sm:$0xe] %v1243_v57  ;;  %1920 = vrot.lane.b32.xlu0 %v1890_v41, %s5034_s23  ;;  %1926 = vrot.lane.b32.xlu1 %v1893_v24, %s5034_s23  ;;  %v4944_v15 = vpack.c.bf16 %v2556_v18, %v2540_v51  ;;  %v4946_v54 = vpack.c.bf16 %v2555_v47, %v2539_v56 }
 0x20b   : > { %4914 = vmatmul.mubr.msk.f32.gmra.mrb[2].mxu0 %vm2569_vm9, %v6626_v3 }
 0x20c   : > { %v1625_v52 = vpop.permute.xlu0 %1624  ;;  %4945 = vmatprep.subr.bf16.mxu1 %v4944_v15  ;;  %v6636_v55 = vpop.permute.xlu1 %1630  ;;  %2794 = vmatprep.mubr.f32.mxu0 %v8168_v8 }
 0x20d   : > { %v1652_v26 = vsel %vm1135_vm4, %v6318_v42, %v1625_v52  ;;  %v1653_v9 = vsel %vm1135_vm4, %v1625_v52, %v6582_v49  ;;  %4947 = vmatpush1.bf16.msra.mxu1 %v4946_v54  ;;  %v2510_v53 = vld [vmem:[#allocation2 + $0x28] sm:$0xff]  ;;  %v2509_v43 = vld [vmem:[#allocation2 + $0x20] sm:$0xff] }
 0x20e   : > { %1684 = vst [vmem:[#allocation2 + $0x120] ss:$-124 sps:$4 sm:$0x83] %v1652_v26   ;;  %1685 = vst [vmem:[#allocation2 + $0x128] ss:$-124 sps:$4 sm:$0x83] %v1653_v9   ;;  %2184 = vrot.lane.b32.xlu0 %v2154_v16, %s5033_s12  ;;  %2190 = vrot.lane.b32.xlu1 %v2157_v39, %s5033_s12 }
 0x210   : > { %v936_v5 = vpop.permute.xlu0 %935  ;;  %4915 = vmatmul.mubr.msk.f32.vlgmr.msra.gmra.mrb[0].mxu1 %vm2569_vm9, %v6604_v36  ;;  %v6652_v42 = vpop.permute.xlu1 %1906 }
 0x211   : > { %v962_v33 = vsel %vm955_vm8, %v6548_v35, %v936_v5  ;;  %v963_v29 = vsel %vm955_vm8, %v936_v5, %v6599_v27  ;;  %2723 = vmatprep.mubr.f32.mxu1 %v8168_v8 }
 0x212   : > { %994 = vst [vmem:[#allocation2 + $0xb0] ss:$-124 sps:$4 sm:$0xc1] %v962_v33   ;;  %995 = vst [vmem:[#allocation2 + $0xb8] ss:$-124 sps:$4 sm:$0xc1] %v963_v29   ;;  %2431 = vrot.lane.b32.xlu0 %v2403_v61, %s5032_s28  ;;  %2437 = vrot.lane.b32.xlu1 %v2387_v34, %s5032_s28 }
 0x214   : > { %v1218_v58 = vpop.permute.xlu0 %1217  ;;  %v2171_v60 = vpop.permute.xlu1 %2170  ;;  %4916 = vmatmul.mubr.msk.f32.gmra.mrb[2].mxu1 %vm2569_vm9, %v6626_v3 }
 0x215   : > { %v1244_v35 = vsel %vm1237_vm5, %v6564_v13, %v1218_v58  ;;  %v1245_v45 = vsel %vm1237_vm5, %v1218_v58, %v6620_v28  ;;  %v2526_v23 = vld [vmem:[#allocation2 + $0xa8] sm:$0xff]  ;;  %v2525_v30 = vld [vmem:[#allocation2 + $0xa0] sm:$0xff]  ;;  %2871 = vmatprep.mubr.f32.mxu1 %v8168_v8 }
 0x216   : > { %1276 = vst [vmem:[#allocation2 + $0xb0] sm:$0xe] %v1244_v35  ;;  %1277 = vst [vmem:[#allocation2 + $0xb8] sm:$0xe] %v1245_v45  ;;  %1924 = vrot.lane.b32.xlu0 %v1892_v59, %s5034_s23  ;;  %v4948_v6 = vpack.c.bf16 %v2526_v23, %v2510_v53  ;;  %v4950_v22 = vpack.c.bf16 %v2525_v30, %v2509_v43 }
 0x218   : > { %v1629_v48 = vpop.permute.xlu0 %1628  ;;  %4949 = vmatprep.subr.bf16.mxu0 %v4948_v6  ;;  %v2418_v21 = vpop.permute.xlu1 %2417 }
 0x219   : > { %v1654_v13 = vsel %vm1135_vm4, %v6582_v49, %v1629_v48  ;;  %v1655_v14 = vsel %vm1135_vm4, %v1629_v48, %v6636_v55  ;;  %4951 = vmatpush1.bf16.msra.mxu0 %v4950_v22  ;;  %v2512_v50 = vld [vmem:[#allocation2 + $0x38] sm:$0xff]  ;;  %v2511_v10 = vld [vmem:[#allocation2 + $0x30] sm:$0xff] }
 0x21a   : > { %1686 = vst [vmem:[#allocation2 + $0x130] ss:$-124 sps:$4 sm:$0x83] %v1654_v13   ;;  %1687 = vst [vmem:[#allocation2 + $0x138] ss:$-124 sps:$4 sm:$0x83] %v1655_v14   ;;  %2188 = vrot.lane.b32.xlu0 %v2156_v40, %s5033_s12 }
 0x21c   : > { %v1905_v62 = vpop.permute.xlu0 %1904  ;;  %v6680_v46 = vpop.permute.xlu1 %1910 }
 0x21d   : > { %v1932_v25 = vsel %vm853_vm3, %v6474_v17, %v1905_v62  ;;  %v1933_v49 = vsel %vm853_vm3, %v1905_v62, %v6652_v42 }
 0x21e   : > { %1964 = vst [vmem:[#allocation2 + $0x120] sm:$0x1c] %v1932_v25  ;;  %1965 = vst [vmem:[#allocation2 + $0x128] sm:$0x1c] %v1933_v49  ;;  %2435 = vrot.lane.b32.xlu0 %v2404_v20, %s5032_s28 }
 0x220   : > { %v2169_v4 = vpop.permute.xlu0 %2168  ;;  %v6687_v63 = vpop.permute.xlu1 %2174 }
 0x221   : > { %v2196_v7 = vsel %vm587_vm2, %v6562_v37, %v2169_v4  ;;  %v2197_v12 = vsel %vm587_vm2, %v2169_v4, %v2171_v60  ;;  %v2528_v31 = vld [vmem:[#allocation2 + $0xb8] sm:$0xff]  ;;  %v2527_v41 = vld [vmem:[#allocation2 + $0xb0] sm:$0xff] }
 0x222   : > { %2228 = vst [vmem:[#allocation2 + $0x120] sm:$0xe0] %v2196_v7  ;;  %2229 = vst [vmem:[#allocation2 + $0x128] sm:$0xe0] %v2197_v12  ;;  %v4956_v17 = vpack.c.bf16 %v2528_v31, %v2512_v50  ;;  %v4958_v24 = vpack.c.bf16 %v2527_v41, %v2511_v10 }
 0x224   : > { %v2416_v44 = vpop.permute.xlu0 %2415  ;;  %4957 = vmatprep.subr.bf16.mxu1 %v4956_v17  ;;  %v6692_v56 = vpop.permute.xlu1 %2421 }
 0x225   : > { %v2443_v0 = vsel %vm337_vm0, %v6523_v2, %v2416_v44  ;;  %v2444_v57 = vsel %vm337_vm0, %v2416_v44, %v2418_v21  ;;  %4959 = vmatpush1.bf16.msra.mxu1 %v4958_v24 }
 0x226   : > { %2475 = vst [vmem:[#allocation2 + $0x1a0] sm:$0x7] %v2443_v0  ;;  %2476 = vst [vmem:[#allocation2 + $0x1a8] sm:$0x7] %v2444_v57 }
 0x228   : > { %v1909_v37 = vpop.permute.xlu0 %1908  ;;  %v942_v51 = vpop.permute.xlu1 %941 }
 0x229   : > { %v1934_v18 = vsel %vm853_vm3, %v6652_v42, %v1909_v37  ;;  %v1935_v47 = vsel %vm853_vm3, %v1909_v37, %v6680_v46  ;;  %v2542_v16 = vld [vmem:[#allocation2 + $0x128] sm:$0xff]  ;;  %v2541_v32 = vld [vmem:[#allocation2 + $0x120] sm:$0xff] }
 0x22a   : > { %1966 = vst [vmem:[#allocation2 + $0x130] sm:$0x1c] %v1934_v18  ;;  %1967 = vst [vmem:[#allocation2 + $0x138] sm:$0x1c] %v1935_v47 }
 0x22c   : > { %v2173_v15 = vpop.permute.xlu0 %2172  ;;  %v1224_v54 = vpop.permute.xlu1 %1223 }
 0x22d   : > { %v2198_v2 = vsel %vm587_vm2, %v2171_v60, %v2173_v15  ;;  %v2199_v39 = vsel %vm587_vm2, %v2173_v15, %v6687_v63  ;;  %v2558_v52 = vld [vmem:[#allocation2 + $0x1a8] sm:$0xff]  ;;  %v2557_v26 = vld [vmem:[#allocation2 + $0x1a0] sm:$0xff] }
 0x22e   : > { %2230 = vst [vmem:[#allocation2 + $0x130] sm:$0xe0] %v2198_v2  ;;  %2231 = vst [vmem:[#allocation2 + $0x138] sm:$0xe0] %v2199_v39  ;;  %v4952_v9 = vpack.c.bf16 %v2558_v52, %v2542_v16  ;;  %v4954_v1 = vpack.c.bf16 %v2557_v26, %v2541_v32 }
 0x230   : > { %v2420_v34 = vpop.permute.xlu0 %2419  ;;  %4953 = vmatprep.subr.bf16.mxu0 %v4952_v9  ;;  %v1635_v5 = vpop.permute.xlu1 %1634 }
 0x231   : > { %v2445_v42 = vsel %vm337_vm0, %v2418_v21, %v2420_v34  ;;  %v2446_v61 = vsel %vm337_vm0, %v2420_v34, %v6692_v56  ;;  %4955 = vmatpush1.bf16.msra.mxu0 %v4954_v1 }
 0x232   : > { %2477 = vst [vmem:[#allocation2 + $0x1b0] sm:$0x7] %v2445_v42  ;;  %2478 = vst [vmem:[#allocation2 + $0x1b8] sm:$0x7] %v2446_v61 }
 0x234   : > { %v940_v33 = vpop.permute.xlu0 %939  ;;  %v6707_v29 = vpop.permute.xlu1 %945  ;;  %4917 = vmatmul.mubr.msk.f32.vlgmr.msra.gmra.mrb[4].mxu0 %vm2569_vm9, %v6604_v36 }
 0x235   : > { %v964_v38 = vsel %vm955_vm8, %v6599_v27, %v940_v33  ;;  %v965_v59 = vsel %vm955_vm8, %v940_v33, %v942_v51  ;;  %2800 = vmatprep.mubr.f32.mxu0 %v8168_v8  ;;  %v2544_v53 = vld [vmem:[#allocation2 + $0x138] sm:$0xff]  ;;  %v2543_v27 = vld [vmem:[#allocation2 + $0x130] sm:$0xff] }
 0x236   : > { %996 = vst [vmem:[#allocation2 + $0xc0] ss:$-124 sps:$4 sm:$0xc1] %v964_v38   ;;  %997 = vst [vmem:[#allocation2 + $0xc8] ss:$-124 sps:$4 sm:$0xc1] %v965_v59  }
 0x238   : > { %v1222_v58 = vpop.permute.xlu0 %1221  ;;  %v6715_v60 = vpop.permute.xlu1 %1227  ;;  %4918 = vmatmul.mubr.msk.f32.gmra.mrb[6].mxu0 %vm2569_vm9, %v6626_v3 }
 0x239   : > { %v1246_v35 = vsel %vm1237_vm5, %v6620_v28, %v1222_v58  ;;  %v1247_v45 = vsel %vm1237_vm5, %v1222_v58, %v1224_v54  ;;  %v2560_v23 = vld [vmem:[#allocation2 + $0x1b8] sm:$0xff]  ;;  %v2559_v43 = vld [vmem:[#allocation2 + $0x1b0] sm:$0xff]  ;;  %2948 = vmatprep.mubr.f32.mxu0 %v8168_v8 }
 0x23a   : > { %1278 = vst [vmem:[#allocation2 + $0xc0] sm:$0xe] %v1246_v35  ;;  %1279 = vst [vmem:[#allocation2 + $0xc8] sm:$0xe] %v1247_v45  ;;  %v4960_v30 = vpack.c.bf16 %v2560_v23, %v2544_v53  ;;  %v4962_v6 = vpack.c.bf16 %v2559_v43, %v2543_v27 }
 0x23c   : > { %v1633_v22 = vpop.permute.xlu0 %1632  ;;  %4961 = vmatprep.subr.bf16.mxu1 %v4960_v30  ;;  %v6723_v40 = vpop.permute.xlu1 %1638 }
 0x23d   : > { %v1656_v48 = vsel %vm1135_vm4, %v6636_v55, %v1633_v22  ;;  %v1657_v28 = vsel %vm1135_vm4, %v1633_v22, %v1635_v5  ;;  %4963 = vmatpush1.bf16.msra.mxu1 %v4962_v6  ;;  %v2514_v25 = vld [vmem:[#allocation2 + $0x48] sm:$0xff]  ;;  %v2513_v7 = vld [vmem:[#allocation2 + $0x40] sm:$0xff] }
 0x23e   : > { %1688 = vst [vmem:[#allocation2 + $0x140] ss:$-124 sps:$4 sm:$0x83] %v1656_v48   ;;  %1689 = vst [vmem:[#allocation2 + $0x148] ss:$-124 sps:$4 sm:$0x83] %v1657_v28  }
 0x240   : > { %v944_v21 = vpop.permute.xlu0 %943  ;;  %v1915_v13 = vpop.permute.xlu1 %1914  ;;  %4919 = vmatmul.mubr.msk.f32.vlgmr.msra.gmra.mrb[4].mxu1 %vm2569_vm9, %v6604_v36 }
 0x241   : > { %v966_v14 = vsel %vm955_vm8, %v942_v51, %v944_v21  ;;  %v967_v20 = vsel %vm955_vm8, %v944_v21, %v6707_v29  ;;  %2877 = vmatprep.mubr.f32.mxu1 %v8168_v8 }
 0x242   : > { %998 = vst [vmem:[#allocation2 + $0xd0] ss:$-124 sps:$4 sm:$0xc1] %v966_v14   ;;  %999 = vst [vmem:[#allocation2 + $0xd8] ss:$-124 sps:$4 sm:$0xc1] %v967_v20  }
 0x244   : > { %v1226_v55 = vpop.permute.xlu0 %1225  ;;  %v2179_v62 = vpop.permute.xlu1 %2178  ;;  %4920 = vmatmul.mubr.msk.f32.gmra.mrb[6].mxu1 %vm2569_vm9, %v6626_v3 }
 0x245   : > { %v1248_v49 = vsel %vm1237_vm5, %v1224_v54, %v1226_v55  ;;  %v1249_v4 = vsel %vm1237_vm5, %v1226_v55, %v6715_v60  ;;  %v2530_v50 = vld [vmem:[#allocation2 + $0xc8] sm:$0xff]  ;;  %v2529_v12 = vld [vmem:[#allocation2 + $0xc0] sm:$0xff]  ;;  %3025 = vmatprep.mubr.f32.mxu1 %v8168_v8 }
 0x246   : > { %1280 = vst [vmem:[#allocation2 + $0xd0] sm:$0xe] %v1248_v49  ;;  %1281 = vst [vmem:[#allocation2 + $0xd8] sm:$0xe] %v1249_v4  ;;  %v4964_v31 = vpack.c.bf16 %v2530_v50, %v2514_v25  ;;  %v4966_v10 = vpack.c.bf16 %v2529_v12, %v2513_v7 }
 0x248   : > { %v1637_v41 = vpop.permute.xlu0 %1636  ;;  %4965 = vmatprep.subr.bf16.mxu0 %v4964_v31  ;;  %v2426_v17 = vpop.permute.xlu1 %2425 }
 0x249   : > { %v1658_v24 = vsel %vm1135_vm4, %v1635_v5, %v1637_v41  ;;  %v1659_v44 = vsel %vm1135_vm4, %v1637_v41, %v6723_v40  ;;  %4967 = vmatpush1.bf16.msra.mxu0 %v4966_v10  ;;  %v2516_v15 = vld [vmem:[#allocation2 + $0x58] sm:$0xff]  ;;  %v2515_v39 = vld [vmem:[#allocation2 + $0x50] sm:$0xff] }
 0x24a   : > { %1690 = vst [vmem:[#allocation2 + $0x150] ss:$-124 sps:$4 sm:$0x83] %v1658_v24   ;;  %1691 = vst [vmem:[#allocation2 + $0x158] ss:$-124 sps:$4 sm:$0x83] %v1659_v44  }
 0x24c   : > { %v1913_v0 = vpop.permute.xlu0 %1912  ;;  %v6743_v57 = vpop.permute.xlu1 %1918 }
 0x24d   : > { %v1936_v37 = vsel %vm853_vm3, %v6680_v46, %v1913_v0  ;;  %v1937_v51 = vsel %vm853_vm3, %v1913_v0, %v1915_v13 }
 0x24e   : > { %1968 = vst [vmem:[#allocation2 + $0x140] sm:$0x1c] %v1936_v37  ;;  %1969 = vst [vmem:[#allocation2 + $0x148] sm:$0x1c] %v1937_v51 }
 0x250   : > { %v2177_v18 = vpop.permute.xlu0 %2176  ;;  %v6748_v47 = vpop.permute.xlu1 %2182 }
 0x251   : > { %v2200_v54 = vsel %vm587_vm2, %v6687_v63, %v2177_v18  ;;  %v2201_v16 = vsel %vm587_vm2, %v2177_v18, %v2179_v62  ;;  %v2532_v2 = vld [vmem:[#allocation2 + $0xd8] sm:$0xff]  ;;  %v2531_v52 = vld [vmem:[#allocation2 + $0xd0] sm:$0xff] }
 0x252   : > { %2232 = vst [vmem:[#allocation2 + $0x140] sm:$0xe0] %v2200_v54  ;;  %2233 = vst [vmem:[#allocation2 + $0x148] sm:$0xe0] %v2201_v16  ;;  %v4972_v32 = vpack.c.bf16 %v2532_v2, %v2516_v15  ;;  %v4974_v46 = vpack.c.bf16 %v2531_v52, %v2515_v39 }
 0x254   : > { %v2424_v26 = vpop.permute.xlu0 %2423  ;;  %4973 = vmatprep.subr.bf16.mxu1 %v4972_v32  ;;  %v6753_v9 = vpop.permute.xlu1 %2429 }
 0x255   : > { %v2447_v1 = vsel %vm337_vm0, %v6692_v56, %v2424_v26  ;;  %v2448_v34 = vsel %vm337_vm0, %v2424_v26, %v2426_v17  ;;  %4975 = vmatpush1.bf16.msra.mxu1 %v4974_v46 }
 0x256   : > { %2479 = vst [vmem:[#allocation2 + $0x1c0] sm:$0x7] %v2447_v1  ;;  %2480 = vst [vmem:[#allocation2 + $0x1c8] sm:$0x7] %v2448_v34 }
 0x258   : > { %v1917_v63 = vpop.permute.xlu0 %1916  ;;  %v950_v5 = vpop.permute.xlu1 %949 }
 0x259   : > { %v1938_v42 = vsel %vm853_vm3, %v1915_v13, %v1917_v63  ;;  %v1939_v61 = vsel %vm853_vm3, %v1917_v63, %v6743_v57  ;;  %v2546_v59 = vld [vmem:[#allocation2 + $0x148] sm:$0xff]  ;;  %v2545_v35 = vld [vmem:[#allocation2 + $0x140] sm:$0xff] }
 0x25a   : > { %1970 = vst [vmem:[#allocation2 + $0x150] sm:$0x1c] %v1938_v42  ;;  %1971 = vst [vmem:[#allocation2 + $0x158] sm:$0x1c] %v1939_v61 }
 0x25c   : > { %v2181_v33 = vpop.permute.xlu0 %2180  ;;  %v1232_v38 = vpop.permute.xlu1 %1231 }
 0x25d   : > { %v2202_v58 = vsel %vm587_vm2, %v2179_v62, %v2181_v33  ;;  %v2203_v56 = vsel %vm587_vm2, %v2181_v33, %v6748_v47  ;;  %v2562_v53 = vld [vmem:[#allocation2 + $0x1c8] sm:$0xff]  ;;  %v2561_v45 = vld [vmem:[#allocation2 + $0x1c0] sm:$0xff] }
 0x25e   : > { %2234 = vst [vmem:[#allocation2 + $0x150] sm:$0xe0] %v2202_v58  ;;  %2235 = vst [vmem:[#allocation2 + $0x158] sm:$0xe0] %v2203_v56  ;;  %v4968_v23 = vpack.c.bf16 %v2562_v53, %v2546_v59  ;;  %v4970_v27 = vpack.c.bf16 %v2561_v45, %v2545_v35 }
 0x260   : > { %v2428_v43 = vpop.permute.xlu0 %2427  ;;  %4969 = vmatprep.subr.bf16.mxu0 %v4968_v23  ;;  %v1643_v30 = vpop.permute.xlu1 %1642 }
 0x261   : > { %v2449_v6 = vsel %vm337_vm0, %v2426_v17, %v2428_v43  ;;  %v2450_v22 = vsel %vm337_vm0, %v2428_v43, %v6753_v9  ;;  %4971 = vmatpush1.bf16.msra.mxu0 %v4970_v27 }
 0x262   : > { %2481 = vst [vmem:[#allocation2 + $0x1d0] sm:$0x7] %v2449_v6  ;;  %2482 = vst [vmem:[#allocation2 + $0x1d8] sm:$0x7] %v2450_v22 }
 0x264   : > { %v948_v48 = vpop.permute.xlu0 %947  ;;  %v954_v28 = vpop.permute.xlu1 %953  ;;  %4921 = vmatmul.mubr.msk.f32.vlgmr.msra.gmra.mrb[8].mxu0 %vm2569_vm9, %v6604_v36 }
 0x265   : > { %v968_v21 = vsel %vm955_vm8, %v6707_v29, %v948_v48  ;;  %v969_v13 = vsel %vm955_vm8, %v948_v48, %v950_v5  ;;  %2954 = vmatprep.mubr.f32.mxu0 %v8168_v8  ;;  %v2548_v55 = vld [vmem:[#allocation2 + $0x158] sm:$0xff]  ;;  %v2547_v4 = vld [vmem:[#allocation2 + $0x150] sm:$0xff] }
 0x266   : > { %1000 = vst [vmem:[#allocation2 + $0xe0] ss:$-124 sps:$4 sm:$0xc1] %v968_v21   ;;  %1001 = vst [vmem:[#allocation2 + $0xe8] ss:$-124 sps:$4 sm:$0xc1] %v969_v13  }
 0x268   : > { %v1230_v14 = vpop.permute.xlu0 %1229  ;;  %v1236_v20 = vpop.permute.xlu1 %1235  ;;  %4922 = vmatmul.mubr.msk.f32.gmra.mrb[10].mxu0 %vm2569_vm9, %v6626_v3 }
 0x269   : > { %v1250_v62 = vsel %vm1237_vm5, %v6715_v60, %v1230_v14  ;;  %v1251_v25 = vsel %vm1237_vm5, %v1230_v14, %v1232_v38  ;;  %v2564_v49 = vld [vmem:[#allocation2 + $0x1d8] sm:$0xff]  ;;  %v2563_v29 = vld [vmem:[#allocation2 + $0x1d0] sm:$0xff]  ;;  %3102 = vmatprep.mubr.f32.mxu0 %v8168_v8 }
 0x26a   : > { %1282 = vst [vmem:[#allocation2 + $0xe0] sm:$0xe] %v1250_v62  ;;  %1283 = vst [vmem:[#allocation2 + $0xe8] sm:$0xe] %v1251_v25  ;;  %v4976_v50 = vpack.c.bf16 %v2564_v49, %v2548_v55  ;;  %v4978_v7 = vpack.c.bf16 %v2563_v29, %v2547_v4 }
 0x26c   : > { %v1641_v12 = vpop.permute.xlu0 %1640  ;;  %4977 = vmatprep.subr.bf16.mxu1 %v4976_v50  ;;  %v1647_v31 = vpop.permute.xlu1 %1646 }
 0x26d   : > { %v1660_v10 = vsel %vm1135_vm4, %v6723_v40, %v1641_v12  ;;  %v1661_v41 = vsel %vm1135_vm4, %v1641_v12, %v1643_v30  ;;  %4979 = vmatpush1.bf16.msra.mxu1 %v4978_v7  ;;  %v2518_v40 = vld [vmem:[#allocation2 + $0x68] sm:$0xff]  ;;  %v2517_v15 = vld [vmem:[#allocation2 + $0x60] sm:$0xff] }
 0x26e   : > { %1692 = vst [vmem:[#allocation2 + $0x160] ss:$-124 sps:$4 sm:$0x83] %v1660_v10   ;;  %1693 = vst [vmem:[#allocation2 + $0x168] ss:$-124 sps:$4 sm:$0x83] %v1661_v41  }
 0x26f   : > { %v6822_v10 = vld [vmem:[%s8129_s3 + $0x40] sm:$0xff]  ;;  %v6827_v41 = vld [vmem:[%s8129_s3 + $0x48] sm:$0xff] }
 0x270   : > { %v952_v60 = vpop.permute.xlu0 %951  ;;  %4923 = vmatmul.mubr.msk.f32.vlgmr.msra.gmra.mrb[8].mxu1 %vm2569_vm9, %v6604_v36  ;;  %v1923_v44 = vpop.permute.xlu1 %1922  ;;  %8169 = vst [vmem:[#allocation6_spill] sm:$0xff] %v6827_v41 }
 0x271   : > { %v970_v17 = vsel %vm955_vm8, %v950_v5, %v952_v60  ;;  %v971_v24 = vsel %vm955_vm8, %v952_v60, %v954_v28  ;;  %3031 = vmatprep.mubr.f32.mxu1 %v8168_v8  ;;  %v6832_v60 = vld [vmem:[%s8129_s3] sm:$0xff]  ;;  %vm4774_vm8 = vcmask 56320  }
 0x272   : > { %1002 = vst [vmem:[#allocation2 + $0xf0] ss:$-124 sps:$4 sm:$0xc1] %v970_v17   ;;  %1003 = vst [vmem:[#allocation2 + $0xf8] ss:$-124 sps:$4 sm:$0xc1] %v971_v24  }
 0x273   : > { %v6847_v17 = vld [vmem:[%s8129_s3 + $0x20] sm:$0xff] }
 0x274   : > { %v1234_v0 = vpop.permute.xlu0 %1233  ;;  %4924 = vmatmul.mubr.msk.f32.gmra.mrb[10].mxu1 %vm2569_vm9, %v6626_v3  ;;  %v2187_v39 = vpop.permute.xlu1 %2186 }
 0x275   : > { %v1252_v37 = vsel %vm1237_vm5, %v1232_v38, %v1234_v0  ;;  %v1253_v51 = vsel %vm1237_vm5, %v1234_v0, %v1236_v20  ;;  %v2534_v18 = vld [vmem:[#allocation2 + $0xe8] sm:$0xff]  ;;  %v2533_v54 = vld [vmem:[#allocation2 + $0xe0] sm:$0xff]  ;;  %3179 = vmatprep.mubr.f32.mxu1 %v8168_v8 }
 0x276   : > { %1284 = vst [vmem:[#allocation2 + $0xf0] sm:$0xe] %v1252_v37  ;;  %1285 = vst [vmem:[#allocation2 + $0xf8] sm:$0xe] %v1253_v51  ;;  %v4980_v16 = vpack.c.bf16 %v2534_v18, %v2518_v40  ;;  %v4982_v2 = vpack.c.bf16 %v2533_v54, %v2517_v15  ;;  %v6852_v0 = vld [vmem:[%s8129_s3 + $0x68] sm:$0xff]  ;;  %v6862_v37 = vld [vmem:[%s8129_s3 + $0x80] sm:$0xff] }
 0x277   : > { %8171 = vst [vmem:[#allocation8_spill] sm:$0xff] %v6852_v0  ;;  %v6857_v40 = vld [vmem:[%s8129_s3 + $0x28] sm:$0xff]  ;;  %8173 = vst [vmem:[#allocation10_spill] sm:$0xff] %v6862_v37  ;;  %v6872_v15 = vld [vmem:[%s8129_s3 + $0xa0] sm:$0xff] }
 0x278   : > { %v1645_v52 = vpop.permute.xlu0 %1644  ;;  %4981 = vmatprep.subr.bf16.mxu0 %v4980_v16  ;;  %v2434_v63 = vpop.permute.xlu1 %2433  ;;  %8172 = vst [vmem:[#allocation9_spill] sm:$0xff] %v6857_v40  ;;  %v6867_v18 = vld [vmem:[%s8129_s3 + $0x88] sm:$0xff]  ;;  %8175 = vst [vmem:[#allocation12_spill] sm:$0xff] %v6872_v15 }
 0x279   : > { %v1662_v32 = vsel %vm1135_vm4, %v1643_v30, %v1645_v52  ;;  %v1663_v46 = vsel %vm1135_vm4, %v1645_v52, %v1647_v31  ;;  %4983 = vmatpush1.bf16.msra.mxu0 %v4982_v2  ;;  %v2520_v42 = vld [vmem:[#allocation2 + $0x78] sm:$0xff]  ;;  %v2519_v59 = vld [vmem:[#allocation2 + $0x70] sm:$0xff]  ;;  %8174 = vst [vmem:[#allocation11_spill] sm:$0xff] %v6867_v18  ;;  %v6877_v54 = vld [vmem:[%s8129_s3 + $0xa8] sm:$0xff]  ;;  %vm4768_vm4 = vcmask 31744  }
 0x27a   : > { %1694 = vst [vmem:[#allocation2 + $0x170] ss:$-124 sps:$4 sm:$0x83] %v1662_v32   ;;  %1695 = vst [vmem:[#allocation2 + $0x178] ss:$-124 sps:$4 sm:$0x83] %v1663_v46  }
 0x27c   : > { %v1921_v26 = vpop.permute.xlu0 %1920 }
 0x27d   : > { %v1940_v1 = vsel %vm853_vm3, %v6743_v57, %v1921_v26  ;;  %v1941_v34 = vsel %vm853_vm3, %v1921_v26, %v1923_v44  ;;  %v1927_v57 = vpop.permute.xlu1 %1926 }
 0x27e   : > { %1972 = vst [vmem:[#allocation2 + $0x160] sm:$0x1c] %v1940_v1  ;;  %1973 = vst [vmem:[#allocation2 + $0x168] sm:$0x1c] %v1941_v34  ;;  %v6890_v34 = vld [vmem:[%s8129_s3 + $0xc0] sm:$0xff] }
 0x280   : > { %v2185_v5 = vpop.permute.xlu0 %2184 }
 0x281   : > { %v2204_v61 = vsel %vm587_vm2, %v6748_v47, %v2185_v5  ;;  %v2205_v33 = vsel %vm587_vm2, %v2185_v5, %v2187_v39  ;;  %v2536_v38 = vld [vmem:[#allocation2 + $0xf8] sm:$0xff]  ;;  %v2535_v58 = vld [vmem:[#allocation2 + $0xf0] sm:$0xff]  ;;  %v2191_v30 = vpop.permute.xlu1 %2190 }
 0x282   : > { %2236 = vst [vmem:[#allocation2 + $0x160] sm:$0xe0] %v2204_v61  ;;  %2237 = vst [vmem:[#allocation2 + $0x168] sm:$0xe0] %v2205_v33  ;;  %v4988_v56 = vpack.c.bf16 %v2536_v38, %v2520_v42  ;;  %v4990_v53 = vpack.c.bf16 %v2535_v58, %v2519_v59  ;;  %v6904_v58 = vld [vmem:[%s8129_s3 + $0xe0] sm:$0xff] }
 0x284   : > { %v2432_v35 = vpop.permute.xlu0 %2431  ;;  %4989 = vmatprep.subr.bf16.mxu1 %v4988_v56  ;;  %v6909_v56 = vld [vmem:[%s8129_s3 + $0xe8] sm:$0xff] }
 0x285   : > { %v2451_v45 = vsel %vm337_vm0, %v6753_v9, %v2432_v35  ;;  %v2452_v23 = vsel %vm337_vm0, %v2432_v35, %v2434_v63  ;;  %4991 = vmatpush1.bf16.msra.mxu1 %v4990_v53  ;;  %v2438_v55 = vpop.permute.xlu1 %2437 }
 0x286   : > { %2483 = vst [vmem:[#allocation2 + $0x1e0] sm:$0x7] %v2451_v45  ;;  %2484 = vst [vmem:[#allocation2 + $0x1e8] sm:$0x7] %v2452_v23 }
 0x288   : > { %v1925_v47 = vpop.permute.xlu0 %1924 }
 0x289   : > { %v1942_v27 = vsel %vm853_vm3, %v1923_v44, %v1925_v47  ;;  %v1943_v43 = vsel %vm853_vm3, %v1925_v47, %v1927_v57  ;;  %v2550_v22 = vld [vmem:[#allocation2 + $0x168] sm:$0xff]  ;;  %v2549_v21 = vld [vmem:[#allocation2 + $0x160] sm:$0xff]  ;;  %vm4766_vm3 = vcmask 23552  }
 0x28a   : > { %1974 = vst [vmem:[#allocation2 + $0x170] sm:$0x1c] %v1942_v27  ;;  %1975 = vst [vmem:[#allocation2 + $0x178] sm:$0x1c] %v1943_v43 }
 0x28c   : > { %v2189_v6 = vpop.permute.xlu0 %2188 }
 0x28d   : > { %v2206_v48 = vsel %vm587_vm2, %v2187_v39, %v2189_v6  ;;  %v2207_v28 = vsel %vm587_vm2, %v2189_v6, %v2191_v30  ;;  %v2566_v9 = vld [vmem:[#allocation2 + $0x1e8] sm:$0xff]  ;;  %v2565_v13 = vld [vmem:[#allocation2 + $0x1e0] sm:$0xff]  ;;  %v6918_v30 = vld [vmem:[%s8129_s3 + $0x10] sm:$0xff]  ;;  %vm4764_vm2 = vcmask 15360  }
 0x28e   : > { %2238 = vst [vmem:[#allocation2 + $0x170] sm:$0xe0] %v2206_v48  ;;  %2239 = vst [vmem:[#allocation2 + $0x178] sm:$0xe0] %v2207_v28  ;;  %v4984_v14 = vpack.c.bf16 %v2566_v9, %v2550_v22  ;;  %v4986_v20 = vpack.c.bf16 %v2565_v13, %v2549_v21  ;;  %v6923_v6 = vld [vmem:[%s8129_s3 + $0x18] sm:$0xff]  ;;  %v6934_v21 = vld [vmem:[%s8129_s3 + $0x30] sm:$0xff] }
 0x28f   : > { %v6939_v13 = vld [vmem:[%s8129_s3 + $0x38] sm:$0xff] }
 0x290   : > { %v2436_v62 = vpop.permute.xlu0 %2435  ;;  %4985 = vmatprep.subr.bf16.mxu0 %v4984_v14  ;;  %v6944_v14 = vld [vmem:[%s8129_s3 + $0x50] sm:$0xff] }
 0x291   : > { %v2453_v25 = vsel %vm337_vm0, %v2434_v63, %v2436_v62  ;;  %v2454_v49 = vsel %vm337_vm0, %v2436_v62, %v2438_v55  ;;  %4987 = vmatpush1.bf16.msra.mxu0 %v4986_v20  ;;  %v6895_v63 = vld [vmem:[%s8129_s3 + $0xc8] sm:$0xff]  ;;  %vm3474_vm0 = vcmask 1046534  }
 0x292   : > { %2485 = vst [vmem:[#allocation2 + $0x1f0] sm:$0x7] %v2453_v25  ;;  %2486 = vst [vmem:[#allocation2 + $0x1f8] sm:$0x7] %v2454_v49 }
 0x294   : > { %4925 = vmatmul.mubr.msk.f32.vlgmr.msra.gmra.mrb[12].mxu0 %vm2569_vm9, %v6604_v36 }
 0x295   : > { %3108 = vmatprep.mubr.f32.mxu0 %v8168_v8  ;;  %v2552_v4 = vld [vmem:[#allocation2 + $0x178] sm:$0xff]  ;;  %v2551_v50 = vld [vmem:[#allocation2 + $0x170] sm:$0xff] }
 0x298   : > { %4926 = vmatmul.mubr.msk.f32.gmra.mrb[14].mxu0 %vm2569_vm9, %v6626_v3 }
 0x299   : > { %v2568_v29 = vld [vmem:[#allocation2 + $0x1f8] sm:$0xff]  ;;  %v2567_v7 = vld [vmem:[#allocation2 + $0x1f0] sm:$0xff] }
 0x29a   : > { %v4992_v12 = vpack.c.bf16 %v2568_v29, %v2552_v4  ;;  %v4994_v31 = vpack.c.bf16 %v2567_v7, %v2551_v50 }
 0x29c   : > { %4993 = vmatprep.subr.bf16.mxu1 %v4992_v12 }
 0x29d   : > { %4995 = vmatpush1.bf16.msra.mxu1 %v4994_v31 }
 0x2a0   : > { %4927 = vmatmul.mubr.msk.f32.vlgmr.msra.gmra.mrb[12].mxu1 %vm2569_vm9, %v6604_v36 }
 0x2a1   : > { %3185 = vmatprep.mubr.f32.mxu1 %v8168_v8  ;;  %v6837_v8 = vld [vmem:[%s8129_s3 + $0x8] sm:$0xff] }
 0x2a2   : > { %8170 = vst [vmem:[#allocation7_spill] sm:$0xff] %v6837_v8 }
 0x2a4   : > { %4928 = vmatmul.mubr.msk.f32.gmra.mrb[14].mxu1 %vm2569_vm9, %v6626_v3  ;;  %v6842_v3 = vld [vmem:[%s8129_s3 + $0x60] sm:$0xff] }
 0x2da   : > { %v2642_v36 = vpop.f32.mrb[0].mxu0 }
 0x2db   : > { %v3192_v24 = vmax.f32 %v2642_v36, 0.0  ;;  %v2644_v44 = vpop.f32.mrb[1].mxu0 }
 0x2dc   : > { %v3193_v51 = vmax.f32 %v2644_v44, 0.0 }
 0x2dd   : > { %v3300_v16 = vmul.f32 %v6822_v10, %v3192_v24  ;;  %v3292_v2 = vmul.f32 %v6832_v60, %v3192_v24  ;;  %v3304_v39 = vmul.f32 %v6842_v3, %v3192_v24  ;;  %v3296_v52 = vmul.f32 %v6847_v17, %v3192_v24 }
 0x2de   : > { %v3301_v32 = vmul.f32 %v6827_v41, %v3193_v51  ;;  %v3293_v46 = vmul.f32 %v6837_v8, %v3193_v51  ;;  %v3305_v26 = vmul.f32 %v6852_v0, %v3193_v51  ;;  %v3297_v1 = vmul.f32 %v6857_v40, %v3193_v51  ;;  %v2648_v5 = vpop.f32.mrb[2].mxu0 }
 0x2df   : > { %v3308_v42 = vmul.f32 %v6862_v37, %v3192_v24  ;;  %v3309_v61 = vmul.f32 %v6867_v18, %v3193_v51  ;;  %v3312_v33 = vmul.f32 %v6872_v15, %v3192_v24  ;;  %v3313_v38 = vmul.f32 %v6877_v54, %v3193_v51  ;;  %v2650_v59 = vpop.f32.mrb[3].mxu0 }
 0x2e0   : > { %v3336_v53 = vadd.f32 %v3301_v32, %v3300_v16  ;;  %v3324_v57 = vadd.f32 %v3293_v46, %v3292_v2  ;;  %v3342_v35 = vadd.f32 %v3305_v26, %v3304_v39  ;;  %v3330_v45 = vadd.f32 %v3297_v1, %v3296_v52 }
 0x2e1   : > { %v3348_v23 = vadd.f32 %v3309_v61, %v3308_v42  ;;  %v6911_v47 = vadd.f32 %v3313_v38, %v3312_v33  ;;  %v3316_v27 = vmul.f32 %v6890_v34, %v3192_v24  ;;  %v3317_v43 = vmul.f32 %v6895_v63, %v3193_v51 }
 0x2e2   : > { %3337 = vadd.xlane.f32.xlu1 %v3336_v53  ;;  %3325 = vadd.xlane.f32.xlu0 %v3324_v57  ;;  %v6925_v22 = vmax.f32 %v2648_v5, 0.0  ;;  %v6927_v48 = vmax.f32 %v2650_v59, 0.0  ;;  %v3320_v28 = vmul.f32 %v6904_v58, %v3192_v24  ;;  %v3321_v9 = vmul.f32 %v6909_v56, %v3193_v51 }
 0x2e3   : > { %v2719_v20 = vpop.f32.mrb[0].mxu1  ;;  %v6946_v55 = vadd.f32 %v3317_v43, %v3316_v27 }
 0x2e4   : > { %v3194_v62 = vmax.f32 %v2719_v20, 0.0  ;;  %v2721_v25 = vpop.f32.mrb[1].mxu1  ;;  %v6948_v49 = vadd.f32 %v3321_v9, %v3320_v28  ;;  %v3294_v4 = vmul.f32 %v6918_v30, %v6925_v22  ;;  %v3295_v29 = vmul.f32 %v6923_v6, %v6927_v48 }
 0x2e5   : > { %v3195_v50 = vmax.f32 %v2721_v25, 0.0  ;;  %v3298_v7 = vmul.f32 %v6934_v21, %v6925_v22  ;;  %v3299_v12 = vmul.f32 %v6939_v13, %v6927_v48  ;;  %v6960_v31 = vmul.f32 %v6944_v14, %v6925_v22  ;;  %v6993_v25 = vld [vmem:[%s8129_s3 + $0x58] sm:$0xff] }
 0x2e6   : > { %3343 = vadd.xlane.f32.xlu1 %v3342_v35  ;;  %3331 = vadd.xlane.f32.xlu0 %v3330_v45  ;;  %v3486_v36 = vmul.f32 %v6832_v60, %v3194_v62  ;;  %v3490_v24 = vmul.f32 %v6847_v17, %v3194_v62  ;;  %v3494_v44 = vmul.f32 %v6822_v10, %v3194_v62 }
 0x2e7   : > { %v3487_v51 = vmul.f32 %v6837_v8, %v3195_v50  ;;  %v3491_v16 = vmul.f32 %v6857_v40, %v3195_v50  ;;  %v3495_v2 = vmul.f32 %v6827_v41, %v3195_v50  ;;  %v2725_v39 = vpop.f32.mrb[2].mxu1  ;;  %v3498_v52 = vmul.f32 %v6842_v3, %v3194_v62 }
 0x2e8   : > { %v6969_v32 = vmax.f32 %v2725_v39, 0.0  ;;  %v3499_v46 = vmul.f32 %v6852_v0, %v3195_v50  ;;  %v2727_v26 = vpop.f32.mrb[3].mxu1  ;;  %v6972_v1 = vadd.f32 %v3295_v29, %v3294_v4  ;;  %v3502_v5 = vmul.f32 %v6862_v37, %v3194_v62 }
 0x2e9   : > { %v3518_v42 = vadd.f32 %v3487_v51, %v3486_v36  ;;  %v3524_v61 = vadd.f32 %v3491_v16, %v3490_v24  ;;  %v3530_v33 = vadd.f32 %v3495_v2, %v3494_v44  ;;  %v3211_v38 = vmax.f32 %v2727_v26, 0.0  ;;  %v7001_v51 = vld [vmem:[%s8129_s3 + $0x70] sm:$0xff] }
 0x2ea   : > { %3349 = vadd.xlane.f32.xlu1 %v3348_v23  ;;  %v6975_v59 = vadd.f32 %v3499_v46, %v3498_v52  ;;  %v3503_v53 = vmul.f32 %v6867_v18, %v3195_v50  ;;  %v3488_v57 = vmul.f32 %v6918_v30, %v6969_v32  ;;  %v3506_v35 = vmul.f32 %v6872_v15, %v3194_v62  ;;  %v7009_v52 = vld [vmem:[%s8129_s3 + $0x78] sm:$0xff]  ;;  %v7016_v26 = vld [vmem:[%s8129_s3 + $0x90] sm:$0xff] }
 0x2eb   : > { %3519 = vadd.xlane.f32.xlu0 %v3518_v42  ;;  %v3489_v45 = vmul.f32 %v6923_v6, %v3211_v38  ;;  %v3507_v27 = vmul.f32 %v6877_v54, %v3195_v50  ;;  %v3492_v43 = vmul.f32 %v6934_v21, %v6969_v32  ;;  %v3493_v28 = vmul.f32 %v6939_v13, %v3211_v38 }
 0x2ec   : > { %v6986_v23 = vadd.f32 %v3503_v53, %v3502_v5  ;;  %v3510_v9 = vmul.f32 %v6890_v34, %v3194_v62  ;;  %v3511_v20 = vmul.f32 %v6895_v63, %v3195_v50  ;;  %v3496_v4 = vmul.f32 %v6944_v14, %v6969_v32  ;;  %8176 = vst [vmem:[#allocation13_spill] sm:$0xff] %v7001_v51  ;;  %v7029_v53 = vld [vmem:[%s8129_s3 + $0xb0] sm:$0xff] }
 0x2ed   : > { %v3521_v29 = vadd.f32 %v3489_v45, %v3488_v57  ;;  %v3548_v36 = vadd.f32 %v3507_v27, %v3506_v35  ;;  %v3527_v24 = vadd.f32 %v3493_v28, %v3492_v43  ;;  %v3497_v44 = vmul.f32 %v6993_v25, %v3211_v38  ;;  %8177 = vst [vmem:[#allocation14_spill] sm:$0xff] %v7009_v52 }
 0x2ee   : > { %3355 = vadd.xlane.f32.xlu1 %v6911_v47  ;;  %v3554_v16 = vadd.f32 %v3511_v20, %v3510_v9  ;;  %v3514_v2 = vmul.f32 %v6904_v58, %v3194_v62  ;;  %v3515_v39 = vmul.f32 %v6909_v56, %v3195_v50  ;;  %v3500_v46 = vmul.f32 %v7001_v51, %v6969_v32  ;;  %v7022_v50 = vld [vmem:[%s8129_s3 + $0x98] sm:$0xff]  ;;  %v7049_v9 = vld [vmem:[%s8129_s3 + $0xd0] sm:$0xff] }
 0x2ef   : > { %3525 = vadd.xlane.f32.xlu0 %v3524_v61  ;;  %v3533_v47 = vadd.f32 %v3497_v44, %v3496_v4  ;;  %v3501_v5 = vmul.f32 %v7009_v52, %v3211_v38  ;;  %v3333_v62 = vadd.f32 %v3299_v12, %v3298_v7  ;;  %v3504_v42 = vmul.f32 %v7016_v26, %v6969_v32  ;;  %v7037_v7 = vld [vmem:[%s8129_s3 + $0xb8] sm:$0xff] }
 0x2f0   : > { %v3560_v57 = vadd.f32 %v3515_v39, %v3514_v2  ;;  %v3505_v61 = vmul.f32 %v7022_v50, %v3211_v38  ;;  %v3303_v35 = vmul.f32 %v6993_v25, %v6927_v48  ;;  %v3508_v12 = vmul.f32 %v7029_v53, %v6969_v32  ;;  %v7054_v20 = vld [vmem:[%s8129_s3 + $0xd8] sm:$0xff] }
 0x2f1   : > { %v3539_v45 = vadd.f32 %v3501_v5, %v3500_v46  ;;  %v3509_v27 = vmul.f32 %v7037_v7, %v3211_v38  ;;  %v3306_v43 = vmul.f32 %v7001_v51, %v6925_v22  ;;  %v3307_v28 = vmul.f32 %v7009_v52, %v6927_v48 }
 0x2f2   : > { %3361 = vadd.xlane.f32.xlu1 %v6946_v55  ;;  %v3545_v4 = vadd.f32 %v3505_v61, %v3504_v42  ;;  %v7058_v44 = vadd.f32 %v3303_v35, %v6960_v31  ;;  %v3512_v2 = vmul.f32 %v7049_v9, %v6969_v32  ;;  %v3513_v39 = vmul.f32 %v7054_v20, %v3211_v38  ;;  %v7074_v31 = vld [vmem:[%s8129_s3 + $0xf0] sm:$0xff]  ;;  %v7079_v42 = vld [vmem:[%s8129_s3 + $0xf8] sm:$0xff] }
 0x2f3   : > { %3531 = vadd.xlane.f32.xlu0 %v3530_v33  ;;  %v7063_v46 = vadd.f32 %v3509_v27, %v3508_v12  ;;  %v7065_v5 = vadd.f32 %v3307_v28, %v3306_v43  ;;  %v3310_v19 = vmul.f32 %v7016_v26, %v6925_v22  ;;  %v3311_v55 = vmul.f32 %v7022_v50, %v6927_v48 }
 0x2f4   : > { %v7081_v33 = vadd.f32 %v3513_v39, %v3512_v2  ;;  %v3516_v61 = vmul.f32 %v7074_v31, %v6969_v32  ;;  %v3517_v35 = vmul.f32 %v7079_v42, %v3211_v38  ;;  %v3314_v12 = vmul.f32 %v7029_v53, %v6925_v22 }
 0x2f5   : > { %v7088_v27 = vadd.f32 %v3311_v55, %v3310_v19  ;;  %v3315_v43 = vmul.f32 %v7037_v7, %v6927_v48  ;;  %v3318_v28 = vmul.f32 %v7049_v9, %v6925_v22  ;;  %v3319_v2 = vmul.f32 %v7054_v20, %v6927_v48 }
 0x2f6   : > { %3367 = vadd.xlane.f32.xlu1 %v6948_v49  ;;  %v7097_v39 = vadd.f32 %v3517_v35, %v3516_v61  ;;  %v3322_v32 = vmul.f32 %v7074_v31, %v6925_v22  ;;  %v3323_v19 = vmul.f32 %v7079_v42, %v6927_v48 }
 0x2f7   : > { %3537 = vadd.xlane.f32.xlu0 %v6975_v59  ;;  %v7104_v38 = vadd.f32 %v3315_v43, %v3314_v12  ;;  %v7106_v55 = vadd.f32 %v3319_v2, %v3318_v28 }
 0x2f8   : > { %v7108_v11 = vadd.f32 %v3323_v19, %v3322_v32 }
 0x2fa   : > { %8178 = vst [vmem:[#allocation15_spill] sm:$0xff] %v7108_v11  ;;  %3328 = vadd.xlane.f32.xlu1 %v6972_v1 }
 0x2fb   : > { %3543 = vadd.xlane.f32.xlu0 %v6986_v23 }
 0x2fe   : > { %3522 = vadd.xlane.f32.xlu1 %v3521_v29 }
 0x2ff   : > { %3549 = vadd.xlane.f32.xlu0 %v3548_v36 }
 0x302   : > { %3528 = vadd.xlane.f32.xlu1 %v3527_v24 }
 0x303   : > { %3555 = vadd.xlane.f32.xlu0 %v3554_v16 }
 0x306   : > { %3534 = vadd.xlane.f32.xlu1 %v3533_v47 }
 0x307   : > { %3561 = vadd.xlane.f32.xlu0 %v3560_v57  ;;  %v2796_v22 = vpop.f32.mrb[4].mxu0 }
 0x308   : > { %v3196_v48 = vmax.f32 %v2796_v22, 0.0  ;;  %v2798_v49 = vpop.f32.mrb[5].mxu0 }
 0x309   : > { %v3197_v59 = vmax.f32 %v2798_v49, 0.0 }
 0x30a   : > { %3540 = vadd.xlane.f32.xlu1 %v3539_v45  ;;  %v3669_v61 = vmul.f32 %v6832_v60, %v3196_v48  ;;  %v3673_v35 = vmul.f32 %v6847_v17, %v3196_v48  ;;  %v3677_v12 = vmul.f32 %v6822_v10, %v3196_v48  ;;  %v3681_v1 = vmul.f32 %v6842_v3, %v3196_v48 }
 0x30b   : > { %3334 = vadd.xlane.f32.xlu0 %v3333_v62  ;;  %v3670_v23 = vmul.f32 %v6837_v8, %v3197_v59  ;;  %v2802_v29 = vpop.f32.mrb[6].mxu0  ;;  %v3674_v36 = vmul.f32 %v6857_v40, %v3197_v59  ;;  %v3678_v24 = vmul.f32 %v6827_v41, %v3197_v59  ;;  %v3682_v16 = vmul.f32 %v6852_v0, %v3197_v59 }
 0x30c   : > { %v7120_v47 = vmax.f32 %v2802_v29, 0.0  ;;  %v2804_v57 = vpop.f32.mrb[7].mxu0  ;;  %v3685_v45 = vmul.f32 %v6862_v37, %v3196_v48  ;;  %v3686_v43 = vmul.f32 %v6867_v18, %v3197_v59  ;;  %v3689_v28 = vmul.f32 %v6872_v15, %v3196_v48 }
 0x30d   : > { %v7125_v2 = vadd.f32 %v3670_v23, %v3669_v61  ;;  %v7127_v62 = vmax.f32 %v2804_v57, 0.0  ;;  %v7129_v32 = vadd.f32 %v3674_v36, %v3673_v35  ;;  %v7131_v19 = vadd.f32 %v3678_v24, %v3677_v12 }
 0x30e   : > { %3546 = vadd.xlane.f32.xlu1 %v3545_v4  ;;  %v3671_v22 = vmul.f32 %v6918_v30, %v7120_v47  ;;  %v7135_v49 = vadd.f32 %v3682_v16, %v3681_v1  ;;  %v3675_v29 = vmul.f32 %v6934_v21, %v7120_v47  ;;  %v7139_v11 = vadd.f32 %v3686_v43, %v3685_v45 }
 0x30f   : > { %8179 = vst [vmem:[#allocation16_spill] sm:$0xff] %v7131_v19  ;;  %3340 = vadd.xlane.f32.xlu0 %v7058_v44  ;;  %v3672_v61 = vmul.f32 %v6923_v6, %v7127_v62  ;;  %v3676_v35 = vmul.f32 %v6939_v13, %v7127_v62  ;;  %v3679_v4 = vmul.f32 %v6944_v14, %v7120_v47 }
 0x310   : > { %8180 = vst [vmem:[#allocation17_spill] sm:$0xff] %v7135_v49  ;;  %8181 = vst [vmem:[#allocation18_spill] sm:$0xff] %v7139_v11  ;;  %v3680_v12 = vmul.f32 %v6993_v25, %v7127_v62  ;;  %v3690_v1 = vmul.f32 %v6877_v54, %v3197_v59  ;;  %v3683_v23 = vmul.f32 %v7001_v51, %v7120_v47 }
 0x311   : > { %v3684_v44 = vmul.f32 %v7009_v52, %v7127_v62  ;;  %v3693_v36 = vmul.f32 %v6890_v34, %v3196_v48  ;;  %v7156_v24 = vadd.f32 %v3672_v61, %v3671_v22  ;;  %v7158_v16 = vadd.f32 %v3676_v35, %v3675_v29 }
 0x312   : > { %v7160_v57 = vadd.f32 %v3680_v12, %v3679_v4  ;;  %v3694_v45 = vmul.f32 %v6895_v63, %v3197_v59  ;;  %3552 = vadd.xlane.f32.xlu1 %v7063_v46  ;;  %v7164_v43 = vadd.f32 %v3690_v1, %v3689_v28  ;;  %v3687_v49 = vmul.f32 %v7016_v26, %v7120_v47 }
 0x313   : > { %v7166_v11 = vadd.f32 %v3684_v44, %v3683_v23  ;;  %v3688_v19 = vmul.f32 %v7022_v50, %v7127_v62  ;;  %3346 = vadd.xlane.f32.xlu0 %v7065_v5  ;;  %v2873_v22 = vpop.f32.mrb[4].mxu1  ;;  %v3697_v61 = vmul.f32 %v6904_v58, %v3196_v48  ;;  %v3698_v35 = vmul.f32 %v6909_v56, %v3197_v59 }
 0x314   : > { %v7173_v29 = vadd.f32 %v3694_v45, %v3693_v36  ;;  %v3691_v46 = vmul.f32 %v7029_v53, %v7120_v47  ;;  %v7179_v28 = vmax.f32 %v2873_v22, 0.0  ;;  %v2875_v4 = vpop.f32.mrb[5].mxu1  ;;  %v3692_v1 = vmul.f32 %v7037_v7, %v7127_v62 }
 0x315   : > { %v7181_v12 = vadd.f32 %v3688_v19, %v3687_v49  ;;  %v3695_v5 = vmul.f32 %v7049_v9, %v7120_v47  ;;  %v7187_v23 = vmax.f32 %v2875_v4, 0.0  ;;  %v7189_v44 = vadd.f32 %v3698_v35, %v3697_v61 }
 0x316   : > { %v3696_v48 = vmul.f32 %v7054_v20, %v7127_v62  ;;  %3558 = vadd.xlane.f32.xlu1 %v7081_v33  ;;  %v7194_v59 = vadd.f32 %v3692_v1, %v3691_v46  ;;  %v3852_v19 = vmul.f32 %v6832_v60, %v7179_v28  ;;  %v3856_v49 = vmul.f32 %v6847_v17, %v7179_v28 }
 0x317   : > { %v3860_v36 = vmul.f32 %v6822_v10, %v7179_v28  ;;  %3352 = vadd.xlane.f32.xlu0 %v7088_v27  ;;  %v2879_v45 = vpop.f32.mrb[6].mxu1  ;;  %v3853_v61 = vmul.f32 %v6837_v8, %v7187_v23  ;;  %v3857_v33 = vmul.f32 %v6857_v40, %v7187_v23  ;;  %v3861_v35 = vmul.f32 %v6827_v41, %v7187_v23 }
 0x318   : > { %8182 = vst [vmem:[#allocation19_spill] sm:$0xff] %v7194_v59  ;;  %v7203_v22 = vadd.f32 %v3696_v48, %v3695_v5  ;;  %v3214_v46 = vmax.f32 %v2879_v45, 0.0  ;;  %v2881_v4 = vpop.f32.mrb[7].mxu1  ;;  %v3864_v1 = vmul.f32 %v6842_v3, %v7179_v28  ;;  %v3865_v27 = vmul.f32 %v6852_v0, %v7187_v23 }
 0x319   : > { %v3868_v5 = vmul.f32 %v6862_v37, %v7179_v28  ;;  %v3215_v48 = vmax.f32 %v2881_v4, 0.0  ;;  %v7219_v8 = vadd.f32 %v3857_v33, %v3856_v49  ;;  %v7221_v40 = vadd.f32 %v3861_v35, %v3860_v36 }
 0x31a   : > { %8183 = vst [vmem:[#allocation20_spill] sm:$0xff] %v7203_v22  ;;  %v7217_v22 = vadd.f32 %v3853_v61, %v3852_v19  ;;  %3564 = vadd.xlane.f32.xlu1 %v7097_v39  ;;  %v3854_v45 = vmul.f32 %v6918_v30, %v3214_v46  ;;  %v3858_v41 = vmul.f32 %v6934_v21, %v3214_v46 }
 0x31b   : > { %8185 = vst [vmem:[#allocation22_spill] sm:$0xff] %v7219_v8  ;;  %8186 = vst [vmem:[#allocation23_spill] sm:$0xff] %v7221_v40  ;;  %v3862_v59 = vmul.f32 %v6944_v14, %v3214_v46  ;;  %v3866_v0 = vmul.f32 %v7001_v51, %v3214_v46  ;;  %3358 = vadd.xlane.f32.xlu0 %v7104_v38  ;;  %v3855_v4 = vmul.f32 %v6923_v6, %v3215_v48 }
 0x31c   : > { %8184 = vst [vmem:[#allocation21_spill] sm:$0xff] %v7217_v22  ;;  %v3859_v19 = vmul.f32 %v6939_v13, %v3215_v48  ;;  %v3863_v49 = vmul.f32 %v6993_v25, %v3215_v48  ;;  %v3867_v36 = vmul.f32 %v7009_v52, %v3215_v48  ;;  %v7233_v61 = vadd.f32 %v3865_v27, %v3864_v1 }
 0x31d   : > { %v3870_v39 = vmul.f32 %v7016_v26, %v3214_v46  ;;  %v3871_v33 = vmul.f32 %v7022_v50, %v3215_v48  ;;  %v3869_v35 = vmul.f32 %v6867_v18, %v7187_v23  ;;  %v7239_v40 = vadd.f32 %v3855_v4, %v3854_v45 }
 0x31e   : > { %8187 = vst [vmem:[#allocation24_spill] sm:$0xff] %v7233_v61  ;;  %v7241_v38 = vadd.f32 %v3859_v19, %v3858_v41  ;;  %v7243_v8 = vadd.f32 %v3863_v49, %v3862_v59  ;;  %v7245_v22 = vadd.f32 %v3867_v36, %v3866_v0  ;;  %3702 = vadd.xlane.f32.xlu1 %v7125_v2 }
 0x31f   : > { %v7248_v52 = vadd.f32 %v3871_v33, %v3870_v39  ;;  %v7250_v1 = vadd.f32 %v3869_v35, %v3868_v5  ;;  %v3872_v27 = vmul.f32 %v6872_v15, %v7179_v28  ;;  %v3873_v61 = vmul.f32 %v6877_v54, %v7187_v23  ;;  %3364 = vadd.xlane.f32.xlu0 %v7106_v55 }
 0x320   : > { %v3874_v41 = vmul.f32 %v7029_v53, %v3214_v46  ;;  %v3875_v59 = vmul.f32 %v7037_v7, %v3215_v48  ;;  %v3699_v0 = vmul.f32 %v7074_v31, %v7120_v47  ;;  %v3700_v2 = vmul.f32 %v7079_v42, %v7127_v62 }
 0x321   : > { %8188 = vst [vmem:[#allocation25_spill] sm:$0xff] %v7248_v52  ;;  %8189 = vst [vmem:[#allocation26_spill] sm:$0xff] %v7250_v1  ;;  %v7263_v5 = vadd.f32 %v3873_v61, %v3872_v27  ;;  %v3876_v45 = vmul.f32 %v6890_v34, %v7179_v28  ;;  %v3877_v4 = vmul.f32 %v6895_v63, %v7187_v23  ;;  %v8194_v61 = vld [vmem:[#allocation15_spill] sm:$0xff] }
 0x322   : > { %v7269_v19 = vadd.f32 %v3875_v59, %v3874_v41  ;;  %v7271_v55 = vadd.f32 %v3700_v2, %v3699_v0  ;;  %v3878_v49 = vmul.f32 %v7049_v9, %v3214_v46  ;;  %v3879_v36 = vmul.f32 %v7054_v20, %v3215_v48  ;;  %3708 = vadd.xlane.f32.xlu1 %v7129_v32  ;;  %v8198_v32 = vld [vmem:[#allocation16_spill] sm:$0xff]  ;;  %v8200_v0 = vld [vmem:[#allocation18_spill] sm:$0xff] }
 0x323   : > { %8190 = vst [vmem:[#allocation27_spill] sm:$0xff] %v7263_v5  ;;  %v7276_v47 = vadd.f32 %v3877_v4, %v3876_v45  ;;  %v3880_v62 = vmul.f32 %v6904_v58, %v7179_v28  ;;  %3370 = vadd.xlane.f32.xlu0 %v8194_v61  ;;  %v3881_v33 = vmul.f32 %v6909_v56, %v7187_v23  ;;  %v8199_v28 = vld [vmem:[#allocation17_spill] sm:$0xff]  ;;  %v8201_v45 = vld [vmem:[#allocation19_spill] sm:$0xff]  ;;  %v8205_v61 = vld [vmem:[#allocation8_spill] sm:$0xff] }
 0x324   : > { %8191 = vst [vmem:[#allocation28_spill] sm:$0xff] %v7269_v19  ;;  %8192 = vst [vmem:[#allocation29_spill] sm:$0xff] %v7271_v55  ;;  %v7281_v39 = vadd.f32 %v3879_v36, %v3878_v49  ;;  %v3882_v35 = vmul.f32 %v7074_v31, %v3214_v46  ;;  %v3883_v27 = vmul.f32 %v7079_v42, %v3215_v48  ;;  %v8204_v36 = vld [vmem:[#allocation6_spill] sm:$0xff] }
 0x325   : > { %8193 = vst [vmem:[#allocation30_spill] sm:$0xff] %v7276_v47  ;;  %v7287_v41 = vadd.f32 %v3881_v33, %v3880_v62 }
 0x326   : > { %8195 = vst [vmem:[#allocation15_spill] sm:$0xff] %v7281_v39  ;;  %v7289_v59 = vadd.f32 %v3883_v27, %v3882_v35  ;;  %3714 = vadd.xlane.f32.xlu1 %v8198_v32 }
 0x327   : > { %8196 = vst [vmem:[#allocation31_spill] sm:$0xff] %v7287_v41  ;;  %3705 = vadd.xlane.f32.xlu0 %v7156_v24 }
 0x328   : > { %8197 = vst [vmem:[#allocation32_spill] sm:$0xff] %v7289_v59 }
 0x32a   : > { %3720 = vadd.xlane.f32.xlu1 %v8199_v28 }
 0x32b   : > { %3711 = vadd.xlane.f32.xlu0 %v7158_v16 }
 0x32e   : > { %3726 = vadd.xlane.f32.xlu1 %v8200_v0 }
 0x32f   : > { %3717 = vadd.xlane.f32.xlu0 %v7160_v57 }
 0x332   : > { %3732 = vadd.xlane.f32.xlu1 %v7164_v43 }
 0x333   : > { %3723 = vadd.xlane.f32.xlu0 %v7166_v11 }
 0x336   : > { %3738 = vadd.xlane.f32.xlu1 %v7173_v29  ;;  %v8202_v29 = vld [vmem:[#allocation7_spill] sm:$0xff] }
 0x337   : > { %3729 = vadd.xlane.f32.xlu0 %v7181_v12  ;;  %v2950_v23 = vpop.f32.mrb[8].mxu0  ;;  %v8203_v12 = vld [vmem:[#allocation9_spill] sm:$0xff] }
 0x338   : > { %v3200_v46 = vmax.f32 %v2950_v23, 0.0  ;;  %v2952_v48 = vpop.f32.mrb[9].mxu0 }
 0x339   : > { %v3201_v24 = vmax.f32 %v2952_v48, 0.0 }
 0x33a   : > { %3744 = vadd.xlane.f32.xlu1 %v7189_v44  ;;  %v4035_v16 = vmul.f32 %v6832_v60, %v3200_v46  ;;  %v4039_v2 = vmul.f32 %v6847_v17, %v3200_v46  ;;  %v4043_v57 = vmul.f32 %v6822_v10, %v3200_v46  ;;  %v4047_v43 = vmul.f32 %v6842_v3, %v3200_v46 }
 0x33b   : > { %3735 = vadd.xlane.f32.xlu0 %v8201_v45  ;;  %v2956_v11 = vpop.f32.mrb[10].mxu0  ;;  %v4036_v4 = vmul.f32 %v8202_v29, %v3201_v24  ;;  %v4040_v49 = vmul.f32 %v8203_v12, %v3201_v24  ;;  %v4044_v62 = vmul.f32 %v8204_v36, %v3201_v24  ;;  %v4048_v33 = vmul.f32 %v8205_v61, %v3201_v24 }
 0x33c   : > { %v7311_v44 = vmax.f32 %v2956_v11, 0.0  ;;  %v2958_v35 = vpop.f32.mrb[11].mxu0  ;;  %v4051_v27 = vmul.f32 %v6862_v37, %v3200_v46  ;;  %v4052_v32 = vmul.f32 %v6867_v18, %v3201_v24  ;;  %v4055_v28 = vmul.f32 %v6872_v15, %v3200_v46 }
 0x33d   : > { %v7316_v0 = vmax.f32 %v2958_v35, 0.0  ;;  %v7318_v23 = vadd.f32 %v4036_v4, %v4035_v16  ;;  %v7320_v48 = vadd.f32 %v4040_v49, %v4039_v2  ;;  %v7322_v45 = vadd.f32 %v4044_v62, %v4043_v57  ;;  %v8206_v16 = vld [vmem:[#allocation20_spill] sm:$0xff]  ;;  %v8207_v4 = vld [vmem:[#allocation14_spill] sm:$0xff] }
 0x33e   : > { %3888 = vadd.xlane.f32.xlu1 %v7239_v40  ;;  %v4037_v11 = vmul.f32 %v6918_v30, %v7311_v44  ;;  %v4041_v59 = vmul.f32 %v6934_v21, %v7311_v44  ;;  %v4045_v41 = vmul.f32 %v6944_v14, %v7311_v44  ;;  %v4049_v35 = vmul.f32 %v7001_v51, %v7311_v44 }
 0x33f   : > { %3741 = vadd.xlane.f32.xlu0 %v8206_v16  ;;  %v4038_v2 = vmul.f32 %v6923_v6, %v7316_v0  ;;  %v4042_v40 = vmul.f32 %v6939_v13, %v7316_v0  ;;  %v4046_v57 = vmul.f32 %v6993_v25, %v7316_v0  ;;  %v4050_v49 = vmul.f32 %v8207_v4, %v7316_v0 }
 0x340   : > { %v7342_v62 = vadd.f32 %v4048_v33, %v4047_v43  ;;  %v7344_v39 = vadd.f32 %v4052_v32, %v4051_v27  ;;  %v4053_v47 = vmul.f32 %v7016_v26, %v7311_v44  ;;  %v4054_v16 = vmul.f32 %v7022_v50, %v7316_v0  ;;  %v8210_v32 = vld [vmem:[#allocation21_spill] sm:$0xff] }
 0x341   : > { %v4070_v55 = vadd.f32 %v4038_v2, %v4037_v11  ;;  %v4076_v19 = vadd.f32 %v4042_v40, %v4041_v59  ;;  %v7350_v5 = vadd.f32 %v4046_v57, %v4045_v41  ;;  %v7352_v1 = vadd.f32 %v4050_v49, %v4049_v35 }
 0x342   : > { %8208 = vst [vmem:[#allocation16_spill] sm:$0xff] %v7344_v39  ;;  %3894 = vadd.xlane.f32.xlu1 %v7241_v38  ;;  %v7355_v52 = vadd.f32 %v4054_v16, %v4053_v47  ;;  %v4056_v43 = vmul.f32 %v6877_v54, %v3201_v24  ;;  %v4057_v33 = vmul.f32 %v7029_v53, %v7311_v44 }
 0x343   : > { %v4058_v27 = vmul.f32 %v7037_v7, %v7316_v0  ;;  %3885 = vadd.xlane.f32.xlu0 %v8210_v32  ;;  %v3027_v11 = vpop.f32.mrb[8].mxu1  ;;  %v4059_v41 = vmul.f32 %v6890_v34, %v3200_v46  ;;  %v4060_v59 = vmul.f32 %v6895_v63, %v3201_v24  ;;  %v4061_v38 = vmul.f32 %v7049_v9, %v7311_v44 }
 0x344   : > { %8209 = vst [vmem:[#allocation17_spill] sm:$0xff] %v7355_v52  ;;  %v4062_v47 = vmul.f32 %v7054_v20, %v7316_v0  ;;  %v7369_v35 = vmax.f32 %v3027_v11, 0.0  ;;  %v3029_v2 = vpop.f32.mrb[9].mxu1  ;;  %v7371_v40 = vadd.f32 %v4056_v43, %v4055_v28  ;;  %v4063_v49 = vmul.f32 %v6904_v58, %v3200_v46 }
 0x345   : > { %v7373_v57 = vadd.f32 %v4058_v27, %v4057_v33  ;;  %v3203_v16 = vmax.f32 %v3029_v2, 0.0  ;;  %v7376_v32 = vadd.f32 %v4060_v59, %v4059_v41  ;;  %v4064_v39 = vmul.f32 %v6909_v56, %v3201_v24  ;;  %v8215_v33 = vld [vmem:[#allocation22_spill] sm:$0xff] }
 0x346   : > { %8211 = vst [vmem:[#allocation18_spill] sm:$0xff] %v7371_v40  ;;  %v7378_v52 = vadd.f32 %v4062_v47, %v4061_v38  ;;  %3900 = vadd.xlane.f32.xlu1 %v7243_v8  ;;  %v4218_v11 = vmul.f32 %v6832_v60, %v7369_v35  ;;  %v4222_v28 = vmul.f32 %v6847_v17, %v7369_v35 }
 0x347   : > { %8212 = vst [vmem:[#allocation19_spill] sm:$0xff] %v7373_v57  ;;  %8213 = vst [vmem:[#allocation20_spill] sm:$0xff] %v7376_v32  ;;  %v4226_v43 = vmul.f32 %v6822_v10, %v7369_v35  ;;  %v4230_v46 = vmul.f32 %v6842_v3, %v7369_v35  ;;  %3891 = vadd.xlane.f32.xlu0 %v8215_v33  ;;  %v3033_v27 = vpop.f32.mrb[10].mxu1  ;;  %v4219_v41 = vmul.f32 %v8202_v29, %v3203_v16 }
 0x348   : > { %8214 = vst [vmem:[#allocation21_spill] sm:$0xff] %v7378_v52  ;;  %v4223_v24 = vmul.f32 %v8203_v12, %v3203_v16  ;;  %v4227_v8 = vmul.f32 %v8204_v36, %v3203_v16  ;;  %v4231_v59 = vmul.f32 %v8205_v61, %v3203_v16  ;;  %v3218_v38 = vmax.f32 %v3033_v27, 0.0  ;;  %v3035_v47 = vpop.f32.mrb[11].mxu1 }
 0x349   : > { %v4234_v2 = vmul.f32 %v6862_v37, %v7369_v35  ;;  %v4235_v52 = vmul.f32 %v6867_v18, %v3203_v16  ;;  %v4238_v32 = vmul.f32 %v6872_v15, %v7369_v35  ;;  %v3219_v33 = vmax.f32 %v3035_v47, 0.0  ;;  %v8217_v37 = vld [vmem:[#allocation23_spill] sm:$0xff] }
 0x34a   : > { %v4250_v57 = vadd.f32 %v4219_v41, %v4218_v11  ;;  %v4256_v40 = vadd.f32 %v4223_v24, %v4222_v28  ;;  %v7400_v29 = vadd.f32 %v4227_v8, %v4226_v43  ;;  %4071 = vadd.xlane.f32.xlu1 %v4070_v55  ;;  %v4220_v36 = vmul.f32 %v6918_v30, %v3218_v38 }
 0x34b   : > { %v4224_v61 = vmul.f32 %v6934_v21, %v3218_v38  ;;  %v4228_v27 = vmul.f32 %v6944_v14, %v3218_v38  ;;  %v7405_v12 = vadd.f32 %v4231_v59, %v4230_v46  ;;  %3897 = vadd.xlane.f32.xlu0 %v8217_v37  ;;  %v4221_v18 = vmul.f32 %v6923_v6, %v3219_v33 }
 0x34c   : > { %v4225_v15 = vmul.f32 %v6939_v13, %v3219_v33  ;;  %v4229_v11 = vmul.f32 %v6993_v25, %v3219_v33  ;;  %v4232_v28 = vmul.f32 %v7001_v51, %v3218_v38  ;;  %v4233_v55 = vmul.f32 %v8207_v4, %v3219_v33 }
 0x34d   : > { %8216 = vst [vmem:[#allocation22_spill] sm:$0xff] %v7405_v12  ;;  %v7413_v43 = vadd.f32 %v4235_v52, %v4234_v2  ;;  %v4236_v41 = vmul.f32 %v7016_v26, %v3218_v38  ;;  %v4237_v24 = vmul.f32 %v7022_v50, %v3219_v33  ;;  %v4253_v46 = vadd.f32 %v4221_v18, %v4220_v36 }
 0x34e   : > { %v4259_v8 = vadd.f32 %v4225_v15, %v4224_v61  ;;  %v4265_v59 = vadd.f32 %v4229_v11, %v4228_v27  ;;  %v4239_v37 = vmul.f32 %v6877_v54, %v3203_v16  ;;  %4077 = vadd.xlane.f32.xlu1 %v4076_v19  ;;  %v7418_v47 = vadd.f32 %v4233_v55, %v4232_v28 }
 0x34f   : > { %v7420_v12 = vadd.f32 %v4237_v24, %v4236_v41  ;;  %v4240_v51 = vmul.f32 %v7029_v53, %v3218_v38  ;;  %v4241_v4 = vmul.f32 %v7037_v7, %v3219_v33  ;;  %4068 = vadd.xlane.f32.xlu0 %v7318_v23  ;;  %v7427_v2 = vadd.f32 %v4064_v39, %v4063_v49  ;;  %v8227_v41 = vld [vmem:[#allocation7_spill] sm:$0xff] }
 0x350   : > { %v7425_v52 = vadd.f32 %v4239_v37, %v4238_v32  ;;  %v4242_v18 = vmul.f32 %v6890_v34, %v7369_v35  ;;  %v4243_v15 = vmul.f32 %v6895_v63, %v3203_v16  ;;  %v4065_v36 = vmul.f32 %v7074_v31, %v7311_v44 }
 0x351   : > { %8218 = vst [vmem:[#allocation23_spill] sm:$0xff] %v7427_v2  ;;  %v7432_v19 = vadd.f32 %v4241_v4, %v4240_v51  ;;  %v4066_v61 = vmul.f32 %v7079_v42, %v7316_v0  ;;  %v4244_v27 = vmul.f32 %v7049_v9, %v3218_v38  ;;  %v4245_v39 = vmul.f32 %v7054_v20, %v3219_v33 }
 0x352   : > { %v7439_v23 = vadd.f32 %v4243_v15, %v4242_v18  ;;  %v4246_v49 = vmul.f32 %v6904_v58, %v7369_v35  ;;  %v4247_v32 = vmul.f32 %v6909_v56, %v3203_v16  ;;  %3906 = vadd.xlane.f32.xlu1 %v7245_v22  ;;  %v4248_v44 = vmul.f32 %v7074_v31, %v3218_v38  ;;  %v8224_v35 = vld [vmem:[#allocation24_spill] sm:$0xff]  ;;  %v8225_v22 = vld [vmem:[#allocation25_spill] sm:$0xff] }
 0x353   : > { %v7446_v51 = vadd.f32 %v4066_v61, %v4065_v36  ;;  %v4249_v4 = vmul.f32 %v7079_v42, %v3219_v33  ;;  %4074 = vadd.xlane.f32.xlu0 %v7320_v48  ;;  %v7451_v0 = vadd.f32 %v4245_v39, %v4244_v27  ;;  %v8226_v48 = vld [vmem:[#allocation26_spill] sm:$0xff]  ;;  %v8230_v18 = vld [vmem:[#allocation8_spill] sm:$0xff] }
 0x354   : > { %8219 = vst [vmem:[#allocation33_spill] sm:$0xff] %v7439_v23  ;;  %v7453_v11 = vadd.f32 %v4247_v32, %v4246_v49  ;;  %v8231_v27 = vld [vmem:[#allocation10_spill] sm:$0xff] }
 0x355   : > { %8220 = vst [vmem:[#allocation34_spill] sm:$0xff] %v7446_v51  ;;  %8221 = vst [vmem:[#allocation35_spill] sm:$0xff] %v7451_v0  ;;  %v7455_v28 = vadd.f32 %v4249_v4, %v4248_v44 }
 0x356   : > { %8222 = vst [vmem:[#allocation36_spill] sm:$0xff] %v7453_v11  ;;  %4083 = vadd.xlane.f32.xlu1 %v7350_v5 }
 0x357   : > { %8223 = vst [vmem:[#allocation37_spill] sm:$0xff] %v7455_v28  ;;  %3903 = vadd.xlane.f32.xlu0 %v8224_v35 }
 0x35a   : > { %4254 = vadd.xlane.f32.xlu1 %v4253_v46  ;;  %v8228_v46 = vld [vmem:[#allocation9_spill] sm:$0xff] }
 0x35b   : > { %4080 = vadd.xlane.f32.xlu0 %v7322_v45 }
 0x35e   : > { %4260 = vadd.xlane.f32.xlu1 %v4259_v8 }
 0x35f   : > { %4251 = vadd.xlane.f32.xlu0 %v4250_v57 }
 0x362   : > { %3912 = vadd.xlane.f32.xlu1 %v8225_v22 }
 0x363   : > { %4257 = vadd.xlane.f32.xlu0 %v4256_v40 }
 0x366   : > { %4089 = vadd.xlane.f32.xlu1 %v7352_v1 }
 0x367   : > { %3909 = vadd.xlane.f32.xlu0 %v8226_v48  ;;  %v3104_v16 = vpop.f32.mrb[12].mxu0 }
 0x368   : > { %v7463_v38 = vmax.f32 %v3104_v16, 0.0  ;;  %v3106_v33 = vpop.f32.mrb[13].mxu0 }
 0x369   : > { %v7465_v55 = vmax.f32 %v3106_v33, 0.0 }
 0x36a   : > { %4266 = vadd.xlane.f32.xlu1 %v4265_v59  ;;  %v4401_v5 = vmul.f32 %v6832_v60, %v7463_v38  ;;  %v4405_v45 = vmul.f32 %v6847_v17, %v7463_v38  ;;  %v4409_v40 = vmul.f32 %v6822_v10, %v7463_v38  ;;  %v4413_v1 = vmul.f32 %v6842_v3, %v7463_v38  ;;  %v8229_v59 = vld [vmem:[#allocation6_spill] sm:$0xff] }
 0x36b   : > { %4086 = vadd.xlane.f32.xlu0 %v7342_v62  ;;  %v3110_v57 = vpop.f32.mrb[14].mxu0  ;;  %v4402_v24 = vmul.f32 %v8227_v41, %v7465_v55  ;;  %v4406_v8 = vmul.f32 %v8228_v46, %v7465_v55  ;;  %v4410_v37 = vmul.f32 %v8229_v59, %v7465_v55  ;;  %v4414_v15 = vmul.f32 %v8230_v18, %v7465_v55  ;;  %v8232_v62 = vld [vmem:[#allocation11_spill] sm:$0xff] }
 0x36c   : > { %v7484_v36 = vmax.f32 %v3110_v57, 0.0  ;;  %v3112_v61 = vpop.f32.mrb[15].mxu0  ;;  %v4417_v39 = vmul.f32 %v8231_v27, %v7463_v38  ;;  %v4418_v49 = vmul.f32 %v8232_v62, %v7465_v55  ;;  %v4422_v23 = vmul.f32 %v6877_v54, %v7465_v55 }
 0x36d   : > { %v7490_v32 = vmax.f32 %v3112_v61, 0.0  ;;  %v4433_v44 = vadd.f32 %v4402_v24, %v4401_v5  ;;  %v4439_v4 = vadd.f32 %v4406_v8, %v4405_v45  ;;  %v7492_v35 = vadd.f32 %v4410_v37, %v4409_v40  ;;  %v8233_v24 = vld [vmem:[#allocation13_spill] sm:$0xff] }
 0x36e   : > { %v4403_v22 = vmul.f32 %v6918_v30, %v7484_v36  ;;  %v4407_v48 = vmul.f32 %v6934_v21, %v7484_v36  ;;  %v4411_v16 = vmul.f32 %v6944_v14, %v7484_v36  ;;  %v7500_v33 = vadd.f32 %v4414_v15, %v4413_v1  ;;  %v8234_v1 = vld [vmem:[#allocation14_spill] sm:$0xff] }
 0x36f   : > { %v7502_v57 = vpop.xlane.xlu0 %3325  ;;  %4263 = vadd.xlane.f32.xlu0 %v7400_v29  ;;  %v7505_v18 = vpop.xlane.xlu1 %3337  ;;  %v4404_v5 = vmul.f32 %v6923_v6, %v7490_v32  ;;  %v4408_v45 = vmul.f32 %v6939_v13, %v7490_v32  ;;  %v4412_v40 = vmul.f32 %v6993_v25, %v7490_v32  ;;  %v4415_v8 = vmul.f32 %v8233_v24, %v7484_v36  ;;  %v8235_v29 = vld [vmem:[#allocation12_spill] sm:$0xff] }
 0x370   : > { %v4416_v37 = vmul.f32 %v8234_v1, %v7490_v32  ;;  %v7517_v15 = vadd.f32 %v4418_v49, %v4417_v39  ;;  %v4421_v61 = vmul.f32 %v8235_v29, %v7463_v38  ;;  %v4419_v11 = vmul.f32 %v7016_v26, %v7484_v36 }
 0x371   : > { %v4436_v27 = vadd.f32 %v4404_v5, %v4403_v22  ;;  %v4442_v62 = vadd.f32 %v4408_v45, %v4407_v48  ;;  %v7521_v28 = vadd.f32 %v4412_v40, %v4411_v16  ;;  %v4420_v51 = vmul.f32 %v7022_v50, %v7490_v32 }
 0x372   : > { %v7525_v0 = vadd.f32 %v4416_v37, %v4415_v8  ;;  %v4423_v39 = vmul.f32 %v7029_v53, %v7484_v36  ;;  %v4424_v48 = vmul.f32 %v7037_v7, %v7490_v32  ;;  %v4425_v16 = vmul.f32 %v6890_v34, %v7463_v38 }
 0x373   : > { %v7533_v49 = vpop.xlane.xlu0 %3331  ;;  %4434 = vadd.xlane.f32.xlu0 %v4433_v44  ;;  %4437 = vadd.xlane.f32.xlu1 %v4436_v27  ;;  %v7535_v22 = vpop.xlane.xlu1 %3343  ;;  %v4426_v5 = vmul.f32 %v6895_v63, %v7465_v55  ;;  %v7543_v54 = vadd.f32 %v4420_v51, %v4419_v11  ;;  %v7545_v40 = vadd.f32 %v4422_v23, %v4421_v61 }
 0x374   : > { %v3181_v45 = vpop.f32.mrb[12].mxu1  ;;  %v7549_v37 = vadd.f32 %v4424_v48, %v4423_v39 }
 0x375   : > { %v7547_v8 = vmax.f32 %v3181_v45, 0.0  ;;  %v3183_v44 = vpop.f32.mrb[13].mxu1  ;;  %v7551_v29 = vadd.f32 %v4426_v5, %v4425_v16  ;;  %v8236_v45 = vld [vmem:[#allocation27_spill] sm:$0xff] }
 0x376   : > { %v7553_v27 = vmax.f32 %v3183_v44, 0.0  ;;  %v8237_v44 = vld [vmem:[#allocation28_spill] sm:$0xff] }
 0x377   : > { %4440 = vadd.xlane.f32.xlu0 %v4439_v4  ;;  %4443 = vadd.xlane.f32.xlu1 %v4442_v62  ;;  %v7555_v34 = vpop.xlane.xlu1 %3349  ;;  %v3187_v2 = vpop.f32.mrb[14].mxu1  ;;  %v4584_v63 = vmul.f32 %v6832_v60, %v7547_v8  ;;  %v4588_v23 = vmul.f32 %v6847_v17, %v7547_v8  ;;  %v4592_v51 = vmul.f32 %v6822_v10, %v7547_v8 }
 0x378   : > { %v7563_v11 = vpop.xlane.xlu0 %3519  ;;  %v7565_v61 = vmax.f32 %v3187_v2, 0.0  ;;  %v3189_v39 = vpop.f32.mrb[15].mxu1  ;;  %v4585_v4 = vmul.f32 %v8227_v41, %v7553_v27  ;;  %v4589_v62 = vmul.f32 %v8228_v46, %v7553_v27  ;;  %v4427_v60 = vmul.f32 %v7049_v9, %v7484_v36 }
 0x379   : > { %v7573_v48 = vmax.f32 %v3189_v39, 0.0  ;;  %v4593_v17 = vmul.f32 %v8229_v59, %v7553_v27  ;;  %v4596_v10 = vmul.f32 %v6842_v3, %v7547_v8  ;;  %v4428_v2 = vmul.f32 %v7054_v20, %v7490_v32 }
 0x37a   : > { %v7581_v16 = vadd.f32 %v4585_v4, %v4584_v63  ;;  %v4586_v41 = vmul.f32 %v6918_v30, %v7565_v61  ;;  %v7585_v46 = vadd.f32 %v4589_v62, %v4588_v23  ;;  %v4590_v5 = vmul.f32 %v6934_v21, %v7565_v61  ;;  %v5015_v4 = vld [vmem:[%s8129_s3 + $0x68] sm:$0xff] }
 0x37b   : > { %3915 = vadd.xlane.f32.xlu0 %v8236_v45  ;;  %3918 = vadd.xlane.f32.xlu1 %v8237_v44  ;;  %v7591_v59 = vpop.xlane.xlu1 %3355  ;;  %v4587_v3 = vmul.f32 %v6923_v6, %v7573_v48  ;;  %v4591_v63 = vmul.f32 %v6939_v13, %v7573_v48  ;;  %v7597_v39 = vadd.f32 %v4593_v17, %v4592_v51 }
 0x37c   : > { %v7599_v30 = vpop.xlane.xlu0 %3525  ;;  %v4594_v23 = vmul.f32 %v6944_v14, %v7565_v61  ;;  %v4595_v21 = vmul.f32 %v6993_v25, %v7573_v48  ;;  %v4597_v62 = vmul.f32 %v5015_v4, %v7553_v27  ;;  %v4429_v6 = vmul.f32 %v6904_v58, %v7463_v38  ;;  %v5016_v4 = vld [vmem:[%s8129_s3 + $0x80] sm:$0xff] }
 0x37d   : > { %v4619_v13 = vadd.f32 %v4587_v3, %v4586_v41  ;;  %v4625_v51 = vadd.f32 %v4591_v63, %v4590_v5  ;;  %v4598_v17 = vmul.f32 %v8233_v24, %v7565_v61  ;;  %v4430_v14 = vmul.f32 %v6909_v56, %v7465_v55  ;;  %v8238_v38 = vld [vmem:[#allocation16_spill] sm:$0xff]  ;;  %v8239_v41 = vld [vmem:[#allocation17_spill] sm:$0xff] }
 0x37e   : > { %v7615_v45 = vadd.f32 %v4595_v21, %v4594_v23  ;;  %v7617_v25 = vadd.f32 %v4597_v62, %v4596_v10  ;;  %v4599_v44 = vmul.f32 %v8234_v1, %v7573_v48  ;;  %v4600_v58 = vmul.f32 %v5016_v4, %v7547_v8  ;;  %v5017_v56 = vld [vmem:[%s8129_s3 + $0x88] sm:$0xff]  ;;  %v5018_v63 = vld [vmem:[%s8129_s3 + $0xa0] sm:$0xff] }
 0x37f   : > { %4092 = vadd.xlane.f32.xlu0 %v8238_v38  ;;  %4095 = vadd.xlane.f32.xlu1 %v8239_v41  ;;  %v7627_v24 = vpop.xlane.xlu1 %3361  ;;  %v4601_v55 = vmul.f32 %v5017_v56, %v7553_v27  ;;  %v4602_v1 = vmul.f32 %v7016_v26, %v7565_v61  ;;  %v4603_v10 = vmul.f32 %v7022_v50, %v7573_v48  ;;  %v5019_v21 = vld [vmem:[%s8129_s3 + $0xa8] sm:$0xff]  ;;  %v8240_v56 = vld [vmem:[#allocation22_spill] sm:$0xff] }
 0x380   : > { %v7637_v5 = vpop.xlane.xlu0 %3531  ;;  %v7639_v3 = vadd.f32 %v4599_v44, %v4598_v17  ;;  %v4604_v23 = vmul.f32 %v5018_v63, %v7547_v8  ;;  %v4605_v62 = vmul.f32 %v5019_v21, %v7553_v27  ;;  %v7653_v50 = vadd.f32 %v4428_v2, %v4427_v60  ;;  %v5020_v60 = vld [vmem:[%s8129_s3 + $0xc0] sm:$0xff] }
 0x381   : > { %v7649_v26 = vadd.f32 %v4601_v55, %v4600_v58  ;;  %v7651_v4 = vadd.f32 %v4603_v10, %v4602_v1  ;;  %v7657_v44 = vadd.f32 %v4430_v14, %v4429_v6  ;;  %v4606_v38 = vmul.f32 %v7029_v53, %v7565_v61  ;;  %v5021_v6 = vld [vmem:[%s8129_s3 + $0xc8] sm:$0xff] }
 0x382   : > { %v7655_v17 = vadd.f32 %v4605_v62, %v4604_v23  ;;  %v4607_v41 = vmul.f32 %v7037_v7, %v7573_v48  ;;  %v4608_v2 = vmul.f32 %v5020_v60, %v7547_v8  ;;  %v4609_v53 = vmul.f32 %v5021_v6, %v7553_v27  ;;  %v5022_v23 = vld [vmem:[%s8129_s3 + $0xe0] sm:$0xff]  ;;  %v8243_v6 = vld [vmem:[#allocation15_spill] sm:$0xff] }
 0x383   : > { %4269 = vadd.xlane.f32.xlu0 %v8240_v56  ;;  %4272 = vadd.xlane.f32.xlu1 %v7418_v47  ;;  %v7665_v58 = vpop.xlane.xlu1 %3367  ;;  %v4431_v7 = vmul.f32 %v7074_v31, %v7484_v36  ;;  %v4432_v55 = vmul.f32 %v7079_v42, %v7490_v32  ;;  %v4610_v1 = vmul.f32 %v7049_v9, %v7565_v61  ;;  %v5023_v32 = vld [vmem:[%s8129_s3 + $0xe8] sm:$0xff] }
 0x384   : > { %v7677_v14 = vpop.xlane.xlu0 %3537  ;;  %v7679_v47 = vadd.f32 %v4607_v41, %v4606_v38  ;;  %v7685_v10 = vadd.f32 %v4609_v53, %v4608_v2  ;;  %v4611_v63 = vmul.f32 %v7054_v20, %v7573_v48  ;;  %v4612_v36 = vmul.f32 %v5022_v23, %v7547_v8 }
 0x385   : > { %v7693_v21 = vadd.f32 %v4432_v55, %v4431_v7  ;;  %v4613_v62 = vmul.f32 %v5023_v32, %v7553_v27  ;;  %v4614_v9 = vmul.f32 %v7074_v31, %v7565_v61  ;;  %v4615_v20 = vmul.f32 %v7079_v42, %v7573_v48  ;;  %v8241_v27 = vld [vmem:[#allocation29_spill] sm:$0xff]  ;;  %v8242_v61 = vld [vmem:[#allocation30_spill] sm:$0xff]  ;;  %v8245_v7 = vld [vmem:[#allocation19_spill] sm:$0xff] }
 0x386   : > { %v7707_v8 = vadd.f32 %v4611_v63, %v4610_v1  ;;  %v8247_v32 = vld [vmem:[#allocation5_spill] sm:$0xff] }
 0x387   : > { %4446 = vadd.xlane.f32.xlu0 %v7492_v35  ;;  %4449 = vadd.xlane.f32.xlu1 %v7521_v28  ;;  %v7705_v38 = vpop.xlane.xlu1 %3328  ;;  %v7711_v56 = vadd.f32 %v4613_v62, %v4612_v36  ;;  %v7713_v60 = vadd.f32 %v4615_v20, %v4614_v9 }
 0x388   : > { %v7709_v41 = vpop.xlane.xlu0 %3543  ;;  %v3398_v9 = vrot.slane %v7705_v38, %v8247_v32 }
 0x38b   : > { %4617 = vadd.xlane.f32.xlu0 %v7581_v16  ;;  %4620 = vadd.xlane.f32.xlu1 %v4619_v13  ;;  %v7716_v31 = vpop.xlane.xlu1 %3522  ;;  %v8244_v16 = vld [vmem:[#allocation18_spill] sm:$0xff] }
 0x38c   : > { %v7718_v42 = vpop.xlane.xlu0 %3549 }
 0x38f   : > { %4623 = vadd.xlane.f32.xlu0 %v7585_v46  ;;  %4626 = vadd.xlane.f32.xlu1 %v4625_v51  ;;  %v3529_v28 = vpop.xlane.xlu1 %3528 }
 0x390   : > { %v7721_v35 = vpop.xlane.xlu0 %3555 }
 0x393   : > { %3747 = vadd.xlane.f32.xlu0 %v8241_v27  ;;  %3921 = vadd.xlane.f32.xlu1 %v8242_v61  ;;  %v3535_v48 = vpop.xlane.xlu1 %3534 }
 0x394   : > { %v7725_v2 = vpop.xlane.xlu0 %3561 }
 0x397   : > { %3924 = vadd.xlane.f32.xlu0 %v8243_v6  ;;  %4098 = vadd.xlane.f32.xlu1 %v8244_v16  ;;  %v3541_v13 = vpop.xlane.xlu1 %3540 }
 0x398   : > { %v3335_v53 = vpop.xlane.xlu0 %3334 }
 0x399   : > { %v3408_v61 = vrot.slane %v3335_v53, %v8247_v32 }
 0x39b   : > { %4101 = vadd.xlane.f32.xlu0 %v8245_v7  ;;  %4275 = vadd.xlane.f32.xlu1 %v7413_v43  ;;  %v7731_v46 = vpop.xlane.xlu1 %3546  ;;  %v8246_v43 = vld [vmem:[#allocation4_spill] sm:$0xff] }
 0x39c   : > { %v3341_v51 = vpop.xlane.xlu0 %3340  ;;  %v3404_v36 = vrot.slane %v7533_v49, %v8246_v43  ;;  %v3431_v62 = vrot.slane %v7555_v34, %v8246_v43  ;;  %v3585_v49 = vrot.slane %v7563_v11, %v8246_v43  ;;  %v3440_v20 = vrot.slane %v7591_v59, %v8246_v43 }
 0x39d   : > { %v3589_v34 = vrot.slane %v7716_v31, %v8247_v32  ;;  %v3458_v27 = vrot.slane %v7665_v58, %v8246_v43  ;;  %v3607_v11 = vrot.slane %v3535_v48, %v8247_v32  ;;  %v3612_v59 = vrot.slane %v7677_v14, %v8246_v43  ;;  %v8249_v58 = vld [vmem:[#allocation32_spill] sm:$0xff] }
 0x39e   : > { %v3616_v31 = vrot.slane %v3541_v13, %v8247_v32  ;;  %v3417_v6 = vrot.slane %v3341_v51, %v8247_v32  ;;  %v8250_v48 = vld [vmem:[#allocation20_spill] sm:$0xff]  ;;  %v3630_v13 = vrot.slane %v7718_v42, %v8246_v43  ;;  %v3639_v53 = vrot.slane %v7721_v35, %v8246_v43 }
 0x39f   : > { %4278 = vadd.xlane.f32.xlu0 %v7420_v12  ;;  %4452 = vadd.xlane.f32.xlu1 %v7500_v33  ;;  %v7735_v55 = vpop.xlane.xlu1 %3552  ;;  %v3393_v12 = vrot.slane %v7502_v57, %v8246_v43  ;;  %v3413_v33 = vrot.slane %v7505_v18, %v8246_v43  ;;  %v8248_v57 = vld [vmem:[#allocation31_spill] sm:$0xff]  ;;  %v3590_v14 = vsel %vm3399_vm10, %v3589_v34, %v3585_v49 }
 0x3a0   : > { %v7737_v1 = vpop.xlane.xlu0 %3346  ;;  %v3409_v42 = vsel %vm3399_vm10, %v3408_v61, %v3404_v36  ;;  %v3634_v35 = vrot.slane %v7735_v55, %v8247_v32  ;;  %v3648_v55 = vrot.slane %v7725_v2, %v8246_v43 }
 0x3a1   : > { %v3418_v49 = vsel %vm3399_vm10, %v3417_v6, %v3413_v33 }
 0x3a2   : > { %v3635_v2 = vsel %vm3399_vm10, %v3634_v35, %v3630_v13 }
 0x3a3   : > { %4455 = vadd.xlane.f32.xlu0 %v7525_v0  ;;  %4629 = vadd.xlane.f32.xlu1 %v7597_v39  ;;  %v7741_v63 = vpop.xlane.xlu1 %3558  ;;  %v3598_v0 = vrot.slane %v3529_v28, %v8247_v32  ;;  %v3422_v39 = vrot.slane %v7535_v22, %v8246_v43  ;;  %v3594_v22 = vrot.slane %v7599_v30, %v8246_v43 }
 0x3a4   : > { %v7743_v23 = vpop.xlane.xlu0 %3352  ;;  %v3603_v28 = vrot.slane %v7637_v5, %v8246_v43  ;;  %v3621_v5 = vrot.slane %v7709_v41, %v8246_v43  ;;  %v3426_v41 = vrot.slane %v7737_v1, %v8247_v32 }
 0x3a5   : > { %v3599_v30 = vsel %vm3399_vm10, %v3598_v0, %v3594_v22  ;;  %v3625_v0 = vrot.slane %v7731_v46, %v8247_v32  ;;  %v3643_v22 = vrot.slane %v7741_v63, %v8247_v32  ;;  %v8251_v46 = vld [vmem:[#allocation21_spill] sm:$0xff] }
 0x3a6   : > { %v3654_v51 = vsel %vm3464_vm11, %v3599_v30, %v3590_v14 }
 0x3a7   : > { %4632 = vadd.xlane.f32.xlu0 %v7615_v45  ;;  %3927 = vadd.xlane.f32.xlu1 %v8248_v57  ;;  %v7760_v18 = vpop.xlane.xlu1 %3564  ;;  %v3449_v45 = vrot.slane %v7627_v24, %v8246_v43  ;;  %v3400_v24 = vsel %vm3399_vm10, %v3398_v9, %v3393_v12  ;;  %v3608_v12 = vsel %vm3399_vm10, %v3607_v11, %v3603_v28 }
 0x3a8   : > { %v3359_v38 = vpop.xlane.xlu0 %3358  ;;  %v3435_v9 = vrot.slane %v7743_v23, %v8247_v32  ;;  %v3617_v57 = vsel %vm3399_vm10, %v3616_v31, %v3612_v59  ;;  %v3655_v36 = vsel %vm3466_vm12, %v3608_v12, %v3654_v51  ;;  %v3652_v33 = vrot.slane %v7760_v18, %v8247_v32 }
 0x3a9   : > { %v3444_v1 = vrot.slane %v3359_v38, %v8247_v32  ;;  %v3427_v38 = vsel %vm3399_vm10, %v3426_v41, %v3422_v39  ;;  %v3465_v63 = vsel %vm3464_vm11, %v3409_v42, %v3400_v24  ;;  %v3626_v11 = vsel %vm3399_vm10, %v3625_v0, %v3621_v5 }
 0x3aa   : > { %v3436_v59 = vsel %vm3399_vm10, %v3435_v9, %v3431_v62  ;;  %v3656_v30 = vsel %vm3468_vm13, %v3617_v57, %v3655_v36  ;;  %v3467_v31 = vsel %vm3466_vm12, %v3418_v49, %v3465_v63  ;;  %v3644_v18 = vsel %vm3399_vm10, %v3643_v22, %v3639_v53  ;;  %v8252_v57 = vld [vmem:[#allocation23_spill] sm:$0xff] }
 0x3ab   : > { %3930 = vadd.xlane.f32.xlu0 %v8249_v58  ;;  %4104 = vadd.xlane.f32.xlu1 %v8250_v48  ;;  %v7788_v16 = vpop.xlane.xlu1 %3702  ;;  %v3445_v39 = vsel %vm3399_vm10, %v3444_v1, %v3440_v20  ;;  %v3469_v61 = vsel %vm3468_vm13, %v3427_v38, %v3467_v31  ;;  %v3657_v5 = vsel %vm3470_vm14, %v3626_v11, %v3656_v30  ;;  %v8254_v38 = vld [vmem:[#allocation34_spill] sm:$0xff] }
 0x3ac   : > { %v3365_v7 = vpop.xlane.xlu0 %3364  ;;  %v3471_v6 = vsel %vm3470_vm14, %v3436_v59, %v3469_v61  ;;  %v3653_v20 = vsel %vm3399_vm10, %v3652_v33, %v3648_v55  ;;  %v3658_v13 = vsel %vm3472_vm15, %v3635_v2, %v3657_v5  ;;  %v8255_v2 = vld [vmem:[#allocation35_spill] sm:$0xff] }
 0x3ad   : > { %v3453_v34 = vrot.slane %v3365_v7, %v8247_v32  ;;  %v3473_v14 = vsel %vm3472_vm15, %v3445_v39, %v3471_v6 }
 0x3af   : > { %4107 = vadd.xlane.f32.xlu0 %v8251_v46  ;;  %4281 = vadd.xlane.f32.xlu1 %v7425_v52  ;;  %v3709_v23 = vpop.xlane.xlu1 %3708  ;;  %v3454_v24 = vsel %vm3399_vm10, %v3453_v34, %v3449_v45  ;;  %v3768_v34 = vrot.slane %v7788_v16, %v8246_v43 }
 0x3b0   : > { %v3371_v28 = vpop.xlane.xlu0 %3370  ;;  %v3475_v45 = vsel %vm3474_vm0, %v3454_v24, %v3473_v14  ;;  %v3777_v42 = vrot.slane %v3709_v23, %v8246_v43 }
 0x3b1   : > { %v3462_v52 = vrot.slane %v3371_v28, %v8247_v32 }
 0x3b3   : > { %4284 = vadd.xlane.f32.xlu0 %v7432_v19  ;;  %4458 = vadd.xlane.f32.xlu1 %v7517_v15  ;;  %v3715_v62 = vpop.xlane.xlu1 %3714  ;;  %v3463_v48 = vsel %vm3399_vm10, %v3462_v52, %v3458_v27  ;;  %v3659_v19 = vsel %vm3474_vm0, %v3644_v18, %v3658_v13 }
 0x3b4   : > { %v3706_v58 = vpop.xlane.xlu0 %3705  ;;  %v3477_v53 = vsel %vm3476_vm1, %v3463_v48, %v3475_v45  ;;  %v3660_v41 = vsel %vm3476_vm1, %v3653_v20, %v3659_v19  ;;  %v3786_v49 = vrot.slane %v3715_v62, %v8246_v43  ;;  %v8256_v45 = vld [vmem:[#allocation36_spill] sm:$0xff] }
 0x3b5   : > { %v3479_v7 = vsel %vm689_vm7, %v3477_v53, 0.0  ;;  %v3662_v51 = vsel %vm689_vm7, %v3660_v41, 0.0  ;;  %v3772_v35 = vrot.slane %v3706_v58, %v8247_v32 }
 0x3b7   : > { %4461 = vadd.xlane.f32.xlu0 %v7543_v54  ;;  %4635 = vadd.xlane.f32.xlu1 %v7617_v25  ;;  %v3721_v15 = vpop.xlane.xlu1 %3720  ;;  %v3773_v33 = vsel %vm3399_vm10, %v3772_v35, %v3768_v34 }
 0x3b8   : > { %v3712_v27 = vpop.xlane.xlu0 %3711  ;;  %v3795_v46 = vrot.slane %v3721_v15, %v8246_v43 }
 0x3b9   : > { %v3781_v9 = vrot.slane %v3712_v27, %v8247_v32  ;;  %v8257_v27 = vld [vmem:[#allocation37_spill] sm:$0xff] }
 0x3bb   : > { %3480 = vadd.xlane.f32.xlu1 %v3479_v7  ;;  %3663 = vadd.xlane.f32.xlu0 %v3662_v51  ;;  %v3727_v12 = vpop.xlane.xlu1 %3726  ;;  %v3782_v36 = vsel %vm3399_vm10, %v3781_v9, %v3777_v42 }
 0x3bc   : > { %v3718_v0 = vpop.xlane.xlu0 %3717  ;;  %v3837_v11 = vsel %vm3464_vm11, %v3782_v36, %v3773_v33  ;;  %v3804_v16 = vrot.slane %v3727_v12, %v8246_v43 }
 0x3bd   : > { %v3790_v54 = vrot.slane %v3718_v0, %v8247_v32 }
 0x3bf   : > { %4110 = vadd.xlane.f32.xlu1 %v8252_v57  ;;  %4638 = vadd.xlane.f32.xlu0 %v7639_v3  ;;  %v3733_v25 = vpop.xlane.xlu1 %3732  ;;  %v3791_v55 = vsel %vm3399_vm10, %v3790_v54, %v3786_v49  ;;  %v8253_v3 = vld [vmem:[#allocation33_spill] sm:$0xff] }
 0x3c0   : > { %v3724_v1 = vpop.xlane.xlu0 %3723  ;;  %v3838_v52 = vsel %vm3466_vm12, %v3791_v55, %v3837_v11  ;;  %v3813_v24 = vrot.slane %v3733_v25, %v8246_v43 }
 0x3c1   : > { %v3799_v22 = vrot.slane %v3724_v1, %v8247_v32 }
 0x3c3   : > { %4287 = vadd.xlane.f32.xlu1 %v8253_v3  ;;  %4113 = vadd.xlane.f32.xlu0 %v8254_v38  ;;  %v3739_v23 = vpop.xlane.xlu1 %3738  ;;  %v3800_v28 = vsel %vm3399_vm10, %v3799_v22, %v3795_v46 }
 0x3c4   : > { %v3730_v63 = vpop.xlane.xlu0 %3729  ;;  %v3839_v30 = vsel %vm3468_vm13, %v3800_v28, %v3838_v52  ;;  %v3822_v48 = vrot.slane %v3739_v23, %v8246_v43 }
 0x3c5   : > { %v3808_v59 = vrot.slane %v3730_v63, %v8247_v32 }
 0x3c7   : > { %v3809_v31 = vsel %vm3399_vm10, %v3808_v59, %v3804_v16  ;;  %4464 = vadd.xlane.f32.xlu1 %v7545_v40  ;;  %4290 = vadd.xlane.f32.xlu0 %v8255_v2  ;;  %v7872_v39 = vpop.xlane.xlu1 %3744 }
 0x3c8   : > { %v3840_v61 = vsel %vm3470_vm14, %v3809_v31, %v3839_v30  ;;  %v3736_v18 = vpop.xlane.xlu0 %3735 }
 0x3c9   : > { %v3817_v62 = vrot.slane %v3736_v18, %v8247_v32 }
 0x3cb   : > { %v3818_v5 = vsel %vm3399_vm10, %v3817_v62, %v3813_v24  ;;  %4641 = vadd.xlane.f32.xlu1 %v7649_v26  ;;  %4467 = vadd.xlane.f32.xlu0 %v7549_v37  ;;  %v3889_v6 = vpop.xlane.xlu1 %3888 }
 0x3cc   : > { %v3742_v58 = vpop.xlane.xlu0 %3741  ;;  %v3841_v40 = vsel %vm3472_vm15, %v3818_v5, %v3840_v61  ;;  %v3955_v14 = vrot.slane %v3889_v6, %v8247_v32 }
 0x3cd   : > { %v3826_v20 = vrot.slane %v3742_v58, %v8247_v32 }
 0x3cf   : > { %v3827_v13 = vsel %vm3399_vm10, %v3826_v20, %v3822_v48  ;;  %4293 = vadd.xlane.f32.xlu1 %v8256_v45  ;;  %4644 = vadd.xlane.f32.xlu0 %v7651_v4  ;;  %v3895_v19 = vpop.xlane.xlu1 %3894 }
 0x3d0   : > { %v3886_v26 = vpop.xlane.xlu0 %3885  ;;  %v7888_v37 = vsel %vm3474_vm0, %v3827_v13, %v3841_v40  ;;  %v3964_v53 = vrot.slane %v3895_v19, %v8247_v32 }
 0x3d1   : > { %v3951_v15 = vrot.slane %v3886_v26, %v8246_v43 }
 0x3d3   : > { %v3956_v41 = vsel %vm3399_vm10, %v3955_v14, %v3951_v15  ;;  %4470 = vadd.xlane.f32.xlu1 %v7551_v29  ;;  %4296 = vadd.xlane.f32.xlu0 %v8257_v27  ;;  %v3901_v7 = vpop.xlane.xlu1 %3900 }
 0x3d4   : > { %v3892_v51 = vpop.xlane.xlu0 %3891  ;;  %v3973_v57 = vrot.slane %v3901_v7, %v8247_v32 }
 0x3d5   : > { %v3960_v12 = vrot.slane %v3892_v51, %v8246_v43 }
 0x3d7   : > { %v3965_v4 = vsel %vm3399_vm10, %v3964_v53, %v3960_v12  ;;  %4647 = vadd.xlane.f32.xlu1 %v7655_v17  ;;  %4473 = vadd.xlane.f32.xlu0 %v7653_v50  ;;  %v4072_v0 = vpop.xlane.xlu1 %4071 }
 0x3d8   : > { %v4020_v9 = vsel %vm3464_vm11, %v3965_v4, %v3956_v41  ;;  %v3898_v54 = vpop.xlane.xlu0 %3897  ;;  %v4138_v25 = vrot.slane %v4072_v0, %v8247_v32 }
 0x3d9   : > { %v3969_v29 = vrot.slane %v3898_v54, %v8246_v43 }
 0x3db   : > { %v3974_v42 = vsel %vm3399_vm10, %v3973_v57, %v3969_v29  ;;  %4476 = vadd.xlane.f32.xlu1 %v7657_v44  ;;  %4650 = vadd.xlane.f32.xlu0 %v7679_v47  ;;  %v4078_v35 = vpop.xlane.xlu1 %4077 }
 0x3dc   : > { %v4021_v17 = vsel %vm3466_vm12, %v3974_v42, %v4020_v9  ;;  %v4069_v50 = vpop.xlane.xlu0 %4068  ;;  %v4147_v49 = vrot.slane %v4078_v35, %v8247_v32 }
 0x3dd   : > { %v4134_v1 = vrot.slane %v4069_v50, %v8246_v43 }
 0x3df   : > { %v4139_v22 = vsel %vm3399_vm10, %v4138_v25, %v4134_v1  ;;  %4653 = vadd.xlane.f32.xlu1 %v7685_v10  ;;  %4479 = vadd.xlane.f32.xlu0 %v7693_v21  ;;  %v3907_v34 = vpop.xlane.xlu1 %3906 }
 0x3e0   : > { %v4075_v46 = vpop.xlane.xlu0 %4074  ;;  %v3982_v38 = vrot.slane %v3907_v34, %v8247_v32 }
 0x3e1   : > { %v4143_v44 = vrot.slane %v4075_v46, %v8246_v43 }
 0x3e3   : > { %v4148_v47 = vsel %vm3399_vm10, %v4147_v49, %v4143_v44  ;;  %4656 = vadd.xlane.f32.xlu0 %v7707_v8  ;;  %4659 = vadd.xlane.f32.xlu1 %v7711_v56  ;;  %v4084_v36 = vpop.xlane.xlu1 %4083 }
 0x3e4   : > { %v4203_v55 = vsel %vm3464_vm11, %v4148_v47, %v4139_v22  ;;  %v3904_v3 = vpop.xlane.xlu0 %3903  ;;  %v4156_v8 = vrot.slane %v4084_v36, %v8247_v32 }
 0x3e5   : > { %v3978_v10 = vrot.slane %v3904_v3, %v8246_v43 }
 0x3e7   : > { %v3983_v21 = vsel %vm3399_vm10, %v3982_v38, %v3978_v10  ;;  %4662 = vadd.xlane.f32.xlu0 %v7713_v60  ;;  %v4255_v23 = vpop.xlane.xlu1 %4254 }
 0x3e8   : > { %v4022_v33 = vsel %vm3468_vm13, %v3983_v21, %v4021_v17  ;;  %v4081_v28 = vpop.xlane.xlu0 %4080  ;;  %v4321_v63 = vrot.slane %v4255_v23, %v8247_v32 }
 0x3e9   : > { %v4152_v56 = vrot.slane %v4081_v28, %v8246_v43 }
 0x3eb   : > { %v4157_v11 = vsel %vm3399_vm10, %v4156_v8, %v4152_v56  ;;  %v4261_v16 = vpop.xlane.xlu1 %4260 }
 0x3ec   : > { %v4204_v59 = vsel %vm3466_vm12, %v4157_v11, %v4203_v55  ;;  %v4252_v52 = vpop.xlane.xlu0 %4251  ;;  %v4330_v60 = vrot.slane %v4261_v16, %v8247_v32 }
 0x3ed   : > { %v4317_v30 = vrot.slane %v4252_v52, %v8246_v43 }
 0x3ef   : > { %v4322_v31 = vsel %vm3399_vm10, %v4321_v63, %v4317_v30  ;;  %v3913_v2 = vpop.xlane.xlu1 %3912 }
 0x3f0   : > { %v4258_v61 = vpop.xlane.xlu0 %4257  ;;  %v3991_v58 = vrot.slane %v3913_v2, %v8247_v32 }
 0x3f1   : > { %v4326_v18 = vrot.slane %v4258_v61, %v8246_v43 }
 0x3f3   : > { %v4331_v24 = vsel %vm3399_vm10, %v4330_v60, %v4326_v18  ;;  %v4090_v5 = vpop.xlane.xlu1 %4089 }
 0x3f4   : > { %v4386_v62 = vsel %vm3464_vm11, %v4331_v24, %v4322_v31  ;;  %v3910_v6 = vpop.xlane.xlu0 %3909  ;;  %v4165_v13 = vrot.slane %v4090_v5, %v8247_v32 }
 0x3f5   : > { %v3987_v40 = vrot.slane %v3910_v6, %v8246_v43  ;;  %v3831_v6 = vrot.slane %v7872_v39, %v8246_v43 }
 0x3f7   : > { %v3992_v48 = vsel %vm3399_vm10, %v3991_v58, %v3987_v40  ;;  %v4267_v19 = vpop.xlane.xlu1 %4266 }
 0x3f8   : > { %v7937_v20 = vsel %vm3470_vm14, %v3992_v48, %v4022_v33  ;;  %v4087_v14 = vpop.xlane.xlu0 %4086  ;;  %v4339_v41 = vrot.slane %v4267_v19, %v8247_v32 }
 0x3f9   : > { %v4161_v45 = vrot.slane %v4087_v14, %v8246_v43 }
 0x3fb   : > { %v4166_v26 = vsel %vm3399_vm10, %v4165_v13, %v4161_v45 }
 0x3fc   : > { %v4205_v15 = vsel %vm3468_vm13, %v4166_v26, %v4204_v59  ;;  %v4264_v53 = vpop.xlane.xlu0 %4263 }
 0x3fd   : > { %v4335_v27 = vrot.slane %v4264_v53, %v8246_v43 }
 0x3ff   : > { %v4340_v7 = vsel %vm3399_vm10, %v4339_v41, %v4335_v27 }
 0x400   : > { %v4387_v51 = vsel %vm3466_vm12, %v4340_v7, %v4386_v62  ;;  %v4435_v12 = vpop.xlane.xlu0 %4434  ;;  %v4438_v4 = vpop.xlane.xlu1 %4437 }
 0x401   : > { %v4500_v0 = vrot.slane %v4435_v12, %v8246_v43  ;;  %v4504_v9 = vrot.slane %v4438_v4, %v8247_v32 }
 0x403   : > { %v4505_v54 = vsel %vm3399_vm10, %v4504_v9, %v4500_v0 }
 0x404   : > { %v4441_v57 = vpop.xlane.xlu0 %4440  ;;  %v4444_v29 = vpop.xlane.xlu1 %4443 }
 0x405   : > { %v4509_v25 = vrot.slane %v4441_v57, %v8246_v43  ;;  %v4513_v42 = vrot.slane %v4444_v29, %v8247_v32 }
 0x407   : > { %v4514_v35 = vsel %vm3399_vm10, %v4513_v42, %v4509_v25 }
 0x408   : > { %v4569_v17 = vsel %vm3464_vm11, %v4514_v35, %v4505_v54  ;;  %v3916_v50 = vpop.xlane.xlu0 %3915  ;;  %v3919_v1 = vpop.xlane.xlu1 %3918 }
 0x409   : > { %v3996_v27 = vrot.slane %v3916_v50, %v8246_v43  ;;  %v4000_v7 = vrot.slane %v3919_v1, %v8247_v32 }
 0x40b   : > { %v4001_v0 = vsel %vm3399_vm10, %v4000_v7, %v3996_v27 }
 0x40c   : > { %v4093_v49 = vpop.xlane.xlu0 %4092  ;;  %v4096_v22 = vpop.xlane.xlu1 %4095  ;;  %v4024_v42 = vsel %vm3472_vm15, %v4001_v0, %v7937_v20 }
 0x40d   : > { %v4170_v34 = vrot.slane %v4093_v49, %v8246_v43  ;;  %v4174_v46 = vrot.slane %v4096_v22, %v8247_v32 }
 0x40f   : > { %v4175_v44 = vsel %vm3399_vm10, %v4174_v46, %v4170_v34 }
 0x410   : > { %v7958_v47 = vsel %vm3470_vm14, %v4175_v44, %v4205_v15  ;;  %v4270_v36 = vpop.xlane.xlu0 %4269  ;;  %v4273_v55 = vpop.xlane.xlu1 %4272 }
 0x411   : > { %v4344_v3 = vrot.slane %v4270_v36, %v8246_v43  ;;  %v4348_v38 = vrot.slane %v4273_v55, %v8247_v32 }
 0x413   : > { %v4349_v10 = vsel %vm3399_vm10, %v4348_v38, %v4344_v3 }
 0x414   : > { %v7964_v21 = vsel %vm3468_vm13, %v4349_v10, %v4387_v51  ;;  %v4447_v23 = vpop.xlane.xlu0 %4446  ;;  %v4450_v33 = vpop.xlane.xlu1 %4449 }
 0x415   : > { %v4518_v28 = vrot.slane %v4447_v23, %v8246_v43  ;;  %v4522_v8 = vrot.slane %v4450_v33, %v8247_v32 }
 0x417   : > { %v4523_v56 = vsel %vm3399_vm10, %v4522_v8, %v4518_v28 }
 0x418   : > { %v7970_v63 = vsel %vm3466_vm12, %v4523_v56, %v4569_v17  ;;  %v4618_v11 = vpop.xlane.xlu0 %4617  ;;  %v4621_v16 = vpop.xlane.xlu1 %4620 }
 0x419   : > { %v4683_v59 = vrot.slane %v4618_v11, %v8246_v43  ;;  %v4687_v52 = vrot.slane %v4621_v16, %v8247_v32 }
 0x41b   : > { %v4688_v30 = vsel %vm3399_vm10, %v4687_v52, %v4683_v59 }
 0x41c   : > { %v4624_v60 = vpop.xlane.xlu0 %4623  ;;  %v4627_v31 = vpop.xlane.xlu1 %4626 }
 0x41d   : > { %v4692_v2 = vrot.slane %v4624_v60, %v8246_v43  ;;  %v4696_v61 = vrot.slane %v4627_v31, %v8247_v32 }
 0x41f   : > { %v4697_v18 = vsel %vm3399_vm10, %v4696_v61, %v4692_v2 }
 0x420   : > { %v7979_v24 = vsel %vm3464_vm11, %v4697_v18, %v4688_v30  ;;  %v3748_v62 = vpop.xlane.xlu0 %3747  ;;  %v3922_v5 = vpop.xlane.xlu1 %3921 }
 0x421   : > { %v3835_v58 = vrot.slane %v3748_v62, %v8247_v32  ;;  %v4005_v4 = vrot.slane %v3922_v5, %v8246_v43 }
 0x423   : > { %v3836_v40 = vsel %vm3399_vm10, %v3835_v58, %v3831_v6 }
 0x424   : > { %v3925_v48 = vpop.xlane.xlu0 %3924  ;;  %v4099_v14 = vpop.xlane.xlu1 %4098  ;;  %v3843_v13 = vsel %vm3476_vm1, %v3836_v40, %v7888_v37 }
 0x425   : > { %v3845_v45 = vsel %vm689_vm7, %v3843_v13, 0.0  ;;  %v4009_v51 = vrot.slane %v3925_v48, %v8247_v32  ;;  %v4179_v28 = vrot.slane %v4099_v14, %v8246_v43 }
 0x426   : > { %3846 = vadd.xlane.f32.xlu1 %v3845_v45 }
 0x427   : > { %v4010_v9 = vsel %vm3399_vm10, %v4009_v51, %v4005_v4 }
 0x428   : > { %v4102_v19 = vpop.xlane.xlu0 %4101  ;;  %v7988_v26 = vpop.xlane.xlu1 %4275  ;;  %v4025_v17 = vsel %vm3474_vm0, %v4010_v9, %v4024_v42 }
 0x429   : > { %v4183_v38 = vrot.slane %v4102_v19, %v8247_v32 }
 0x42b   : > { %v4184_v56 = vsel %vm3399_vm10, %v4183_v38, %v4179_v28 }
 0x42c   : > { %v4279_v15 = vpop.xlane.xlu0 %4278  ;;  %v7990_v53 = vpop.xlane.xlu1 %4452  ;;  %v4207_v60 = vsel %vm3472_vm15, %v4184_v56, %v7958_v47  ;;  %v4353_v47 = vrot.slane %v7988_v26, %v8246_v43 }
 0x42d   : > { %v4357_v40 = vrot.slane %v4279_v15, %v8247_v32 }
 0x42f   : > { %v4358_v27 = vsel %vm3399_vm10, %v4357_v40, %v4353_v47 }
 0x430   : > { %v7992_v41 = vpop.xlane.xlu0 %4455  ;;  %v7994_v39 = vpop.xlane.xlu1 %4629  ;;  %v4389_v0 = vsel %vm3470_vm14, %v4358_v27, %v7964_v21 }
 0x434   : > { %v7999_v37 = vpop.xlane.xlu0 %4632  ;;  %v3928_v12 = vpop.xlane.xlu1 %3927 }
 0x435   : > { %v4014_v29 = vrot.slane %v3928_v12, %v8246_v43 }
 0x438   : > { %v3931_v54 = vpop.xlane.xlu0 %3930  ;;  %v4105_v57 = vpop.xlane.xlu1 %4104 }
 0x439   : > { %v4018_v25 = vrot.slane %v3931_v54, %v8247_v32  ;;  %v4188_v8 = vrot.slane %v4105_v57, %v8246_v43 }
 0x43b   : > { %v4019_v35 = vsel %vm3399_vm10, %v4018_v25, %v4014_v29 }
 0x43c   : > { %v4108_v50 = vpop.xlane.xlu0 %4107  ;;  %v4282_v1 = vpop.xlane.xlu1 %4281  ;;  %v4026_v49 = vsel %vm3476_vm1, %v4019_v35, %v4025_v17  ;;  %v4531_v17 = vrot.slane %v7992_v41, %v8247_v32 }
 0x43d   : > { %v4028_v22 = vsel %vm689_vm7, %v4026_v49, 0.0  ;;  %v4192_v10 = vrot.slane %v4108_v50, %v8247_v32  ;;  %v4362_v19 = vrot.slane %v4282_v1, %v8246_v43  ;;  %v4527_v1 = vrot.slane %v7990_v53, %v8246_v43 }
 0x43e   : > { %4029 = vadd.xlane.f32.xlu0 %v4028_v22 }
 0x43f   : > { %v4193_v11 = vsel %vm3399_vm10, %v4192_v10, %v4188_v8  ;;  %v4532_v41 = vsel %vm3399_vm10, %v4531_v17, %v4527_v1  ;;  %v4929_v1 = vld [vmem:[%s8130_s4] ss:$0 sm:$0xff] }
 0x440   : > { %v4285_v34 = vpop.xlane.xlu0 %4284  ;;  %v8012_v46 = vpop.xlane.xlu1 %4458  ;;  %v4208_v2 = vsel %vm3474_vm0, %v4193_v11, %v4207_v60  ;;  %v4571_v53 = vsel %vm3468_vm13, %v4532_v41, %v7970_v63 }
 0x441   : > { %v4366_v48 = vrot.slane %v4285_v34, %v8247_v32  ;;  %v4536_v22 = vrot.slane %v8012_v46, %v8246_v43  ;;  %v4705_v46 = vrot.slane %v7999_v37, %v8247_v32 }
 0x443   : > { %v4367_v51 = vsel %vm3399_vm10, %v4366_v48, %v4362_v19 }
 0x444   : > { %v8014_v44 = vpop.xlane.xlu0 %4461  ;;  %v8016_v36 = vpop.xlane.xlu1 %4635  ;;  %v4390_v54 = vsel %vm3472_vm15, %v4367_v51, %v4389_v0 }
 0x445   : > { %v4540_v21 = vrot.slane %v8014_v44, %v8247_v32  ;;  %v4710_v60 = vrot.slane %v8016_v36, %v8246_v43 }
 0x447   : > { %v4541_v10 = vsel %vm3399_vm10, %v4540_v21, %v4536_v22 }
 0x448   : > { %v3664_v55 = vpop.xlane.xlu0 %3663  ;;  %v3481_v20 = vpop.xlane.xlu1 %3480  ;;  %v4572_v11 = vsel %vm3470_vm14, %v4541_v10, %v4571_v53 }
 0x449   : > { %v8019_v3 = vsel %vm1237_vm5, %v3481_v20, %v3664_v55  ;;  %vm4770_vm5 = vcmask 39936  }
 0x44c   : > { %v8023_v23 = vpop.xlane.xlu0 %4638  ;;  %v4111_v33 = vpop.xlane.xlu1 %4110 }
 0x44d   : > { %v4197_v52 = vrot.slane %v4111_v33, %v8246_v43 }
 0x450   : > { %v4114_v16 = vpop.xlane.xlu0 %4113  ;;  %v4288_v59 = vpop.xlane.xlu1 %4287 }
 0x451   : > { %v4201_v30 = vrot.slane %v4114_v16, %v8247_v32  ;;  %v4371_v7 = vrot.slane %v4288_v59, %v8246_v43  ;;  %v4714_v16 = vrot.slane %v8023_v23, %v8247_v32 }
 0x453   : > { %v4202_v31 = vsel %vm3399_vm10, %v4201_v30, %v4197_v52  ;;  %v4701_v30 = vrot.slane %v7994_v39, %v8246_v43 }
 0x454   : > { %v4291_v61 = vpop.xlane.xlu0 %4290  ;;  %v4465_v18 = vpop.xlane.xlu1 %4464  ;;  %v4209_v62 = vsel %vm3476_vm1, %v4202_v31, %v4208_v2 }
 0x455   : > { %v4211_v5 = vsel %vm689_vm7, %v4209_v62, 0.0  ;;  %v4375_v14 = vrot.slane %v4291_v61, %v8247_v32  ;;  %v4545_v38 = vrot.slane %v4465_v18, %v8246_v43  ;;  %v4706_v61 = vsel %vm3399_vm10, %v4705_v46, %v4701_v30 }
 0x456   : > { %4212 = vadd.xlane.f32.xlu1 %v4211_v5  ;;  %v4715_v5 = vsel %vm3399_vm10, %v4714_v16, %v4710_v60 }
 0x457   : > { %v4376_v12 = vsel %vm3399_vm10, %v4375_v14, %v4371_v7 }
 0x458   : > { %v4468_v6 = vpop.xlane.xlu0 %4467  ;;  %v8037_v58 = vpop.xlane.xlu1 %4641  ;;  %v4391_v29 = vsel %vm3474_vm0, %v4376_v12, %v4390_v54 }
 0x459   : > { %v4549_v49 = vrot.slane %v4468_v6, %v8247_v32  ;;  %v4719_v18 = vrot.slane %v8037_v58, %v8246_v43  ;;  %v4753_v58 = vsel %vm3466_vm12, %v4706_v61, %v7979_v24 }
 0x45b   : > { %v4550_v33 = vsel %vm3399_vm10, %v4549_v49, %v4545_v38 }
 0x45c   : > { %v4645_v13 = vpop.xlane.xlu0 %4644  ;;  %v4294_v45 = vpop.xlane.xlu1 %4293  ;;  %v4573_v37 = vsel %vm3472_vm15, %v4550_v33, %v4572_v11 }
 0x45d   : > { %v4380_v26 = vrot.slane %v4294_v45, %v8246_v43  ;;  %v4723_v63 = vrot.slane %v4645_v13, %v8247_v32  ;;  %v4754_v45 = vsel %vm3468_vm13, %v4715_v5, %v4753_v58 }
 0x45f   : > { %v4724_v48 = vsel %vm3399_vm10, %v4723_v63, %v4719_v18 }
 0x460   : > { %v4297_v15 = vpop.xlane.xlu0 %4296  ;;  %v4471_v4 = vpop.xlane.xlu1 %4470  ;;  %v4755_v7 = vsel %vm3470_vm14, %v4724_v48, %v4754_v45 }
 0x461   : > { %v4384_v9 = vrot.slane %v4297_v15, %v8247_v32  ;;  %v4554_v44 = vrot.slane %v4471_v4, %v8246_v43 }
 0x463   : > { %v4385_v57 = vsel %vm3399_vm10, %v4384_v9, %v4380_v26 }
 0x464   : > { %v4474_v25 = vpop.xlane.xlu0 %4473  ;;  %v4648_v42 = vpop.xlane.xlu1 %4647  ;;  %v4392_v35 = vsel %vm3476_vm1, %v4385_v57, %v4391_v29 }
 0x465   : > { %v4394_v50 = vsel %vm689_vm7, %v4392_v35, 0.0  ;;  %v4558_v34 = vrot.slane %v4474_v25, %v8247_v32  ;;  %v4728_v6 = vrot.slane %v4648_v42, %v8246_v43 }
 0x466   : > { %4395 = vadd.xlane.f32.xlu0 %v4394_v50 }
 0x467   : > { %v4559_v28 = vsel %vm3399_vm10, %v4558_v34, %v4554_v44 }
 0x468   : > { %v4651_v55 = vpop.xlane.xlu0 %4650  ;;  %v4477_v20 = vpop.xlane.xlu1 %4476  ;;  %v4574_v23 = vsel %vm3474_vm0, %v4559_v28, %v4573_v37 }
 0x469   : > { %v4563_v59 = vrot.slane %v4477_v20, %v8246_v43  ;;  %v4732_v31 = vrot.slane %v4651_v55, %v8247_v32 }
 0x46b   : > { %v4733_v13 = vsel %vm3399_vm10, %v4732_v31, %v4728_v6 }
 0x46c   : > { %v4480_v8 = vpop.xlane.xlu0 %4479  ;;  %v4654_v56 = vpop.xlane.xlu1 %4653  ;;  %v4756_v15 = vsel %vm3472_vm15, %v4733_v13, %v4755_v7 }
 0x46d   : > { %v4567_v52 = vrot.slane %v4480_v8, %v8247_v32  ;;  %v4737_v47 = vrot.slane %v4654_v56, %v8246_v43 }
 0x46f   : > { %v4568_v2 = vsel %vm3399_vm10, %v4567_v52, %v4563_v59 }
 0x470   : > { %v4657_v62 = vpop.xlane.xlu0 %4656  ;;  %v4575_v39 = vsel %vm3476_vm1, %v4568_v2, %v4574_v23  ;;  %v4660_v14 = vpop.xlane.xlu1 %4659 }
 0x471   : > { %v4741_v36 = vrot.slane %v4657_v62, %v8247_v32  ;;  %v4577_v40 = vsel %vm689_vm7, %v4575_v39, 0.0  ;;  %v4746_v51 = vrot.slane %v4660_v14, %v8246_v43 }
 0x472   : > { %4578 = vadd.xlane.f32.xlu1 %v4577_v40 }
 0x473   : > { %v4742_v19 = vsel %vm3399_vm10, %v4741_v36, %v4737_v47 }
 0x474   : > { %v4663_v27 = vpop.xlane.xlu0 %4662  ;;  %v4757_v0 = vsel %vm3474_vm0, %v4742_v19, %v4756_v15 }
 0x475   : > { %v4750_v12 = vrot.slane %v4663_v27, %v8247_v32 }
 0x477   : > { %v4751_v4 = vsel %vm3399_vm10, %v4750_v12, %v4746_v51 }
 0x478   : > { %v4758_v24 = vsel %vm3476_vm1, %v4751_v4, %v4757_v0 }
 0x479   : > { %v4760_v26 = vsel %vm689_vm7, %v4758_v24, 0.0  ;;  %vm4816_vm7 = vcmask 64512  }
 0x47a   : > { %4761 = vadd.xlane.f32.xlu0 %v4760_v26 }
 0x4b3   : > { %v3847_v9 = vpop.xlane.xlu1 %3846 }
 0x4b4   : > { %v4765_v43 = vsel %vm4764_vm2, %v8019_v3, %v3847_v9 }
 0x4cb   : > { %v4030_v54 = vpop.xlane.xlu0 %4029 }
 0x4cc   : > { %v4767_v29 = vsel %vm4766_vm3, %v4765_v43, %v4030_v54 }
 0x4e3   : > { %v4213_v57 = vpop.xlane.xlu1 %4212 }
 0x4e4   : > { %v4769_v42 = vsel %vm4768_vm4, %v4767_v29, %v4213_v57 }
 0x4f3   : > { %v4396_v32 = vpop.xlane.xlu0 %4395 }
 0x4f4   : > { %v4771_v35 = vsel %vm4770_vm5, %v4769_v42, %v4396_v32 }
 0x4ff   : > { %v4579_v25 = vpop.xlane.xlu1 %4578 }
 0x500   : > { %v4773_v17 = vsel %vm4772_vm6, %v4771_v35, %v4579_v25 }
 0x507   : > { %v4762_v50 = vpop.xlane.xlu0 %4761 }
 0x508   : > { %v4775_v21 = vsel %vm4774_vm8, %v4773_v17, %v4762_v50 }
 0x509   : > { %4776 = vxpose.xlu1.b32.start.end [1/1] (short) (narrow) %v4775_v21, 8 }
 0x589   : > { %v4792_v49 = vpop.trf.xlu1 }
 0x58a   : > { %v4815_v3 = vadd.f32 %v4929_v1, %v4792_v49 }
 0x58c   : > { %v4817_v22 = vsel %vm4816_vm7, %v4815_v3, 0.0 }
 0x58d   : > { %4818 = vst [vmem:[%s222_s6] sm:$0xff] %v4817_v22 }
 0x58e PF: > { %s15_s18 = sadd.s32 1, %s5030_s18  }
 0x58f   : > { %p12_p4 = scmp.ge.s32.totalorder %s15_s18, 4  }
 0x591   :  { %14 = sbr.rel (!%p12_p4) target bundleno = 1 (0x1), region = 87 }

</bundles_post_ra>
